<compile_context>
chip_gen: v7x
topology: tpu7x:2x2x1
jax: 0.10.0
libtpu: 0.0.40
codegen_flags: <defaults>
</compile_context>

<pallas_src>
import jax
import jax.numpy as jnp
from jax.experimental import pallas as pl
from jax.experimental.pallas import tpu as pltpu

K = 3           # TNet "k"
N_POINTS = 128  # number of points (W of the Conv1d input)
BATCH = 2
BN_EPS = 1e-5
OUT_PAD = 128   # lane-dense padding of the k*k fc_3 output

# Channel widths of the six layers and lane-aligned offsets of their biases
# inside the single concatenated bias buffer.
_CH = (64, 128, 1024, 512, 256, OUT_PAD)


def _bias_layout():
    offs, off = [], 0
    for c in _CH:
        offs.append(off)
        off += ((c + 127) // 128) * 128
    return tuple(offs), off


_BOFF, BIAS_W = _bias_layout()


def _tnet_math(x, w1, w2, w3, b_all, f1w, f2w, f3w, B, N, k,
               wait_f1=None, wait_f2=None, wait_f3=None):
    """Forward math shared by the Pallas kernel and the pure-JAX reference.

    x:          (B*N, k) bf16 points-major input (batch fused into M).
    w1:         (k, 64) f32 conv_1 weight (VPU broadcast-FMA path).
    w2/w3:      bf16 (Cin, Cout) conv weights (MXU, f32 accumulation).
    b_all:      (1, BIAS_W) f32 concatenated biases (BN + eye(k) folded in).
    f1w/f2w/f3w: bf16 fc weights -- VMEM scratch refs in the kernel (filled by
                 async DMA), plain arrays in the reference.
    wait_*:     callables blocking on the matching DMA (kernel only).
    """
    def bias(i):
        return b_all[:, _BOFF[i]:_BOFF[i] + _CH[i]]

    # conv_1 (1x1, k=3) + folded bn_1 + relu: VPU broadcast-FMA formulation.
    h = bias(0)                                                    # (1, 64)
    for j in range(k):
        h = h + x[:, j:j + 1].astype(jnp.float32) * w1[j:j + 1, :]
    h = jnp.maximum(h, 0.0)

    # conv_2 + folded bn_2 + relu -> (B*N, 128): bf16 MXU, f32 acc.
    h = jnp.dot(h.astype(jnp.bfloat16), w2[...],
                preferred_element_type=jnp.float32) + bias(1)
    h = jnp.maximum(h, 0.0)

    # conv_3 + folded bn_3 + relu -> (B*N, 1024); cast the largest activation
    # to bf16 before the pool (halves vreg/VPU traffic and VMEM footprint).
    h = jnp.dot(h.astype(jnp.bfloat16), w3[...],
                preferred_element_type=jnp.float32) + bias(2)
    h = jnp.maximum(h, 0.0).astype(jnp.bfloat16)

    # MaxPool1d over the N points of each batch element -> (B, 1024) bf16.
    g = jnp.max(h.reshape(B, N, h.shape[-1]), axis=1)

    # fc_1 + folded bn_4 + relu -> (B, 512)
    if wait_f1 is not None:
        wait_f1()
    f = jnp.dot(g, f1w[...], preferred_element_type=jnp.float32) + bias(3)
    f = jnp.maximum(f, 0.0)

    # fc_2 + folded bn_5 + relu -> (B, 256)
    if wait_f2 is not None:
        wait_f2()
    f = jnp.dot(f.astype(jnp.bfloat16), f2w[...],
                preferred_element_type=jnp.float32) + bias(4)
    f = jnp.maximum(f, 0.0)

    # fc_3 (+ folded identity), lane-dense padded -> (B, OUT_PAD)
    if wait_f3 is not None:
        wait_f3()
    f = jnp.dot(f.astype(jnp.bfloat16), f3w[...],
                preferred_element_type=jnp.float32) + bias(5)
    return f


def make_tnet_kernel(B, N, k):
    def tnet_kernel(x_ref, w1_ref, w2_ref, w3_ref, b_ref,
                    f1w_hbm, f2w_hbm, f3w_hbm,
                    out_ref,
                    f1w_vmem, f2w_vmem, f3w_vmem, sem):
        # Kick off the fc-weight HBM->VMEM DMAs first so ~1.3 MiB of weight
        # traffic streams in underneath the conv_1..conv_3 compute.
        cp1 = pltpu.make_async_copy(f1w_hbm, f1w_vmem, sem.at[0])
        cp2 = pltpu.make_async_copy(f2w_hbm, f2w_vmem, sem.at[1])
        cp3 = pltpu.make_async_copy(f3w_hbm, f3w_vmem, sem.at[2])
        cp1.start()
        cp2.start()
        cp3.start()

        out_ref[...] = _tnet_math(
            x_ref[...], w1_ref, w2_ref, w3_ref, b_ref,
            f1w_vmem, f2w_vmem, f3w_vmem, B, N, k,
            wait_f1=cp1.wait, wait_f2=cp2.wait, wait_f3=cp3.wait)
    return tnet_kernel


def tnet_forward(x_bkn, kparams, k=K):
    """x_bkn: (B, k, N) float32, same layout as the PyTorch Conv1d input."""
    B, kk, N = x_bkn.shape
    assert kk == k
    # (B, k, N) -> points-major (B*N, k) bf16: batch fused into the matmul M
    # dim; bf16 halves the lane-padded input DMA.
    x = jnp.transpose(x_bkn, (0, 2, 1)).reshape(B * N, k).astype(jnp.bfloat16)

    w1, w2, w3, b_all, f1w, f2w, f3w = kparams

    vmem = pl.BlockSpec(memory_space=pltpu.MemorySpace.VMEM)
    hbm = pl.BlockSpec(memory_space=pl.ANY)   # fc weights: manual async copy

    flops = (2 * B * N * (k * 64 + 64 * 128 + 128 * 1024)
             + 2 * B * (1024 * 512 + 512 * 256 + 256 * k * k))
    bytes_accessed = (int(x.size) * x.dtype.itemsize
                      + sum(int(p.size) * p.dtype.itemsize for p in kparams)
                      + B * OUT_PAD * 4)

    out = pl.pallas_call(
        make_tnet_kernel(B, N, k),
        out_shape=jax.ShapeDtypeStruct((B, OUT_PAD), jnp.float32),
        in_specs=[vmem, vmem, vmem, vmem, vmem, hbm, hbm, hbm],
        out_specs=vmem,
        scratch_shapes=[
            pltpu.VMEM((1024, 512), jnp.bfloat16),      # fc_1 weight buffer
            pltpu.VMEM((512, 256), jnp.bfloat16),       # fc_2 weight buffer
            pltpu.VMEM((256, OUT_PAD), jnp.bfloat16),   # fc_3 weight buffer
            pltpu.SemaphoreType.DMA((3,)),
        ],
        cost_estimate=pl.CostEstimate(flops=flops, transcendentals=0,
                                      bytes_accessed=int(bytes_accessed)),
    )(x, w1, w2, w3, b_all, f1w, f2w, f3w)

    # eye(k) is already folded into the fc_3 bias; just slice the real lanes.
    return out[:, : k * k].reshape(B, k, k)


def make_params(key, k=K):
    """Deterministic synthetic parameters matching TNet.__init__ shapes.

    Eval-mode BatchNorm (gamma, beta, running_mean, running_var) is folded
    into the conv/fc weights using the running statistics; the module's final
    '+ eye(k)' is folded into the fc_3 bias.  MXU-layer weights (conv_2/3,
    fc_1/2/3) are bf16; conv_1 weight (VPU path) and all biases stay f32.
    The six biases are concatenated into one lane-aligned (1, BIAS_W) f32
    buffer, and fc_3 weight/bias are padded to OUT_PAD lanes."""
    dims = [(64, k), (128, 64), (1024, 128),
            (512, 1024), (256, 512), (k * k, 256)]
    n_layers = len(dims)
    keys = jax.random.split(key, 2 * n_layers + 4 * 5)
    ki = iter(range(len(keys)))

    def nrm(shape, scale):
        return scale * jax.random.normal(keys[next(ki)], shape, dtype=jnp.float32)

    raw_w, raw_b = [], []
    for (co, ci) in dims:
        raw_w.append(nrm((co, ci), 0.1))
        raw_b.append(nrm((co,), 0.05))

    # Eval-mode BatchNorm parameters for bn_1..bn_5.
    bn_ch = [64, 128, 1024, 512, 256]
    gammas, betas, means, variances = [], [], [], []
    for c in bn_ch:
        gammas.append(1.0 + nrm((c,), 0.02))
        betas.append(nrm((c,), 0.02))
        means.append(nrm((c,), 0.1))
        variances.append(1.0 + jnp.abs(nrm((c,), 0.1)))

    weights, biases = [], []
    for i in range(n_layers):
        w, b = raw_w[i], raw_b[i]
        if i < 5:
            # y = gamma * (Wx + b - mean) / sqrt(var + eps) + beta
            scale = gammas[i] / jnp.sqrt(variances[i] + BN_EPS)
            w = w * scale[:, None]
            b = (b - means[i]) * scale + betas[i]
        w = jnp.transpose(w)            # (Cin, Cout) for (M,Cin)@(Cin,Cout)
        b = b[None, :]                  # (1, Cout)
        if i == n_layers - 1:
            # Lane-dense fc_3: pad to OUT_PAD lanes and fold in '+ eye(k)'.
            w = jnp.pad(w, ((0, 0), (0, OUT_PAD - w.shape[1])))
            b = jnp.pad(b, ((0, 0), (0, OUT_PAD - b.shape[1])))
            b = b.at[0, : k * k].add(jnp.eye(k, dtype=jnp.float32).reshape(-1))
        if i > 0:
            w = w.astype(jnp.bfloat16)  # MXU layers: bf16 weights, f32 biases
        weights.append(w)
        biases.append(b)

    # Concatenate the six biases into one lane-aligned f32 buffer.
    b_all = jnp.zeros((1, BIAS_W), dtype=jnp.float32)
    for i, b in enumerate(biases):
        b_all = b_all.at[0, _BOFF[i]:_BOFF[i] + b.shape[1]].set(b[0])

    w1, w2, w3, f1w, f2w, f3w = weights
    return (w1, w2, w3, b_all, f1w, f2w, f3w)


def tnet_reference(x_bkn, kparams, k=K):
    """Pure-JAX reference using the same folded/quantized parameters and the
    same math structure as the kernel (no DMA waits)."""
    B, kk, N = x_bkn.shape
    x = jnp.transpose(x_bkn, (0, 2, 1)).reshape(B * N, kk).astype(jnp.bfloat16)
    w1, w2, w3, b_all, f1w, f2w, f3w = kparams
    f = _tnet_math(x, w1, w2, w3, b_all, f1w, f2w, f3w, B, N, kk)
    return f[:, : k * k].reshape(B, k, k)


if __name__ == "__main__":
    key = jax.random.PRNGKey(0)
    kx, kp = jax.random.split(key)
    # Input in the PyTorch Conv1d layout: (batch, k, num_points)
    x = jax.random.normal(kx, (BATCH, K, N_POINTS), dtype=jnp.float32)
    params = make_params(kp)

    out = jax.block_until_ready(tnet_forward(x, params))
    ref = tnet_reference(x, params)

    assert out.shape == (BATCH, K, K)
    # NOTE: reference uses the same bf16-quantized weights/activations, so
    # this checks kernel correctness, not bf16-vs-f32 quantization error.
    assert jnp.allclose(out, ref, atol=2e-2, rtol=2e-2), "mismatch vs reference"
    print("KERNEL_OK")
</pallas_src>

<mosaic_0001>
module attributes {stable_mosaic.version = 11 : i64} {
  func.func @tnet_kernel(%arg0: memref<256x3xbf16, #tpu.memory_space<vmem>>, %arg1: memref<3x64xf32, #tpu.memory_space<vmem>>, %arg2: memref<64x128xbf16, #tpu.memory_space<vmem>>, %arg3: memref<128x1024xbf16, #tpu.memory_space<vmem>>, %arg4: memref<1x2176xf32, #tpu.memory_space<vmem>>, %arg5: memref<1024x512xbf16, #tpu.memory_space<any>>, %arg6: memref<512x256xbf16, #tpu.memory_space<any>>, %arg7: memref<256x128xbf16, #tpu.memory_space<any>>, %arg8: memref<2x128xf32, #tpu.memory_space<vmem>>, %arg9: memref<1024x512xbf16, #tpu.memory_space<vmem>>, %arg10: memref<512x256xbf16, #tpu.memory_space<vmem>>, %arg11: memref<256x128xbf16, #tpu.memory_space<vmem>>, %arg12: memref<3x!tpu.dma_semaphore, #tpu.memory_space<semaphore_mem>>) attributes {dimension_semantics = [], scalar_prefetch = 0 : i64, scratch_operands = 4 : i64, tpu.core_type = #tpu.core_type<tc>} {
    %c0_i32 = arith.constant 0 : i32
    %0 = tpu.memref_slice %arg12[%c0_i32] : memref<3x!tpu.dma_semaphore, #tpu.memory_space<semaphore_mem>> -> memref<1x!tpu.dma_semaphore, #tpu.memory_space<semaphore_mem>>
    %1 = tpu.memref_squeeze %0 : memref<1x!tpu.dma_semaphore, #tpu.memory_space<semaphore_mem>> -> memref<!tpu.dma_semaphore, #tpu.memory_space<semaphore_mem>>
    tpu.enqueue_dma source(%arg5 : memref<1024x512xbf16, #tpu.memory_space<any>>) target(%arg9 : memref<1024x512xbf16, #tpu.memory_space<vmem>>) target_semaphore(%1 : memref<!tpu.dma_semaphore, #tpu.memory_space<semaphore_mem>>)
    %c1_i32 = arith.constant 1 : i32
    %2 = tpu.memref_slice %arg12[%c1_i32] : memref<3x!tpu.dma_semaphore, #tpu.memory_space<semaphore_mem>> -> memref<1x!tpu.dma_semaphore, #tpu.memory_space<semaphore_mem>>
    %3 = tpu.memref_squeeze %2 : memref<1x!tpu.dma_semaphore, #tpu.memory_space<semaphore_mem>> -> memref<!tpu.dma_semaphore, #tpu.memory_space<semaphore_mem>>
    tpu.enqueue_dma source(%arg6 : memref<512x256xbf16, #tpu.memory_space<any>>) target(%arg10 : memref<512x256xbf16, #tpu.memory_space<vmem>>) target_semaphore(%3 : memref<!tpu.dma_semaphore, #tpu.memory_space<semaphore_mem>>)
    %c2_i32 = arith.constant 2 : i32
    %4 = tpu.memref_slice %arg12[%c2_i32] : memref<3x!tpu.dma_semaphore, #tpu.memory_space<semaphore_mem>> -> memref<1x!tpu.dma_semaphore, #tpu.memory_space<semaphore_mem>>
    %5 = tpu.memref_squeeze %4 : memref<1x!tpu.dma_semaphore, #tpu.memory_space<semaphore_mem>> -> memref<!tpu.dma_semaphore, #tpu.memory_space<semaphore_mem>>
    tpu.enqueue_dma source(%arg7 : memref<256x128xbf16, #tpu.memory_space<any>>) target(%arg11 : memref<256x128xbf16, #tpu.memory_space<vmem>>) target_semaphore(%5 : memref<!tpu.dma_semaphore, #tpu.memory_space<semaphore_mem>>)
    %c0 = arith.constant 0 : index
    %c0_0 = arith.constant 0 : index
    %6 = vector.load %arg0[%c0, %c0_0] : memref<256x3xbf16, #tpu.memory_space<vmem>>, vector<256x3xbf16>
    %c0_1 = arith.constant 0 : index
    %c0_2 = arith.constant 0 : index
    %7 = vector.load %arg4[%c0_1, %c0_2] : memref<1x2176xf32, #tpu.memory_space<vmem>>, vector<1x64xf32>
    %8 = vector.extract_strided_slice %6 {offsets = [0, 0], sizes = [256, 1], strides = [1, 1]} : vector<256x3xbf16> to vector<256x1xbf16>
    %9 = arith.extf %8 : vector<256x1xbf16> to vector<256x1xf32>
    %c0_3 = arith.constant 0 : index
    %c0_4 = arith.constant 0 : index
    %10 = vector.load %arg1[%c0_3, %c0_4] : memref<3x64xf32, #tpu.memory_space<vmem>>, vector<1x64xf32>
    %11 = vector.broadcast %9 : vector<256x1xf32> to vector<256x64xf32>
    %12 = vector.broadcast %10 : vector<1x64xf32> to vector<256x64xf32>
    %13 = arith.mulf %11, %12 : vector<256x64xf32>
    %14 = vector.broadcast %7 : vector<1x64xf32> to vector<256x64xf32>
    %15 = arith.addf %14, %13 : vector<256x64xf32>
    %16 = vector.extract_strided_slice %6 {offsets = [0, 1], sizes = [256, 1], strides = [1, 1]} : vector<256x3xbf16> to vector<256x1xbf16>
    %17 = arith.extf %16 : vector<256x1xbf16> to vector<256x1xf32>
    %c1 = arith.constant 1 : index
    %c0_5 = arith.constant 0 : index
    %18 = vector.load %arg1[%c1, %c0_5] : memref<3x64xf32, #tpu.memory_space<vmem>>, vector<1x64xf32>
    %19 = vector.broadcast %17 : vector<256x1xf32> to vector<256x64xf32>
    %20 = vector.broadcast %18 : vector<1x64xf32> to vector<256x64xf32>
    %21 = arith.mulf %19, %20 : vector<256x64xf32>
    %22 = arith.addf %15, %21 : vector<256x64xf32>
    %23 = vector.extract_strided_slice %6 {offsets = [0, 2], sizes = [256, 1], strides = [1, 1]} : vector<256x3xbf16> to vector<256x1xbf16>
    %24 = arith.extf %23 : vector<256x1xbf16> to vector<256x1xf32>
    %c2 = arith.constant 2 : index
    %c0_6 = arith.constant 0 : index
    %25 = vector.load %arg1[%c2, %c0_6] : memref<3x64xf32, #tpu.memory_space<vmem>>, vector<1x64xf32>
    %26 = vector.broadcast %24 : vector<256x1xf32> to vector<256x64xf32>
    %27 = vector.broadcast %25 : vector<1x64xf32> to vector<256x64xf32>
    %28 = arith.mulf %26, %27 : vector<256x64xf32>
    %29 = arith.addf %22, %28 : vector<256x64xf32>
    %cst = arith.constant 0.000000e+00 : f32
    %30 = vector.broadcast %cst : f32 to vector<256x64xf32>
    %31 = arith.maximumf %29, %30 : vector<256x64xf32>
    %32 = arith.truncf %31 : vector<256x64xf32> to vector<256x64xbf16>
    %c0_7 = arith.constant 0 : index
    %c0_8 = arith.constant 0 : index
    %33 = vector.load %arg2[%c0_7, %c0_8] : memref<64x128xbf16, #tpu.memory_space<vmem>>, vector<64x128xbf16>
    %cst_9 = arith.constant dense<0.000000e+00> : vector<256x128xf32>
    %34 = tpu.matmul %32, %33, %cst_9 {dimension_numbers = #tpu.dot_dimension_numbers<[1], [0], [0], [1], [0, 0, 1, 1], [], []>} : vector<256x64xbf16>, vector<64x128xbf16>, vector<256x128xf32> -> vector<256x128xf32>
    %c0_10 = arith.constant 0 : index
    %c128 = arith.constant 128 : index
    %35 = vector.load %arg4[%c0_10, %c128] : memref<1x2176xf32, #tpu.memory_space<vmem>>, vector<1x128xf32>
    %36 = vector.broadcast %35 : vector<1x128xf32> to vector<256x128xf32>
    %37 = arith.addf %34, %36 : vector<256x128xf32>
    %cst_11 = arith.constant 0.000000e+00 : f32
    %38 = vector.broadcast %cst_11 : f32 to vector<256x128xf32>
    %39 = arith.maximumf %37, %38 : vector<256x128xf32>
    %40 = arith.truncf %39 : vector<256x128xf32> to vector<256x128xbf16>
    %c0_12 = arith.constant 0 : index
    %c0_13 = arith.constant 0 : index
    %41 = vector.load %arg3[%c0_12, %c0_13] : memref<128x1024xbf16, #tpu.memory_space<vmem>>, vector<128x1024xbf16>
    %cst_14 = arith.constant dense<0.000000e+00> : vector<256x1024xf32>
    %42 = tpu.matmul %40, %41, %cst_14 {dimension_numbers = #tpu.dot_dimension_numbers<[1], [0], [0], [1], [0, 0, 1, 1], [], []>} : vector<256x128xbf16>, vector<128x1024xbf16>, vector<256x1024xf32> -> vector<256x1024xf32>
    %c0_15 = arith.constant 0 : index
    %c256 = arith.constant 256 : index
    %43 = vector.load %arg4[%c0_15, %c256] : memref<1x2176xf32, #tpu.memory_space<vmem>>, vector<1x1024xf32>
    %44 = vector.broadcast %43 : vector<1x1024xf32> to vector<256x1024xf32>
    %45 = arith.addf %42, %44 : vector<256x1024xf32>
    %cst_16 = arith.constant 0.000000e+00 : f32
    %46 = vector.broadcast %cst_16 : f32 to vector<256x1024xf32>
    %47 = arith.maximumf %45, %46 : vector<256x1024xf32>
    %48 = arith.truncf %47 : vector<256x1024xf32> to vector<256x1024xbf16>
    %49 = vector.shape_cast %48 : vector<256x1024xbf16> to vector<2x128x1024xbf16>
    %cst_17 = arith.constant dense<0xFF80> : vector<2x1024xbf16>
    %50 = vector.multi_reduction <maximumf>, %49, %cst_17 [1] : vector<2x128x1024xbf16> to vector<2x1024xbf16>
    %c0_i32_18 = arith.constant 0 : i32
    %51 = tpu.memref_slice %arg12[%c0_i32_18] : memref<3x!tpu.dma_semaphore, #tpu.memory_space<semaphore_mem>> -> memref<1x!tpu.dma_semaphore, #tpu.memory_space<semaphore_mem>>
    %52 = tpu.memref_squeeze %51 : memref<1x!tpu.dma_semaphore, #tpu.memory_space<semaphore_mem>> -> memref<!tpu.dma_semaphore, #tpu.memory_space<semaphore_mem>>
    tpu.wait_dma2 semaphore(%52 : memref<!tpu.dma_semaphore, #tpu.memory_space<semaphore_mem>>) src(%arg5 : memref<1024x512xbf16, #tpu.memory_space<any>>) dst(%arg9 : memref<1024x512xbf16, #tpu.memory_space<vmem>>)
    %c0_19 = arith.constant 0 : index
    %c0_20 = arith.constant 0 : index
    %53 = vector.load %arg9[%c0_19, %c0_20] : memref<1024x512xbf16, #tpu.memory_space<vmem>>, vector<1024x512xbf16>
    %cst_21 = arith.constant dense<0.000000e+00> : vector<2x512xf32>
    %54 = tpu.matmul %50, %53, %cst_21 {dimension_numbers = #tpu.dot_dimension_numbers<[1], [0], [0], [1], [0, 0, 1, 1], [], []>} : vector<2x1024xbf16>, vector<1024x512xbf16>, vector<2x512xf32> -> vector<2x512xf32>
    %c0_22 = arith.constant 0 : index
    %c1280 = arith.constant 1280 : index
    %55 = vector.load %arg4[%c0_22, %c1280] : memref<1x2176xf32, #tpu.memory_space<vmem>>, vector<1x512xf32>
    %56 = vector.broadcast %55 : vector<1x512xf32> to vector<2x512xf32>
    %57 = arith.addf %54, %56 : vector<2x512xf32>
    %cst_23 = arith.constant 0.000000e+00 : f32
    %58 = vector.broadcast %cst_23 : f32 to vector<2x512xf32>
    %59 = arith.maximumf %57, %58 : vector<2x512xf32>
    %c1_i32_24 = arith.constant 1 : i32
    %60 = tpu.memref_slice %arg12[%c1_i32_24] : memref<3x!tpu.dma_semaphore, #tpu.memory_space<semaphore_mem>> -> memref<1x!tpu.dma_semaphore, #tpu.memory_space<semaphore_mem>>
    %61 = tpu.memref_squeeze %60 : memref<1x!tpu.dma_semaphore, #tpu.memory_space<semaphore_mem>> -> memref<!tpu.dma_semaphore, #tpu.memory_space<semaphore_mem>>
    tpu.wait_dma2 semaphore(%61 : memref<!tpu.dma_semaphore, #tpu.memory_space<semaphore_mem>>) src(%arg6 : memref<512x256xbf16, #tpu.memory_space<any>>) dst(%arg10 : memref<512x256xbf16, #tpu.memory_space<vmem>>)
    %62 = arith.truncf %59 : vector<2x512xf32> to vector<2x512xbf16>
    %c0_25 = arith.constant 0 : index
    %c0_26 = arith.constant 0 : index
    %63 = vector.load %arg10[%c0_25, %c0_26] : memref<512x256xbf16, #tpu.memory_space<vmem>>, vector<512x256xbf16>
    %cst_27 = arith.constant dense<0.000000e+00> : vector<2x256xf32>
    %64 = tpu.matmul %62, %63, %cst_27 {dimension_numbers = #tpu.dot_dimension_numbers<[1], [0], [0], [1], [0, 0, 1, 1], [], []>} : vector<2x512xbf16>, vector<512x256xbf16>, vector<2x256xf32> -> vector<2x256xf32>
    %c0_28 = arith.constant 0 : index
    %c1792 = arith.constant 1792 : index
    %65 = vector.load %arg4[%c0_28, %c1792] : memref<1x2176xf32, #tpu.memory_space<vmem>>, vector<1x256xf32>
    %66 = vector.broadcast %65 : vector<1x256xf32> to vector<2x256xf32>
    %67 = arith.addf %64, %66 : vector<2x256xf32>
    %cst_29 = arith.constant 0.000000e+00 : f32
    %68 = vector.broadcast %cst_29 : f32 to vector<2x256xf32>
    %69 = arith.maximumf %67, %68 : vector<2x256xf32>
    %c2_i32_30 = arith.constant 2 : i32
    %70 = tpu.memref_slice %arg12[%c2_i32_30] : memref<3x!tpu.dma_semaphore, #tpu.memory_space<semaphore_mem>> -> memref<1x!tpu.dma_semaphore, #tpu.memory_space<semaphore_mem>>
    %71 = tpu.memref_squeeze %70 : memref<1x!tpu.dma_semaphore, #tpu.memory_space<semaphore_mem>> -> memref<!tpu.dma_semaphore, #tpu.memory_space<semaphore_mem>>
    tpu.wait_dma2 semaphore(%71 : memref<!tpu.dma_semaphore, #tpu.memory_space<semaphore_mem>>) src(%arg7 : memref<256x128xbf16, #tpu.memory_space<any>>) dst(%arg11 : memref<256x128xbf16, #tpu.memory_space<vmem>>)
    %72 = arith.truncf %69 : vector<2x256xf32> to vector<2x256xbf16>
    %c0_31 = arith.constant 0 : index
    %c0_32 = arith.constant 0 : index
    %73 = vector.load %arg11[%c0_31, %c0_32] : memref<256x128xbf16, #tpu.memory_space<vmem>>, vector<256x128xbf16>
    %cst_33 = arith.constant dense<0.000000e+00> : vector<2x128xf32>
    %74 = tpu.matmul %72, %73, %cst_33 {dimension_numbers = #tpu.dot_dimension_numbers<[1], [0], [0], [1], [0, 0, 1, 1], [], []>} : vector<2x256xbf16>, vector<256x128xbf16>, vector<2x128xf32> -> vector<2x128xf32>
    %c0_34 = arith.constant 0 : index
    %c2048 = arith.constant 2048 : index
    %75 = vector.load %arg4[%c0_34, %c2048] : memref<1x2176xf32, #tpu.memory_space<vmem>>, vector<1x128xf32>
    %76 = vector.broadcast %75 : vector<1x128xf32> to vector<2x128xf32>
    %77 = arith.addf %74, %76 : vector<2x128xf32>
    %c0_35 = arith.constant 0 : index
    %c0_36 = arith.constant 0 : index
    %78 = vector.load %arg8[%c0_35, %c0_36] : memref<2x128xf32, #tpu.memory_space<vmem>>, vector<2x128xf32>
    tpu.vector_store %arg8[%c0_35, %c0_36], %77 {strides = array<i32>} : memref<2x128xf32, #tpu.memory_space<vmem>>, vector<2x128xf32>,
    return
  }
}

</mosaic_0001>

<bundles_post_ra>
// kernel: tpu_custom_call.1
= control target key start
LH: loop header
LB: loop body
LE: loop exit
PB: predicated region body
PF: predicated region fallthrough
CT: control target
= control target key end

     0   :  { %13 = vsyncpa [#allocation7], 0  ;;  %s5983_s0 = inlined_call_operand.vmem [shape: bf16[256,3], index: 0, kind: input, shape index: {}]   ;;  %s5984_s1 = inlined_call_operand.vmem [shape: f32[3,64], index: 1, kind: input, shape index: {}]   ;;  %s5985_s2 = inlined_call_operand.hbm [shape: bf16[64,128], index: 2, kind: input, shape index: {}]   ;;  %s5986_s3 = inlined_call_operand.hbm [shape: bf16[128,1024], index: 3, kind: input, shape index: {}]   ;;  %s5987_s4 = inlined_call_operand.vmem [shape: f32[1,2176], index: 4, kind: input, shape index: {}]   ;;  %s5988_s5 = inlined_call_operand.hbm [shape: bf16[1024,512], index: 5, kind: input, shape index: {}]   ;;  %s5989_s6 = inlined_call_operand.hbm [shape: bf16[512,256], index: 6, kind: input, shape index: {}]   ;;  %s5990_s7 = inlined_call_operand.vmem [shape: bf16[256,128], index: 7, kind: input, shape index: {}]   ;;  %s5991_s8 = inlined_call_operand.hbm [shape: f32[2,128], index: 8, kind: output, shape index: {}]  }
   0x1   :  { %14 = vsyncpa [#allocation10], 0 }
   0x2   :  { %15 = vsyncpa [#allocation8], 0  ;;  %s4715_s27 = smov [#allocation6]   ;;  %s4637_s9 = scalar_lea.hbm %s5985_s2, 512 }
   0x3   :  { %s25_s28 = sshll.u32 %s4715_s27, 4  ;;  %p4638_p0 = scmp.ne.s32.totalorder %s5985_s2, %s4637_s9  ;;  %s26_s28 = int_to_ptr.vmem [resolvable:$true] %s25_s28 }
   0x4   :  { %p4641_p1 = scmp.lt.u32.totalorder %s4637_s9, %s5985_s2 }
   0x6   :  { %p4643_p2 = pnand %p4641_p1, %p4638_p0 }
   0x8   :  { %4646 = shalt.err (!%p4643_p2)
}
   0x9   :  { %s4647_s14 = scalar_lea.vmem %s26_s28, 512  ;;  %p4652_p4 = scmp.lt.s32.totalorder %s26_s28, %s26_s28 }
   0xa   :  { %p4648_p3 = scmp.ne.s32.totalorder %s26_s28, %s4647_s14  ;;  %p4653_p5 = scmp.lt.s32.totalorder %s4647_s14, %s4647_s14 }
   0xc   :  { %p4654_p6 = por %p4653_p5, %p4652_p4 }
   0xe   :  { %p4655_p7 = pnand %p4654_p6, %p4648_p3 }
  0x10   :  { %4658 = shalt.err (!%p4655_p7)
}
  0x11   :  { %s4716_s15 = smov 64   ;;  %s4717_s16 = smov 4  }
  0x12   :  { %31 = dma.hbm_to_vmem [thread:$0]  %s5985_s2, 512, %s26_s28, [#allocation7], %s4716_s15, %s4716_s15, %s4717_s16  }
  0x13   :  { %s4718_s19 = smov [#allocation9]   ;;  %s4659_s23 = scalar_lea.hbm %s5986_s3, 8192 }
  0x14   :  { %s37_s20 = sshll.u32 %s4718_s19, 4  ;;  %p4660_p8 = scmp.ne.s32.totalorder %s5986_s3, %s4659_s23  ;;  %s38_s20 = int_to_ptr.vmem [resolvable:$true] %s37_s20 }
  0x15   :  { %p4663_p9 = scmp.lt.u32.totalorder %s4659_s23, %s5986_s3 }
  0x17   :  { %p4665_p10 = pnand %p4663_p9, %p4660_p8 }
  0x19   :  { %4668 = shalt.err (!%p4665_p10)
}
  0x1a   :  { %s4669_s29 = scalar_lea.vmem %s38_s20, 8192  ;;  %p4674_p12 = scmp.lt.s32.totalorder %s38_s20, %s38_s20 }
  0x1b   :  { %p4670_p11 = scmp.ne.s32.totalorder %s38_s20, %s4669_s29  ;;  %p4675_p13 = scmp.lt.s32.totalorder %s4669_s29, %s4669_s29 }
  0x1d   :  { %p4676_p0 = por %p4675_p13, %p4674_p12 }
  0x1f   :  { %p4677_p1 = pnand %p4676_p0, %p4670_p11 }
  0x21   :  { %4680 = shalt.err (!%p4677_p1)
}
  0x22   :  { %s4719_s2 = smov 512   ;;  %s4720_s28 = smov 32  }
  0x23   :  { %43 = dma.hbm_to_vmem [thread:$0]  %s5986_s3, 8192, %s38_s20, [#allocation10], %s4719_s2, %s4719_s2, %s4720_s28  }
  0x24   :  { %4703 = dma.done.wait [#allocation7], 512  }
  0x25   :  { %4704 = vsyncadd [#allocation7], 4294966784 }
  0x26   :  { %4705 = dma.done.wait [#allocation10], 8192  }
  0x27   :  { %4706 = vsyncadd [#allocation10], 4294959104  ;;  %s57_s10 = sld [smem:[#allocation0]]   ;;  %69 = sst [smem:[#allocation13]] %s4719_s2  ;;  %v4730_v18 = vmov 1   ;;  %v4731_v19 = vmov 0  }
  0x28   :  { %71 = sst [smem:[#allocation13 + $0x1]] %s4719_s2  ;;  %s4721_s11 = smov [#allocation2]   ;;  %4364 = vset.pattern.permute.xlu1 %v4730_v18  ;;  %4353 = vset.pattern.permute.xlu0 %v4731_v19 }
  0x29   :  { %s65_s12 = sshll.u32 %s4721_s11, 4  ;;  %73 = sst [smem:[#allocation13 + $0x2]] %s4717_s16  ;;  %1693 = vmatprep.mubr.bf16.mxu1 %v4731_v19  ;;  %s66_s12 = int_to_ptr.vmem [resolvable:$true] %s65_s12 }
  0x2a   :  { %75 = sst [smem:[#allocation13 + $0x3]] %s4716_s15  ;;  %s4722_s3 = smov 128  }
  0x2b   :  { %83 = sst [smem:[#allocation13 + $0x7]] %s4716_s15  ;;  %s4723_s17 = smov 2  }
  0x2c   :  { %85 = sst [smem:[#allocation13 + $0x8]] %s4717_s16  ;;  %s4724_s18 = smov 256  }
  0x2d   :  { %s4042_s13 = sshll.u32 %s57_s10, 26  ;;  %77 = sst [smem:[#allocation13 + $0x4]] %s4722_s3 }
  0x2e   :  { %s4043_s14 = sadd.s32 134217728, %s4042_s13  ;;  %79 = sst [smem:[#allocation13 + $0x5]] %s4723_s17 }
  0x2f   :  { %81 = sst [smem:[#allocation13 + $0x6]] %s4724_s18  ;;  %s4725_s19 = smov [#allocation5]  }
  0x30   :  { %s4726_s20 = smov [#allocation12]   ;;  %s4727_s23 = smov [#allocation3]  }
  0x31   :  { %87 = dma.general %s5988_s5, 32768, %s66_s12, %s4725_s19, %s4726_s20, [#allocation13], %s4043_s14, 0  }
  0x32   :  { %104 = sst [smem:[#allocation15]] %s4724_s18  ;;  %s100_s24 = sshll.u32 %s4727_s23, 4  ;;  %s101_s24 = int_to_ptr.vmem [resolvable:$true] %s100_s24 }
  0x33   :  { %106 = sst [smem:[#allocation15 + $0x1]] %s4724_s18  ;;  %s4728_s25 = smov [#allocation5 + $0x1]  }
  0x34   :  { %108 = sst [smem:[#allocation15 + $0x2]] %s4723_s17  ;;  %s4729_s26 = smov [#allocation14]  }
  0x35   :  { %110 = sst [smem:[#allocation15 + $0x3]] %s4716_s15 }
  0x36   :  { %112 = sst [smem:[#allocation15 + $0x4]] %s4722_s3 }
  0x37   :  { %114 = sst [smem:[#allocation15 + $0x5]] %s4723_s17 }
  0x38   :  { %116 = sst [smem:[#allocation15 + $0x6]] %s4722_s3 }
  0x39   :  { %118 = sst [smem:[#allocation15 + $0x7]] %s4716_s15 }
  0x3a   :  { %120 = sst [smem:[#allocation15 + $0x8]] %s4717_s16 }
  0x3b   :  { %122 = dma.general %s5989_s6, 8192, %s101_s24, %s4728_s25, %s4729_s26, [#allocation15], %s4043_s14, 0  }
  0x3c   :  { %v4822_v0 = vld [vmem:[%s5990_s7] sm:$0xff]  ;;  %v4827_v1 = vld [vmem:[%s5990_s7 + $0x8] sm:$0xff]  ;;  %v4832_v2 = vld [vmem:[%s5990_s7 + $0x10] sm:$0xff] }
  0x3d   :  { %v4837_v3 = vld [vmem:[%s5990_s7 + $0x18] sm:$0xff]  ;;  %v4842_v4 = vld [vmem:[%s5990_s7 + $0x20] sm:$0xff]  ;;  %v4847_v5 = vld [vmem:[%s5990_s7 + $0x28] sm:$0xff] }
  0x3e   :  { %5994 = vst [vmem:[#allocation23_spill] sm:$0xff] %v4847_v5  ;;  %v4852_v6 = vld [vmem:[%s5990_s7 + $0x30] sm:$0xff]  ;;  %v4857_v7 = vld [vmem:[%s5990_s7 + $0x38] sm:$0xff]  ;;  %v4862_v8 = vld [vmem:[%s5990_s7 + $0x40] sm:$0xff] }
  0x3f   :  { %5995 = vst [vmem:[#allocation24_spill] sm:$0xff] %v4852_v6  ;;  %5996 = vst [vmem:[#allocation25_spill] sm:$0xff] %v4857_v7  ;;  %v4867_v9 = vld [vmem:[%s5990_s7 + $0x48] sm:$0xff]  ;;  %v4872_v10 = vld [vmem:[%s5990_s7 + $0x50] sm:$0xff] }
  0x40   :  { %v4877_v11 = vld [vmem:[%s5990_s7 + $0x58] sm:$0xff]  ;;  %v4882_v12 = vld [vmem:[%s5990_s7 + $0x60] sm:$0xff]  ;;  %v4887_v13 = vld [vmem:[%s5990_s7 + $0x68] sm:$0xff] }
  0x41   :  { %5997 = vst [vmem:[#allocation26_spill] sm:$0xff] %v4887_v13  ;;  %v4892_v14 = vld [vmem:[%s5990_s7 + $0x70] sm:$0xff]  ;;  %v4897_v15 = vld [vmem:[%s5990_s7 + $0x78] sm:$0xff]  ;;  %v4140_v16 = vld [vmem:[%s5983_s0] sm:$0xff]  }
  0x42   :  { %5998 = vst [vmem:[#allocation27_spill] sm:$0xff] %v4892_v14  ;;  %5999 = vst [vmem:[#allocation28_spill] sm:$0xff] %v4897_v15  ;;  %v4203_v17 = vld [vmem:[%s5983_s0 + $0x8] sm:$0xff]   ;;  %v4141_v20 = vunpack.c.l.bf16 %v4140_v16  ;;  %v4142_v21 = vunpack.c.h.bf16 %v4140_v16 }
  0x43   :  { %v4145_v22 = vunpack.c.l.bf16 %v4203_v17  ;;  %v4146_v23 = vunpack.c.h.bf16 %v4203_v17 }
  0x44   :  { %v4365_v24 = vpack.i.bf16 %v4142_v21, %v4141_v20 }
  0x45   :  { %v4370_v25 = vpack.i.bf16 %v4146_v23, %v4145_v22 }
  0x46   :  { %4366 = vperm.xlu1 %4364, %v4365_v24   ;;  %4355 = vperm.xlu0 %4353, %v4365_v24  }
  0x47   :  { %195 = vsyncadd [#allocation5 + $0x2], 2048  ;;  %v4204_v26 = vld [vmem:[%s5983_s0 + $0x10] sm:$0xff]   ;;  %v4205_v27 = vld [vmem:[%s5983_s0 + $0x18] sm:$0xff]   ;;  %v4732_v34 = vmov 2   ;;  %vm977_vm0 = vcmask 523264  }
  0x48   :  { %v4632_v28 = vld [vmem:[#allocation6] sm:$0xff]   ;;  %v4149_v29 = vunpack.c.l.bf16 %v4204_v26  ;;  %v4150_v30 = vunpack.c.h.bf16 %v4204_v26  ;;  %v4153_v31 = vunpack.c.l.bf16 %v4205_v27  ;;  %v4154_v32 = vunpack.c.h.bf16 %v4205_v27  ;;  %v4633_v33 = vld [vmem:[#allocation6 + $0x8] sm:$0xff]   ;;  %v4217_v37 = vld [vmem:[%s5983_s0 + $0x78] sm:$0xff]  }
  0x49   :  { %4260 = vmatprep.subr.bf16.mxu0 %v4632_v28  ;;  %v4634_v38 = vld [vmem:[#allocation6 + $0x10] sm:$0xff]   ;;  %v4207_v39 = vld [vmem:[%s5983_s0 + $0x28] sm:$0xff]   ;;  %v4201_v40 = vunpack.c.l.bf16 %v4217_v37  ;;  %v4202_v41 = vunpack.c.h.bf16 %v4217_v37  ;;  %v4635_v42 = vld [vmem:[#allocation6 + $0x18] sm:$0xff]  }
  0x4a   :  { %4371 = vperm.xlu1 %4364, %v4370_v25   ;;  %4360 = vperm.xlu0 %4353, %v4370_v25   ;;  %v4388_v35 = vpack.i.bf16 %v4150_v30, %v4149_v29  ;;  %v4394_v36 = vpack.i.bf16 %v4154_v32, %v4153_v31  ;;  %v4161_v43 = vunpack.c.l.bf16 %v4207_v39  ;;  %v4162_v44 = vunpack.c.h.bf16 %v4207_v39  ;;  %v4206_v46 = vld [vmem:[%s5983_s0 + $0x20] sm:$0xff]   ;;  %v4209_v50 = vld [vmem:[%s5983_s0 + $0x38] sm:$0xff]   ;;  %v4208_v54 = vld [vmem:[%s5983_s0 + $0x30] sm:$0xff]  }
  0x4b   :  { %4261 = vmatpush3.bf16.msra.mxu0 %v4632_v28  ;;  %v4924_v45 = vpack.i.bf16 %v4202_v41, %v4201_v40  ;;  %v4157_v48 = vunpack.c.l.bf16 %v4206_v46  ;;  %v4158_v49 = vunpack.c.h.bf16 %v4206_v46  ;;  %v4169_v52 = vunpack.c.l.bf16 %v4209_v50  ;;  %v4211_v58 = vld [vmem:[%s5983_s0 + $0x48] sm:$0xff]   ;;  %v4210_v62 = vld [vmem:[%s5983_s0 + $0x40] sm:$0xff]   ;;  %v4213_v20 = vld [vmem:[%s5983_s0 + $0x58] sm:$0xff]  }
  0x4c   :  { %4262 = vmatprep.subr.bf16.mxu0 %v4633_v33  ;;  %v4429_v47 = vpack.i.bf16 %v4162_v44, %v4161_v43  ;;  %v4170_v53 = vunpack.c.h.bf16 %v4209_v50  ;;  %v4165_v56 = vunpack.c.l.bf16 %v4208_v54  ;;  %v4166_v57 = vunpack.c.h.bf16 %v4208_v54  ;;  %v4215_v28 = vld [vmem:[%s5983_s0 + $0x68] sm:$0xff]   ;;  %v4214_v32 = vld [vmem:[%s5983_s0 + $0x60] sm:$0xff]  }
  0x4d   :  { %v4446_v51 = vpack.i.bf16 %v4158_v49, %v4157_v48  ;;  %v4177_v60 = vunpack.c.l.bf16 %v4211_v58  ;;  %v4178_v61 = vunpack.c.h.bf16 %v4211_v58  ;;  %v4173_v16 = vunpack.c.l.bf16 %v4210_v62  ;;  %v4999_v54 = vld [vmem:[%s5987_s4] ss:$0 sm:$0xff] }
  0x4e   :  { %4381 = vset.pattern.permute.xlu1 %v4732_v34  ;;  %4375 = vset.pattern.permute.xlu0 %v4732_v34  ;;  %v4464_v55 = vpack.i.bf16 %v4170_v53, %v4169_v52  ;;  %v4481_v59 = vpack.i.bf16 %v4166_v57, %v4165_v56  ;;  %v4174_v17 = vunpack.c.h.bf16 %v4210_v62  ;;  %v4185_v22 = vunpack.c.l.bf16 %v4213_v20 }
  0x4f   :  { %4383 = vperm.xlu1 %4381, %v4370_v25   ;;  %4377 = vperm.xlu0 %4375, %v4365_v24   ;;  %v4499_v63 = vpack.i.bf16 %v4178_v61, %v4177_v60  ;;  %v4186_v23 = vunpack.c.h.bf16 %v4213_v20  ;;  %v4212_v24 = vld [vmem:[%s5983_s0 + $0x50] sm:$0xff]   ;;  %v4193_v30 = vunpack.c.l.bf16 %v4215_v28  ;;  %v4194_v31 = vunpack.c.h.bf16 %v4215_v28 }
  0x50   :  { %4263 = vmatpush3.bf16.msra.mxu0 %v4633_v33  ;;  %v4516_v21 = vpack.i.bf16 %v4174_v17, %v4173_v16  ;;  %v4181_v26 = vunpack.c.l.bf16 %v4212_v24  ;;  %v4182_v27 = vunpack.c.h.bf16 %v4212_v24  ;;  %v5015_v17 = vld [vmem:[%s5984_s1 + $0x2] ss:$0 sm:$0xff] }
  0x51   :  { %4264 = vmatprep.subr.bf16.mxu0 %v4634_v38  ;;  %v4534_v25 = vpack.i.bf16 %v4186_v23, %v4185_v22  ;;  %v4569_v33 = vpack.i.bf16 %v4194_v31, %v4193_v30 }
  0x52   :  { %v4551_v29 = vpack.i.bf16 %v4182_v27, %v4181_v26 }
  0x53   :  { %4387 = vset.pattern.permute.xlu1 %v4731_v19  ;;  %4393 = vset.pattern.permute.xlu0 %v4731_v19 }
  0x54   :  { %4389 = vperm.xlu1 %4387, %v4388_v35   ;;  %4395 = vperm.xlu0 %4393, %v4394_v36  }
  0x55   :  { %4265 = vmatpush3.bf16.msra.mxu0 %v4634_v38  ;;  %v4216_v38 = vld [vmem:[%s5983_s0 + $0x70] sm:$0xff]  }
  0x56   :  { %4266 = vmatprep.subr.bf16.mxu0 %v4635_v42  ;;  %v4197_v39 = vunpack.c.l.bf16 %v4216_v38  ;;  %v4198_v40 = vunpack.c.h.bf16 %v4216_v38 }
  0x58   :  { %4399 = vset.pattern.permute.xlu1 %v4730_v18  ;;  %4410 = vset.pattern.permute.xlu0 %v4732_v34  ;;  %v4621_v41 = vpack.i.bf16 %v4198_v40, %v4197_v39 }
  0x59   :  { %4401 = vperm.xlu1 %4399, %v4388_v35   ;;  %4412 = vperm.xlu0 %4410, %v4388_v35   ;;  %v4189_v35 = vunpack.c.l.bf16 %v4214_v32 }
  0x5a   :  { %4267 = vmatpush3.bf16.msra.mxu0 %v4635_v42 }
  0x5d   :  { %4406 = vperm.xlu1 %4399, %v4394_v36   ;;  %4428 = vset.pattern.permute.xlu0 %v4731_v19 }
  0x5e   :  { %4430 = vperm.xlu0 %4428, %v4429_v47  }
  0x61   :  { %4416 = vset.pattern.permute.xlu1 %v4732_v34 }
  0x62   :  { %4418 = vperm.xlu1 %4416, %v4394_v36   ;;  %4445 = vset.pattern.permute.xlu0 %v4732_v34  ;;  %v4190_v36 = vunpack.c.h.bf16 %v4214_v32 }
  0x63   :  { %4447 = vperm.xlu0 %4445, %v4446_v51  }
  0x64   :  { %v4586_v37 = vpack.i.bf16 %v4190_v36, %v4189_v35 }
  0x66   :  { %4422 = vset.pattern.permute.xlu1 %v4731_v19 }
  0x67   :  { %4424 = vperm.xlu1 %4422, %v4446_v51   ;;  %4463 = vset.pattern.permute.xlu0 %v4731_v19 }
  0x68   :  { %4465 = vperm.xlu0 %4463, %v4464_v55  }
  0x6b   :  { %4434 = vset.pattern.permute.xlu1 %v4730_v18 }
  0x6c   :  { %4436 = vperm.xlu1 %4434, %v4446_v51   ;;  %4480 = vset.pattern.permute.xlu0 %v4732_v34 }
  0x6d   :  { %4482 = vperm.xlu0 %4480, %v4481_v59  }
  0x70   :  { %4441 = vperm.xlu1 %4434, %v4429_v47  }
  0x71   :  { %4498 = vset.pattern.permute.xlu0 %v4731_v19 }
  0x72   :  { %4500 = vperm.xlu0 %4498, %v4499_v63  }
  0x74   :  { %4451 = vset.pattern.permute.xlu1 %v4732_v34 }
  0x75   :  { %4453 = vperm.xlu1 %4451, %v4429_v47   ;;  %v4991_v47 = vld [vmem:[%s5984_s1] ss:$0 sm:$0xff] }
  0x76   :  { %4515 = vset.pattern.permute.xlu0 %v4732_v34 }
  0x77   :  { %4517 = vperm.xlu0 %4515, %v4516_v21  }
  0x79   :  { %4457 = vset.pattern.permute.xlu1 %v4731_v19 }
  0x7a   :  { %4459 = vperm.xlu1 %4457, %v4481_v59  }
  0x7b   :  { %4533 = vset.pattern.permute.xlu0 %v4731_v19 }
  0x7c   :  { %4535 = vperm.xlu0 %4533, %v4534_v25  }
  0x7e   :  { %4469 = vset.pattern.permute.xlu1 %v4730_v18 }
  0x7f   :  { %4471 = vperm.xlu1 %4469, %v4481_v59   ;;  %v5004_v59 = vld [vmem:[%s5984_s1 + $0x1] ss:$0 sm:$0xff] }
  0x80   :  { %4550 = vset.pattern.permute.xlu0 %v4732_v34 }
  0x81   :  { %4552 = vperm.xlu0 %4550, %v4551_v29  }
  0x83   :  { %4476 = vperm.xlu1 %4469, %v4464_v55  }
  0x85   :  { %4568 = vset.pattern.permute.xlu0 %v4731_v19 }
  0x86   :  { %4570 = vperm.xlu0 %4568, %v4569_v33  }
  0x87   :  { %4486 = vset.pattern.permute.xlu1 %v4732_v34 }
  0x88   :  { %4488 = vperm.xlu1 %4486, %v4464_v55  }
  0x8a   :  { %4585 = vset.pattern.permute.xlu0 %v4732_v34 }
  0x8b   :  { %4587 = vperm.xlu0 %4585, %v4586_v37  }
  0x8c   :  { %4492 = vset.pattern.permute.xlu1 %v4731_v19 }
  0x8d   :  { %4494 = vperm.xlu1 %4492, %v4516_v21  }
  0x8f   :  { %4603 = vset.pattern.permute.xlu0 %v4731_v19 }
  0x90   :  { %4605 = vperm.xlu0 %4603, %v4924_v45  }
  0x91   :  { %4504 = vset.pattern.permute.xlu1 %v4730_v18 }
  0x92   :  { %4506 = vperm.xlu1 %4504, %v4516_v21  }
  0x94   :  { %4620 = vset.pattern.permute.xlu0 %v4732_v34 }
  0x95   :  { %4622 = vperm.xlu0 %4620, %v4621_v41  }
  0x96   :  { %4511 = vperm.xlu1 %4504, %v4499_v63  }
  0x9a   :  { %4521 = vset.pattern.permute.xlu1 %v4732_v34 }
  0x9b   :  { %4523 = vperm.xlu1 %4521, %v4499_v63  }
  0x9f   :  { %4527 = vset.pattern.permute.xlu1 %v4731_v19 }
  0xa0   :  { %4529 = vperm.xlu1 %4527, %v4551_v29  }
  0xa4   :  { %4539 = vset.pattern.permute.xlu1 %v4730_v18 }
  0xa5   :  { %4541 = vperm.xlu1 %4539, %v4551_v29  }
  0xa9   :  { %4546 = vperm.xlu1 %4539, %v4534_v25  }
  0xad   :  { %4556 = vset.pattern.permute.xlu1 %v4732_v34 }
  0xae   :  { %4558 = vperm.xlu1 %4556, %v4534_v25  }
  0xb2   :  { %4562 = vset.pattern.permute.xlu1 %v4731_v19 }
  0xb3   :  { %4564 = vperm.xlu1 %4562, %v4586_v37  }
  0xb7   :  { %4574 = vset.pattern.permute.xlu1 %v4730_v18 }
  0xb8   :  { %4576 = vperm.xlu1 %4574, %v4586_v37  }
  0xbc   :  { %4581 = vperm.xlu1 %4574, %v4569_v33  }
  0xc0   :  { %4591 = vset.pattern.permute.xlu1 %v4732_v34 }
  0xc1   :  { %4593 = vperm.xlu1 %4591, %v4569_v33  }
  0xc5   :  { %4597 = vset.pattern.permute.xlu1 %v4731_v19  ;;  %v4367_v42 = vpop.permute.xlu1 %4366  ;;  %v4356_v43 = vpop.permute.xlu0 %4355 }
  0xc6   :  { %v4358_v44 = vunpack.i.h.bf16 %v4356_v43  ;;  %v4357_v46 = vunpack.i.l.bf16 %v4356_v43  ;;  %4599 = vperm.xlu1 %4597, %v4621_v41   ;;  %v4369_v57 = vunpack.i.h.bf16 %v4367_v42  ;;  %v4368_v58 = vunpack.i.l.bf16 %v4367_v42 }
  0xc8   :  { %v427_v50 = vmul.f32 %v4358_v44, %v4991_v47  ;;  %v426_v51 = vmul.f32 %v4357_v46, %v4991_v47  ;;  %v630_v26 = vmul.f32 %v4369_v57, %v5004_v59  ;;  %v629_v27 = vmul.f32 %v4368_v58, %v5004_v59 }
  0xc9   :  { %v4372_v48 = vpop.permute.xlu1 %4371  ;;  %v4361_v49 = vpop.permute.xlu0 %4360 }
  0xca   :  { %v4374_v52 = vunpack.i.h.bf16 %v4372_v48  ;;  %v4373_v53 = vunpack.i.l.bf16 %v4372_v48  ;;  %4609 = vset.pattern.permute.xlu1 %v4730_v18  ;;  %v4363_v55 = vunpack.i.h.bf16 %v4361_v49  ;;  %v4362_v56 = vunpack.i.l.bf16 %v4361_v49 }
  0xcb   :  { %4611 = vperm.xlu1 %4609, %v4621_v41   ;;  %v465_v18 = vadd.f32 %v4999_v54, %v427_v50  ;;  %v464_v62 = vadd.f32 %v4999_v54, %v426_v51 }
  0xcc   :  { %v429_v60 = vmul.f32 %v4363_v55, %v4991_v47  ;;  %v428_v61 = vmul.f32 %v4362_v56, %v4991_v47  ;;  %v632_v63 = vmul.f32 %v4374_v52, %v5004_v59  ;;  %v631_v16 = vmul.f32 %v4373_v53, %v5004_v59 }
  0xcd   :  { %v661_v41 = vadd.f32 %v629_v27, %v464_v62  ;;  %v662_v42 = vadd.f32 %v630_v26, %v465_v18 }
  0xce   :  { %v4384_v20 = vpop.permute.xlu1 %4383  ;;  %v4378_v21 = vpop.permute.xlu0 %4377  ;;  %v467_v22 = vadd.f32 %v4999_v54, %v429_v60  ;;  %v466_v23 = vadd.f32 %v4999_v54, %v428_v61 }
  0xcf   :  { %v4386_v24 = vunpack.i.h.bf16 %v4384_v20  ;;  %v4385_v25 = vunpack.i.l.bf16 %v4384_v20  ;;  %4616 = vperm.xlu1 %4609, %v4924_v45   ;;  %v4380_v28 = vunpack.i.h.bf16 %v4378_v21  ;;  %v4379_v29 = vunpack.i.l.bf16 %v4378_v21 }
  0xd0   :  { %v663_v31 = vadd.f32 %v631_v16, %v466_v23  ;;  %v664_v32 = vadd.f32 %v632_v63, %v467_v22 }
  0xd1   :  { %v829_v30 = vmul.f32 %v4386_v24, %v5015_v17  ;;  %v828_v33 = vmul.f32 %v4385_v25, %v5015_v17  ;;  %v827_v35 = vmul.f32 %v4380_v28, %v5015_v17  ;;  %v826_v36 = vmul.f32 %v4379_v29, %v5015_v17 }
  0xd3   :  { %v860_v37 = vadd.f32 %v828_v33, %v663_v31  ;;  %v861_v38 = vadd.f32 %v829_v30, %v664_v32  ;;  %4626 = vset.pattern.permute.xlu1 %v4732_v34  ;;  %v4390_v39 = vpop.permute.xlu1 %4389  ;;  %v4396_v40 = vpop.permute.xlu0 %4395  ;;  %v858_v49 = vadd.f32 %v826_v36, %v661_v41  ;;  %v859_v50 = vadd.f32 %v827_v35, %v662_v42  ;;  %v1236_v35 = vld [vmem:[#allocation9 + $0x8] sm:$0xff] }
  0xd4   :  { %v4392_v43 = vunpack.i.h.bf16 %v4390_v39  ;;  %v4391_v44 = vunpack.i.l.bf16 %v4390_v39  ;;  %4628 = vperm.xlu1 %4626, %v4924_v45   ;;  %v4398_v52 = vunpack.i.h.bf16 %v4396_v40  ;;  %v4397_v53 = vunpack.i.l.bf16 %v4396_v40  ;;  %v1240_v36 = vld [vmem:[#allocation9 + $0x28] sm:$0xff] }
  0xd5   :  { %v892_v46 = vmax.f32 %v860_v37, 0.0  ;;  %v893_v48 = vmax.f32 %v861_v38, 0.0  ;;  %v890_v56 = vmax.f32 %v858_v49, 0.0  ;;  %v891_v34 = vmax.f32 %v859_v50, 0.0 }
  0xd6   :  { %v431_v51 = vmul.f32 %v4392_v43, %v4991_v47  ;;  %v430_v55 = vmul.f32 %v4391_v44, %v4991_v47  ;;  %v433_v16 = vmul.f32 %v4398_v52, %v4991_v47  ;;  %v432_v20 = vmul.f32 %v4397_v53, %v4991_v47  ;;  %v1244_v44 = vld [vmem:[#allocation9 + $0x48] sm:$0xff]  ;;  %v1239_v52 = vld [vmem:[#allocation9 + $0x20] sm:$0xff] }
  0xd7   :  { %v923_v60 = vpack.c.bf16 %v893_v48, %v892_v46  ;;  %v922_v62 = vpack.c.bf16 %v891_v34, %v890_v56  ;;  %v4073_v42 = vcombine.low %v1236_v35, %v1240_v36  ;;  %v4074_v43 = vcombine.high %v1236_v35, %v1240_v36  ;;  %v1248_v46 = vld [vmem:[#allocation9 + $0x68] sm:$0xff] }
  0xd8   :  { %v4402_v57 = vpop.permute.xlu1 %4401  ;;  %v4413_v58 = vpop.permute.xlu0 %4412  ;;  %v469_v63 = vadd.f32 %v4999_v54, %v431_v51  ;;  %v468_v22 = vadd.f32 %v4999_v54, %v430_v55  ;;  %v471_v32 = vadd.f32 %v4999_v54, %v433_v16  ;;  %v470_v33 = vadd.f32 %v4999_v54, %v432_v20  ;;  %v1235_v51 = vld [vmem:[#allocation9] sm:$0xff]  ;;  %v1252_v56 = vld [vmem:[#allocation9 + $0x88] sm:$0xff] }
  0xd9   :  { %v4404_v61 = vunpack.i.h.bf16 %v4402_v57  ;;  %v4403_v18 = vunpack.i.l.bf16 %v4402_v57  ;;  %v4415_v45 = vunpack.i.h.bf16 %v4413_v58  ;;  %v4414_v21 = vunpack.i.l.bf16 %v4413_v58  ;;  %4268 = vmatprep.mubr.msk.bf16.mxu0 %vm977_vm0, %v922_v62  ;;  %1854 = vmatprep.subr.bf16.mxu0 %v4074_v43  ;;  %v1256_v34 = vld [vmem:[#allocation9 + $0xa8] sm:$0xff]  ;;  %v1243_v16 = vld [vmem:[#allocation9 + $0x40] sm:$0xff] }
  0xda   :  { %4269 = vmatmul.mubr.msk.bf16.vlgmr.msra.gmra.mrb[0].mxu0 %vm977_vm0, %v923_v60  ;;  %v1247_v20 = vld [vmem:[#allocation9 + $0x60] sm:$0xff] }
  0xdb   :  { %v634_v23 = vmul.f32 %v4404_v61, %v5004_v59  ;;  %v633_v24 = vmul.f32 %v4403_v18, %v5004_v59  ;;  %v831_v25 = vmul.f32 %v4415_v45, %v5015_v17  ;;  %v830_v26 = vmul.f32 %v4414_v21, %v5015_v17  ;;  %1855 = vmatpush1.bf16.msra.mxu0 %v4073_v42 }
  0xdc   :  { %v4407_v27 = vpop.permute.xlu1 %4406  ;;  %v4081_v61 = vcombine.low %v1244_v44, %v1248_v46  ;;  %v4082_v45 = vcombine.high %v1244_v44, %v1248_v46  ;;  %v4071_v21 = vcombine.low %v1235_v51, %v1239_v52 }
  0xdd   :  { %v665_v28 = vadd.f32 %v633_v24, %v468_v22  ;;  %v666_v29 = vadd.f32 %v634_v23, %v469_v63  ;;  %v4409_v30 = vunpack.i.h.bf16 %v4407_v27  ;;  %v4408_v31 = vunpack.i.l.bf16 %v4407_v27  ;;  %v5044_v41 = vpop.permute.xlu0 %4430 }
  0xde   :  { %v4072_v63 = vcombine.high %v1235_v51, %v1239_v52  ;;  %v4089_v22 = vcombine.low %v1252_v56, %v1256_v34  ;;  %1856 = vmatprep.subr.bf16.mxu0 %v4082_v45  ;;  %v4090_v27 = vcombine.high %v1252_v56, %v1256_v34  ;;  %v1263_v51 = vld [vmem:[#allocation9 + $0xe0] sm:$0xff] }
  0xdf   :  { %v863_v37 = vadd.f32 %v831_v25, %v666_v29  ;;  %v862_v38 = vadd.f32 %v830_v26, %v665_v28  ;;  %v636_v39 = vmul.f32 %v4409_v30, %v5004_v59  ;;  %v635_v40 = vmul.f32 %v4408_v31, %v5004_v59  ;;  %v1251_v28 = vld [vmem:[#allocation9 + $0x80] sm:$0xff]  ;;  %1857 = vmatpush1.bf16.msra.mxu0 %v4081_v61 }
  0xe0   :  { %1661 = vmatprep.subr.bf16.mxu1 %v4072_v63  ;;  %v1255_v29 = vld [vmem:[#allocation9 + $0xa0] sm:$0xff]  ;;  %1858 = vmatprep.subr.bf16.mxu0 %v4090_v27 }
  0xe1   :  { %v895_v48 = vmax.f32 %v863_v37, 0.0  ;;  %v894_v49 = vmax.f32 %v862_v38, 0.0  ;;  %v4419_v50 = vpop.permute.xlu1 %4418  ;;  %v667_v57 = vadd.f32 %v635_v40, %v470_v33  ;;  %v668_v58 = vadd.f32 %v636_v39, %v471_v32  ;;  %1662 = vmatpush1.bf16.msra.mxu1 %v4071_v21  ;;  %v1260_v39 = vld [vmem:[#allocation9 + $0xc8] sm:$0xff]  ;;  %v1267_v56 = vld [vmem:[#allocation9 + $0x100] sm:$0xff] }
  0xe2   :  { %v4421_v53 = vunpack.i.h.bf16 %v4419_v50  ;;  %v4420_v55 = vunpack.i.l.bf16 %v4419_v50  ;;  %v4448_v26 = vpop.permute.xlu0 %4447  ;;  %v4080_v32 = vcombine.high %v1243_v16, %v1247_v20  ;;  %v4079_v33 = vcombine.low %v1243_v16, %v1247_v20  ;;  %v1264_v40 = vld [vmem:[#allocation9 + $0xe8] sm:$0xff]  ;;  %v1259_v50 = vld [vmem:[#allocation9 + $0xc0] sm:$0xff] }
  0xe3   :  { %v924_v60 = vpack.c.bf16 %v895_v48, %v894_v49  ;;  %v4433_v37 = vunpack.i.h.bf16 %v5044_v41  ;;  %v4432_v38 = vunpack.i.l.bf16 %v5044_v41  ;;  %v4450_v43 = vunpack.i.h.bf16 %v4448_v26  ;;  %1859 = vmatpush1.bf16.msra.mxu0 %v4089_v22  ;;  %v1271_v61 = vld [vmem:[#allocation9 + $0x120] sm:$0xff] }
  0xe4   :  { %v833_v18 = vmul.f32 %v4421_v53, %v5015_v17  ;;  %v832_v62 = vmul.f32 %v4420_v55, %v5015_v17  ;;  %v4449_v44 = vunpack.i.l.bf16 %v4448_v26  ;;  %1663 = vmatprep.subr.bf16.mxu1 %v4080_v32  ;;  %v4088_v46 = vcombine.high %v1251_v28, %v1255_v29  ;;  %v1280_v26 = vld [vmem:[#allocation9 + $0x168] sm:$0xff] }
  0xe5   :  { %4272 = vmatprep.mubr.msk.bf16.mxu0 %vm977_vm0, %v924_v60  ;;  %1664 = vmatpush1.bf16.msra.mxu1 %v4079_v33  ;;  %v4087_v53 = vcombine.low %v1251_v28, %v1255_v29  ;;  %v4097_v55 = vcombine.low %v1260_v39, %v1264_v40  ;;  %v4098_v41 = vcombine.high %v1260_v39, %v1264_v40 }
  0xe6   :  { %v864_v23 = vadd.f32 %v832_v62, %v667_v57  ;;  %v865_v24 = vadd.f32 %v833_v18, %v668_v58  ;;  %v4425_v25 = vpop.permute.xlu1 %4424  ;;  %v437_v34 = vmul.f32 %v4433_v37, %v4991_v47  ;;  %v436_v57 = vmul.f32 %v4432_v38, %v4991_v47  ;;  %1665 = vmatprep.subr.bf16.mxu1 %v4088_v46  ;;  %v1268_v18 = vld [vmem:[#allocation9 + $0x108] sm:$0xff]  ;;  %v1279_v37 = vld [vmem:[#allocation9 + $0x160] sm:$0xff] }
  0xe7   :  { %v4427_v30 = vunpack.i.h.bf16 %v4425_v25  ;;  %v4426_v31 = vunpack.i.l.bf16 %v4425_v25  ;;  %v1272_v62 = vld [vmem:[#allocation9 + $0x128] sm:$0xff]  ;;  %v835_v63 = vmul.f32 %v4450_v43, %v5015_v17  ;;  %v834_v16 = vmul.f32 %v4449_v44, %v5015_v17  ;;  %1860 = vmatprep.subr.bf16.mxu0 %v4098_v41 }
  0xe8   :  { %v896_v35 = vmax.f32 %v864_v23, 0.0  ;;  %v897_v36 = vmax.f32 %v865_v24, 0.0  ;;  %v4096_v20 = vcombine.high %v1259_v50, %v1263_v51  ;;  %v4095_v24 = vcombine.low %v1259_v50, %v1263_v51  ;;  %v1276_v25 = vld [vmem:[#allocation9 + $0x148] sm:$0xff]  ;;  %1861 = vmatpush1.bf16.msra.mxu0 %v4097_v55 }
  0xe9   :  { %v435_v42 = vmul.f32 %v4427_v30, %v4991_v47  ;;  %v434_v48 = vmul.f32 %v4426_v31, %v4991_v47  ;;  %1666 = vmatpush1.bf16.msra.mxu1 %v4087_v53  ;;  %v4104_v28 = vcombine.high %v1267_v56, %v1271_v61  ;;  %v4105_v29 = vcombine.low %v1268_v18, %v1272_v62 }
  0xea   :  { %v925_v49 = vpack.c.bf16 %v897_v36, %v896_v35  ;;  %v4106_v30 = vcombine.high %v1268_v18, %v1272_v62  ;;  %1667 = vmatprep.subr.bf16.mxu1 %v4096_v20  ;;  %v1275_v36 = vld [vmem:[#allocation9 + $0x140] sm:$0xff]  ;;  %v4114_v38 = vcombine.high %v1276_v25, %v1280_v26  ;;  %v475_v39 = vadd.f32 %v4999_v54, %v437_v34 }
  0xeb   :  { %v4437_v52 = vpop.permute.xlu1 %4436  ;;  %v473_v45 = vadd.f32 %v4999_v54, %v435_v42  ;;  %v472_v21 = vadd.f32 %v4999_v54, %v434_v48  ;;  %v474_v40 = vadd.f32 %v4999_v54, %v436_v57  ;;  %v4466_v48 = vpop.permute.xlu0 %4465  ;;  %v4112_v53 = vcombine.high %v1275_v36, %v1279_v37 }
  0xec   :  { %v4439_v58 = vunpack.i.h.bf16 %v4437_v52  ;;  %v4438_v60 = vunpack.i.l.bf16 %v4437_v52  ;;  %4273 = vmatmul.mubr.msk.bf16.gmra.mrb[4].mxu0 %vm977_vm0, %v925_v49  ;;  %1862 = vmatprep.subr.bf16.mxu0 %v4106_v30  ;;  %v4103_v49 = vcombine.low %v1267_v56, %v1271_v61  ;;  %v4113_v34 = vcombine.low %v1276_v25, %v1280_v26 }
  0xed   :  { %1668 = vmatpush1.bf16.msra.mxu1 %v4095_v24  ;;  %1863 = vmatpush1.bf16.msra.mxu0 %v4105_v29  ;;  %v4468_v29 = vunpack.i.h.bf16 %v4466_v48  ;;  %v4467_v30 = vunpack.i.l.bf16 %v4466_v48 }
  0xee   :  { %v638_v22 = vmul.f32 %v4439_v58, %v5004_v59  ;;  %v637_v23 = vmul.f32 %v4438_v60, %v5004_v59  ;;  %1669 = vmatprep.subr.bf16.mxu1 %v4104_v28  ;;  %1864 = vmatprep.subr.bf16.mxu0 %v4114_v38  ;;  %v4111_v58 = vcombine.low %v1275_v36, %v1279_v37 }
  0xef   :  { %v4442_v27 = vpop.permute.xlu1 %4441 }
  0xf0   :  { %v669_v31 = vadd.f32 %v637_v23, %v472_v21  ;;  %v670_v32 = vadd.f32 %v638_v22, %v473_v45  ;;  %v4444_v33 = vunpack.i.h.bf16 %v4442_v27  ;;  %v4443_v35 = vunpack.i.l.bf16 %v4442_v27 }
  0xf1   :  { %1670 = vmatpush1.bf16.msra.mxu1 %v4103_v49  ;;  %1865 = vmatpush1.bf16.msra.mxu0 %v4113_v34 }
  0xf2   :  { %v867_v42 = vadd.f32 %v835_v63, %v670_v32  ;;  %v866_v43 = vadd.f32 %v834_v16, %v669_v31  ;;  %v640_v44 = vmul.f32 %v4444_v33, %v5004_v59  ;;  %v639_v46 = vmul.f32 %v4443_v35, %v5004_v59  ;;  %1671 = vmatprep.subr.bf16.mxu1 %v4112_v53  ;;  %v4483_v16 = vpop.permute.xlu0 %4482 }
  0xf3   :  { %v4485_v24 = vunpack.i.h.bf16 %v4483_v16  ;;  %v4484_v25 = vunpack.i.l.bf16 %v4483_v16 }
  0xf4   :  { %v899_v50 = vmax.f32 %v867_v42, 0.0  ;;  %v898_v51 = vmax.f32 %v866_v43, 0.0  ;;  %v4454_v52 = vpop.permute.xlu1 %4453  ;;  %v671_v60 = vadd.f32 %v639_v46, %v474_v40  ;;  %v672_v18 = vadd.f32 %v640_v44, %v475_v39 }
  0xf5   :  { %v4456_v55 = vunpack.i.h.bf16 %v4454_v52  ;;  %v4455_v41 = vunpack.i.l.bf16 %v4454_v52  ;;  %1672 = vmatpush1.bf16.msra.mxu1 %v4111_v58  ;;  %v839_v35 = vmul.f32 %v4485_v24, %v5015_v17  ;;  %v838_v36 = vmul.f32 %v4484_v25, %v5015_v17 }
  0xf6   :  { %v926_v57 = vpack.c.bf16 %v899_v50, %v898_v51  ;;  %v441_v42 = vmul.f32 %v4468_v29, %v4991_v47  ;;  %v440_v43 = vmul.f32 %v4467_v30, %v4991_v47 }
  0xf7   :  { %v837_v62 = vmul.f32 %v4456_v55, %v5015_v17  ;;  %v836_v45 = vmul.f32 %v4455_v41, %v5015_v17 }
  0xf8   :  { %4276 = vmatprep.mubr.msk.bf16.mxu0 %vm977_vm0, %v926_v57  ;;  %v479_v53 = vadd.f32 %v4999_v54, %v441_v42  ;;  %v478_v55 = vadd.f32 %v4999_v54, %v440_v43  ;;  %v4501_v57 = vpop.permute.xlu0 %4500 }
  0xf9   :  { %v868_v56 = vadd.f32 %v836_v45, %v671_v60  ;;  %v869_v61 = vadd.f32 %v837_v62, %v672_v18  ;;  %v4460_v63 = vpop.permute.xlu1 %4459 }
  0xfa   :  { %v4462_v20 = vunpack.i.h.bf16 %v4460_v63  ;;  %v4461_v21 = vunpack.i.l.bf16 %v4460_v63 }
  0xfb   :  { %v900_v22 = vmax.f32 %v868_v56, 0.0  ;;  %v901_v23 = vmax.f32 %v869_v61, 0.0 }
  0xfc   :  { %v439_v26 = vmul.f32 %v4462_v20, %v4991_v47  ;;  %v438_v27 = vmul.f32 %v4461_v21, %v4991_v47  ;;  %v4518_v24 = vpop.permute.xlu0 %4517 }
  0xfd   :  { %v927_v28 = vpack.c.bf16 %v901_v23, %v900_v22  ;;  %v4520_v29 = vunpack.i.h.bf16 %v4518_v24  ;;  %v4519_v30 = vunpack.i.l.bf16 %v4518_v24 }
  0xfe   :  { %v4472_v31 = vpop.permute.xlu1 %4471  ;;  %v477_v37 = vadd.f32 %v4999_v54, %v439_v26  ;;  %v476_v38 = vadd.f32 %v4999_v54, %v438_v27 }
  0xff   :  { %v4474_v32 = vunpack.i.h.bf16 %v4472_v31  ;;  %v4473_v33 = vunpack.i.l.bf16 %v4472_v31  ;;  %4277 = vmatmul.mubr.msk.bf16.gmra.mrb[8].mxu0 %vm977_vm0, %v927_v28  ;;  %v842_v42 = vmul.f32 %v4519_v30, %v5015_v17 }
 0x101   :  { %v642_v39 = vmul.f32 %v4474_v32, %v5004_v59  ;;  %v641_v40 = vmul.f32 %v4473_v33, %v5004_v59 }
 0x102   :  { %v4477_v44 = vpop.permute.xlu1 %4476 }
 0x103   :  { %v673_v46 = vadd.f32 %v641_v40, %v476_v38  ;;  %v674_v48 = vadd.f32 %v642_v39, %v477_v37  ;;  %v4479_v49 = vunpack.i.h.bf16 %v4477_v44  ;;  %v4478_v50 = vunpack.i.l.bf16 %v4477_v44 }
 0x104   :  { %v843_v40 = vmul.f32 %v4520_v29, %v5015_v17 }
 0x105   :  { %v871_v51 = vadd.f32 %v839_v35, %v674_v48  ;;  %v870_v52 = vadd.f32 %v838_v36, %v673_v46  ;;  %v644_v41 = vmul.f32 %v4479_v49, %v5004_v59  ;;  %v643_v34 = vmul.f32 %v4478_v50, %v5004_v59 }
 0x106   :  { %v4503_v35 = vunpack.i.h.bf16 %v4501_v57  ;;  %v4502_v36 = vunpack.i.l.bf16 %v4501_v57 }
 0x107   :  { %v903_v58 = vmax.f32 %v871_v51, 0.0  ;;  %v902_v60 = vmax.f32 %v870_v52, 0.0  ;;  %v4489_v18 = vpop.permute.xlu1 %4488  ;;  %v675_v61 = vadd.f32 %v643_v34, %v478_v55  ;;  %v676_v63 = vadd.f32 %v644_v41, %v479_v53 }
 0x108   :  { %v4491_v62 = vunpack.i.h.bf16 %v4489_v18  ;;  %v4490_v45 = vunpack.i.l.bf16 %v4489_v18  ;;  %v445_v49 = vmul.f32 %v4503_v35, %v4991_v47  ;;  %v444_v50 = vmul.f32 %v4502_v36, %v4991_v47 }
 0x109   :  { %v928_v56 = vpack.c.bf16 %v903_v58, %v902_v60 }
 0x10a   :  { %v841_v16 = vmul.f32 %v4491_v62, %v5015_v17  ;;  %v840_v20 = vmul.f32 %v4490_v45, %v5015_v17  ;;  %v483_v58 = vadd.f32 %v4999_v54, %v445_v49  ;;  %v482_v60 = vadd.f32 %v4999_v54, %v444_v50  ;;  %v4536_v45 = vpop.permute.xlu0 %4535 }
 0x10b   :  { %4280 = vmatprep.mubr.msk.bf16.mxu0 %vm977_vm0, %v928_v56  ;;  %v4538_v35 = vunpack.i.h.bf16 %v4536_v45  ;;  %v4537_v36 = vunpack.i.l.bf16 %v4536_v45 }
 0x10c   :  { %v872_v21 = vadd.f32 %v840_v20, %v675_v61  ;;  %v873_v22 = vadd.f32 %v841_v16, %v676_v63  ;;  %v4495_v23 = vpop.permute.xlu1 %4494 }
 0x10d   :  { %v4497_v25 = vunpack.i.h.bf16 %v4495_v23  ;;  %v4496_v26 = vunpack.i.l.bf16 %v4495_v23  ;;  %v448_v49 = vmul.f32 %v4537_v36, %v4991_v47 }
 0x10e   :  { %v904_v27 = vmax.f32 %v872_v21, 0.0  ;;  %v905_v28 = vmax.f32 %v873_v22, 0.0  ;;  %v4553_v29 = vpop.permute.xlu0 %4552 }
 0x10f   :  { %v443_v31 = vmul.f32 %v4497_v25, %v4991_v47  ;;  %v442_v32 = vmul.f32 %v4496_v26, %v4991_v47  ;;  %v486_v45 = vadd.f32 %v4999_v54, %v448_v49  ;;  %v1292_v49 = vld [vmem:[#allocation9 + $0x1c8] sm:$0xff] }
 0x110   :  { %v929_v33 = vpack.c.bf16 %v905_v28, %v904_v27 }
 0x111   :  { %v4507_v37 = vpop.permute.xlu1 %4506  ;;  %v481_v43 = vadd.f32 %v4999_v54, %v443_v31  ;;  %v480_v44 = vadd.f32 %v4999_v54, %v442_v32 }
 0x112   :  { %v4509_v38 = vunpack.i.h.bf16 %v4507_v37  ;;  %v4508_v39 = vunpack.i.l.bf16 %v4507_v37  ;;  %4281 = vmatmul.mubr.msk.bf16.gmra.mrb[12].mxu0 %vm977_vm0, %v929_v33  ;;  %v4555_v37 = vunpack.i.h.bf16 %v4553_v29 }
 0x114   :  { %v646_v46 = vmul.f32 %v4509_v38, %v5004_v59  ;;  %v645_v48 = vmul.f32 %v4508_v39, %v5004_v59  ;;  %v4554_v38 = vunpack.i.l.bf16 %v4553_v29  ;;  %v847_v50 = vmul.f32 %v4555_v37, %v5015_v17 }
 0x115   :  { %v4512_v51 = vpop.permute.xlu1 %4511 }
 0x116   :  { %v677_v52 = vadd.f32 %v645_v48, %v480_v44  ;;  %v678_v53 = vadd.f32 %v646_v46, %v481_v43  ;;  %v4514_v55 = vunpack.i.h.bf16 %v4512_v51  ;;  %v4513_v41 = vunpack.i.l.bf16 %v4512_v51 }
 0x117   :  { %v449_v48 = vmul.f32 %v4538_v35, %v4991_v47  ;;  %v846_v51 = vmul.f32 %v4554_v38, %v5015_v17 }
 0x118   :  { %v875_v34 = vadd.f32 %v843_v40, %v678_v53  ;;  %v874_v57 = vadd.f32 %v842_v42, %v677_v52  ;;  %v648_v18 = vmul.f32 %v4514_v55, %v5004_v59  ;;  %v647_v62 = vmul.f32 %v4513_v41, %v5004_v59 }
 0x11a   :  { %v907_v56 = vmax.f32 %v875_v34, 0.0  ;;  %v906_v61 = vmax.f32 %v874_v57, 0.0  ;;  %v4524_v63 = vpop.permute.xlu1 %4523  ;;  %v679_v22 = vadd.f32 %v647_v62, %v482_v60  ;;  %v680_v23 = vadd.f32 %v648_v18, %v483_v58 }
 0x11b   :  { %v4526_v16 = vunpack.i.h.bf16 %v4524_v63  ;;  %v4525_v20 = vunpack.i.l.bf16 %v4524_v63  ;;  %v487_v62 = vadd.f32 %v4999_v54, %v449_v48  ;;  %v1295_v48 = vld [vmem:[#allocation9 + $0x1e0] sm:$0xff] }
 0x11c   :  { %v930_v21 = vpack.c.bf16 %v907_v56, %v906_v61 }
 0x11d   :  { %v845_v24 = vmul.f32 %v4526_v16, %v5015_v17  ;;  %v844_v25 = vmul.f32 %v4525_v20, %v5015_v17  ;;  %v5120_v20 = vpop.permute.xlu0 %4570 }
 0x11e   :  { %4284 = vmatprep.mubr.msk.bf16.mxu0 %vm977_vm0, %v930_v21 }
 0x11f   :  { %v876_v26 = vadd.f32 %v844_v25, %v679_v22  ;;  %v877_v27 = vadd.f32 %v845_v24, %v680_v23  ;;  %v4530_v28 = vpop.permute.xlu1 %4529 }
 0x120   :  { %v4532_v30 = vunpack.i.h.bf16 %v4530_v28  ;;  %v4531_v31 = vunpack.i.l.bf16 %v4530_v28  ;;  %v1284_v28 = vld [vmem:[#allocation9 + $0x188] sm:$0xff] }
 0x121   :  { %v908_v32 = vmax.f32 %v876_v26, 0.0  ;;  %v909_v33 = vmax.f32 %v877_v27, 0.0  ;;  %v1283_v26 = vld [vmem:[#allocation9 + $0x180] sm:$0xff] }
 0x122   :  { %v447_v39 = vmul.f32 %v4532_v30, %v4991_v47  ;;  %v446_v40 = vmul.f32 %v4531_v31, %v4991_v47  ;;  %v1287_v27 = vld [vmem:[#allocation9 + $0x1a0] sm:$0xff] }
 0x123   :  { %v931_v42 = vpack.c.bf16 %v909_v33, %v908_v32  ;;  %v4120_v32 = vcombine.high %v1283_v26, %v1287_v27  ;;  %v1288_v33 = vld [vmem:[#allocation9 + $0x1a8] sm:$0xff] }
 0x124   :  { %v4542_v43 = vpop.permute.xlu1 %4541  ;;  %v485_v52 = vadd.f32 %v4999_v54, %v447_v39  ;;  %v484_v53 = vadd.f32 %v4999_v54, %v446_v40  ;;  %v4121_v37 = vcombine.low %v1284_v28, %v1288_v33  ;;  %v4122_v38 = vcombine.high %v1284_v28, %v1288_v33 }
 0x125   :  { %v4544_v44 = vunpack.i.h.bf16 %v4542_v43  ;;  %v4543_v46 = vunpack.i.l.bf16 %v4542_v43  ;;  %4285 = vmatmul.mubr.msk.bf16.gmra.mrb[16].mxu0 %vm977_vm0, %v931_v42  ;;  %1673 = vmatprep.subr.bf16.mxu1 %v4120_v32  ;;  %v4119_v39 = vcombine.low %v1283_v26, %v1287_v27 }
 0x126   :  { %1866 = vmatprep.subr.bf16.mxu0 %v4122_v38 }
 0x127   :  { %v650_v55 = vmul.f32 %v4544_v44, %v5004_v59  ;;  %v649_v41 = vmul.f32 %v4543_v46, %v5004_v59  ;;  %v4588_v44 = vpop.permute.xlu0 %4587  ;;  %v1291_v46 = vld [vmem:[#allocation9 + $0x1c0] sm:$0xff]  ;;  %1674 = vmatpush1.bf16.msra.mxu1 %v4119_v39  ;;  %1867 = vmatpush1.bf16.msra.mxu0 %v4121_v37 }
 0x128   :  { %v4547_v34 = vpop.permute.xlu1 %4546 }
 0x129   :  { %v681_v57 = vadd.f32 %v649_v41, %v484_v53  ;;  %v682_v58 = vadd.f32 %v650_v55, %v485_v52  ;;  %v4549_v60 = vunpack.i.h.bf16 %v4547_v34  ;;  %v4548_v18 = vunpack.i.l.bf16 %v4547_v34  ;;  %v1296_v53 = vld [vmem:[#allocation9 + $0x1e8] sm:$0xff] }
 0x12a   :  { %v4128_v52 = vcombine.high %v1291_v46, %v1295_v48  ;;  %v4129_v34 = vcombine.low %v1292_v49, %v1296_v53 }
 0x12b   :  { %v879_v56 = vadd.f32 %v847_v50, %v682_v58  ;;  %v878_v61 = vadd.f32 %v846_v51, %v681_v57  ;;  %v652_v63 = vmul.f32 %v4549_v60, %v5004_v59  ;;  %v651_v16 = vmul.f32 %v4548_v18, %v5004_v59 }
 0x12c   :  { %v4130_v57 = vcombine.high %v1292_v49, %v1296_v53  ;;  %v4590_v58 = vunpack.i.h.bf16 %v4588_v44  ;;  %v4589_v60 = vunpack.i.l.bf16 %v4588_v44  ;;  %1675 = vmatprep.subr.bf16.mxu1 %v4128_v52  ;;  %v4127_v18 = vcombine.low %v1291_v46, %v1295_v48 }
 0x12d   :  { %v911_v21 = vmax.f32 %v879_v56, 0.0  ;;  %v910_v22 = vmax.f32 %v878_v61, 0.0  ;;  %v4559_v23 = vpop.permute.xlu1 %4558  ;;  %v683_v29 = vadd.f32 %v651_v16, %v486_v45  ;;  %v684_v30 = vadd.f32 %v652_v63, %v487_v62 }
 0x12e   :  { %v4561_v24 = vunpack.i.h.bf16 %v4559_v23  ;;  %v4560_v25 = vunpack.i.l.bf16 %v4559_v23  ;;  %1868 = vmatprep.subr.bf16.mxu0 %v4130_v57  ;;  %v4573_v61 = vunpack.i.h.bf16 %v5120_v20  ;;  %v4572_v63 = vunpack.i.l.bf16 %v5120_v20  ;;  %1676 = vmatpush1.bf16.msra.mxu1 %v4127_v18 }
 0x12f   :  { %v932_v31 = vpack.c.bf16 %v911_v21, %v910_v22  ;;  %1869 = vmatpush1.bf16.msra.mxu0 %v4129_v34  ;;  %v851_v23 = vmul.f32 %v4590_v58, %v5015_v17 }
 0x130   :  { %v849_v35 = vmul.f32 %v4561_v24, %v5015_v17  ;;  %v848_v36 = vmul.f32 %v4560_v25, %v5015_v17  ;;  %v850_v24 = vmul.f32 %v4589_v60, %v5015_v17  ;;  %v453_v20 = vmul.f32 %v4573_v61, %v4991_v47 }
 0x131   :  { %4288 = vmatprep.mubr.msk.bf16.mxu0 %vm977_vm0, %v932_v31 }
 0x132   :  { %v880_v40 = vadd.f32 %v848_v36, %v683_v29  ;;  %v881_v42 = vadd.f32 %v849_v35, %v684_v30  ;;  %v4565_v43 = vpop.permute.xlu1 %4564  ;;  %v452_v29 = vmul.f32 %v4572_v63, %v4991_v47  ;;  %v491_v38 = vadd.f32 %v4999_v54, %v453_v20 }
 0x133   :  { %v4567_v50 = vunpack.i.h.bf16 %v4565_v43  ;;  %v4566_v51 = vunpack.i.l.bf16 %v4565_v43  ;;  %v4606_v43 = vpop.permute.xlu0 %4605 }
 0x134   :  { %v912_v55 = vmax.f32 %v880_v40, 0.0  ;;  %v913_v41 = vmax.f32 %v881_v42, 0.0  ;;  %v490_v39 = vadd.f32 %v4999_v54, %v452_v29 }
 0x135   :  { %v451_v62 = vmul.f32 %v4567_v50, %v4991_v47  ;;  %v450_v45 = vmul.f32 %v4566_v51, %v4991_v47 }
 0x136   :  { %v933_v56 = vpack.c.bf16 %v913_v41, %v912_v55 }
 0x137   :  { %v4577_v16 = vpop.permute.xlu1 %4576  ;;  %v489_v25 = vadd.f32 %v4999_v54, %v451_v62  ;;  %v488_v26 = vadd.f32 %v4999_v54, %v450_v45  ;;  %v4623_v60 = vpop.permute.xlu0 %4622 }
 0x138   :  { %v4579_v21 = vunpack.i.h.bf16 %v4577_v16  ;;  %v4578_v22 = vunpack.i.l.bf16 %v4577_v16  ;;  %4289 = vmatmul.mubr.msk.bf16.gmra.mrb[20].mxu0 %vm977_vm0, %v933_v56  ;;  %v4625_v61 = vunpack.i.h.bf16 %v4623_v60  ;;  %v4624_v63 = vunpack.i.l.bf16 %v4623_v60 }
 0x13a   :  { %v654_v27 = vmul.f32 %v4579_v21, %v5004_v59  ;;  %v653_v28 = vmul.f32 %v4578_v22, %v5004_v59 }
 0x13b   :  { %v4582_v30 = vpop.permute.xlu1 %4581 }
 0x13c   :  { %v685_v31 = vadd.f32 %v653_v28, %v488_v26  ;;  %v686_v32 = vadd.f32 %v654_v27, %v489_v25  ;;  %v4584_v33 = vunpack.i.h.bf16 %v4582_v30  ;;  %v4583_v35 = vunpack.i.l.bf16 %v4582_v30  ;;  %v5151_v25 = vld [vmem:[#allocation9 + $0x18] sm:$0xff] }
 0x13d   :  { %v4608_v26 = vunpack.i.h.bf16 %v4606_v43  ;;  %v4607_v27 = vunpack.i.l.bf16 %v4606_v43  ;;  %v5157_v30 = vld [vmem:[#allocation9 + $0x38] sm:$0xff] }
 0x13e   :  { %v883_v36 = vadd.f32 %v851_v23, %v686_v32  ;;  %v882_v37 = vadd.f32 %v850_v24, %v685_v31  ;;  %v656_v40 = vmul.f32 %v4584_v33, %v5004_v59  ;;  %v655_v42 = vmul.f32 %v4583_v35, %v5004_v59  ;;  %v5147_v23 = vld [vmem:[#allocation9 + $0x10] sm:$0xff] }
 0x13f   :  { %v5149_v24 = vld [vmem:[#allocation9 + $0x30] sm:$0xff]  ;;  %v4077_v33 = vcombine.low %v5151_v25, %v5157_v30  ;;  %v4078_v35 = vcombine.high %v5151_v25, %v5157_v30  ;;  %v457_v43 = vmul.f32 %v4608_v26, %v4991_v47 }
 0x140   :  { %v915_v44 = vmax.f32 %v883_v36, 0.0  ;;  %v914_v46 = vmax.f32 %v882_v37, 0.0  ;;  %v4594_v48 = vpop.permute.xlu1 %4593  ;;  %v687_v52 = vadd.f32 %v655_v42, %v490_v39  ;;  %v688_v53 = vadd.f32 %v656_v40, %v491_v38 }
 0x141   :  { %v4596_v49 = vunpack.i.h.bf16 %v4594_v48  ;;  %v4595_v50 = vunpack.i.l.bf16 %v4594_v48  ;;  %v4075_v20 = vcombine.low %v5147_v23, %v5149_v24  ;;  %v4076_v29 = vcombine.high %v5147_v23, %v5149_v24  ;;  %2240 = vmatprep.subr.bf16.mxu0 %v4078_v35 }
 0x142   :  { %v934_v51 = vpack.c.bf16 %v915_v44, %v914_v46  ;;  %v855_v36 = vmul.f32 %v4625_v61, %v5015_v17  ;;  %v854_v37 = vmul.f32 %v4624_v63, %v5015_v17  ;;  %v456_v44 = vmul.f32 %v4607_v27, %v4991_v47 }
 0x143   :  { %v853_v55 = vmul.f32 %v4596_v49, %v5015_v17  ;;  %v852_v41 = vmul.f32 %v4595_v50, %v5015_v17  ;;  %2047 = vmatprep.subr.bf16.mxu1 %v4076_v29 }
 0x144   :  { %4292 = vmatprep.mubr.msk.bf16.mxu0 %vm977_vm0, %v934_v51 }
 0x145   :  { %v884_v34 = vadd.f32 %v852_v41, %v687_v52  ;;  %v885_v57 = vadd.f32 %v853_v55, %v688_v53  ;;  %v4600_v58 = vpop.permute.xlu1 %4599  ;;  %v495_v55 = vadd.f32 %v4999_v54, %v457_v43  ;;  %v494_v41 = vadd.f32 %v4999_v54, %v456_v44  ;;  %v1249_v44 = vld [vmem:[#allocation9 + $0x70] sm:$0xff] }
 0x146   :  { %v4602_v18 = vunpack.i.h.bf16 %v4600_v58  ;;  %v4601_v62 = vunpack.i.l.bf16 %v4600_v58 }
 0x147   :  { %v916_v45 = vmax.f32 %v884_v34, 0.0  ;;  %v917_v56 = vmax.f32 %v885_v57, 0.0 }
 0x148   :  { %v455_v16 = vmul.f32 %v4602_v18, %v4991_v47  ;;  %v454_v21 = vmul.f32 %v4601_v62, %v4991_v47 }
 0x149   :  { %v935_v22 = vpack.c.bf16 %v917_v56, %v916_v45 }
 0x14a   :  { %v4612_v28 = vpop.permute.xlu1 %4611  ;;  %v493_v38 = vadd.f32 %v4999_v54, %v455_v16  ;;  %v492_v39 = vadd.f32 %v4999_v54, %v454_v21 }
 0x14b   :  { %v4614_v31 = vunpack.i.h.bf16 %v4612_v28  ;;  %v4613_v32 = vunpack.i.l.bf16 %v4612_v28  ;;  %4293 = vmatmul.mubr.msk.bf16.gmra.mrb[24].mxu0 %vm977_vm0, %v935_v22 }
 0x14d   :  { %v658_v40 = vmul.f32 %v4614_v31, %v5004_v59  ;;  %v657_v42 = vmul.f32 %v4613_v32, %v5004_v59 }
 0x14e   :  { %v4617_v46 = vpop.permute.xlu1 %4616 }
 0x14f   :  { %v689_v48 = vadd.f32 %v657_v42, %v492_v39  ;;  %v690_v49 = vadd.f32 %v658_v40, %v493_v38  ;;  %v4619_v50 = vunpack.i.h.bf16 %v4617_v46  ;;  %v4618_v51 = vunpack.i.l.bf16 %v4617_v46  ;;  %v1245_v40 = vld [vmem:[#allocation9 + $0x50] sm:$0xff]  ;;  %v1246_v46 = vld [vmem:[#allocation9 + $0x58] sm:$0xff] }
 0x151   :  { %v887_v52 = vadd.f32 %v855_v36, %v690_v49  ;;  %v886_v53 = vadd.f32 %v854_v37, %v689_v48  ;;  %v660_v34 = vmul.f32 %v4619_v50, %v5004_v59  ;;  %v659_v57 = vmul.f32 %v4618_v51, %v5004_v59  ;;  %v5184_v59 = vld [vmem:[%s5987_s4 + $0x1] ss:$0 sm:$0xff]  ;;  %v1250_v48 = vld [vmem:[#allocation9 + $0x78] sm:$0xff] }
 0x152   :  { %v4084_v51 = vcombine.high %v1245_v40, %v1249_v44 }
 0x153   :  { %v919_v58 = vmax.f32 %v887_v52, 0.0  ;;  %v918_v60 = vmax.f32 %v886_v53, 0.0  ;;  %v4629_v18 = vpop.permute.xlu1 %4628  ;;  %v691_v56 = vadd.f32 %v659_v57, %v494_v41  ;;  %v692_v61 = vadd.f32 %v660_v34, %v495_v55  ;;  %v1253_v53 = vld [vmem:[#allocation9 + $0x90] sm:$0xff]  ;;  %v1254_v41 = vld [vmem:[#allocation9 + $0x98] sm:$0xff] }
 0x154   :  { %v4631_v62 = vunpack.i.h.bf16 %v4629_v18  ;;  %v4630_v47 = vunpack.i.l.bf16 %v4629_v18  ;;  %v4086_v52 = vcombine.high %v1246_v46, %v1250_v48  ;;  %v1257_v55 = vld [vmem:[#allocation9 + $0xb0] sm:$0xff]  ;;  %v1258_v34 = vld [vmem:[#allocation9 + $0xb8] sm:$0xff]  ;;  %v4083_v57 = vcombine.low %v1245_v40, %v1249_v44 }
 0x155   :  { %v936_v45 = vpack.c.bf16 %v919_v58, %v918_v60  ;;  %v4085_v58 = vcombine.low %v1246_v46, %v1250_v48  ;;  %v4092_v60 = vcombine.high %v1253_v53, %v1257_v55  ;;  %v4094_v18 = vcombine.high %v1254_v41, %v1258_v34  ;;  %v1282_v44 = vld [vmem:[#allocation9 + $0x178] sm:$0xff] }
 0x156   :  { %v857_v63 = vmul.f32 %v4631_v62, %v5015_v17  ;;  %v856_v16 = vmul.f32 %v4630_v47, %v5015_v17  ;;  %v1261_v62 = vld [vmem:[#allocation9 + $0xd0] sm:$0xff]  ;;  %v4093_v23 = vcombine.low %v1254_v41, %v1258_v34 }
 0x157   :  { %4296 = vmatprep.mubr.msk.bf16.mxu0 %vm977_vm0, %v936_v45  ;;  %v1265_v47 = vld [vmem:[#allocation9 + $0xf0] sm:$0xff]  ;;  %v1262_v45 = vld [vmem:[#allocation9 + $0xd8] sm:$0xff] }
 0x158   :  { %v888_v21 = vadd.f32 %v856_v16, %v691_v56  ;;  %v889_v54 = vadd.f32 %v857_v63, %v692_v61  ;;  %v1266_v56 = vld [vmem:[#allocation9 + $0xf8] sm:$0xff]  ;;  %v4091_v63 = vcombine.low %v1253_v53, %v1257_v55  ;;  %v4100_v25 = vcombine.high %v1261_v62, %v1265_v47  ;;  %v1285_v41 = vld [vmem:[#allocation9 + $0x190] sm:$0xff] }
 0x159   :  { %v4102_v30 = vcombine.high %v1262_v45, %v1266_v56  ;;  %v1289_v34 = vld [vmem:[#allocation9 + $0x1b0] sm:$0xff] }
 0x15a   :  { %v920_v22 = vmax.f32 %v888_v21, 0.0  ;;  %v921_v26 = vmax.f32 %v889_v54, 0.0  ;;  %v1273_v54 = vld [vmem:[#allocation9 + $0x130] sm:$0xff] }
 0x15c   :  { %v937_v27 = vpack.c.bf16 %v921_v26, %v920_v22  ;;  %v1270_v22 = vld [vmem:[#allocation9 + $0x118] sm:$0xff] }
 0x15d   :  { %v1274_v26 = vld [vmem:[#allocation9 + $0x138] sm:$0xff] }
 0x15e   :  { %4297 = vmatmul.mubr.msk.bf16.gmra.mrb[28].mxu0 %vm977_vm0, %v937_v27 }
 0x15f   :  { %1886 = vmatprep.mubr.bf16.mxu0 %v4731_v19 }
 0x1ad   :  { %v4270_v28 = vpop.f32.mrb[0].mxu0 }
 0x1ae   :  { %v1069_v29 = vadd.f32 %v4270_v28, %v5184_v59  ;;  %v1060_v17 = vpop.f32.mrb[1].mxu0 }
 0x1af   :  { %v1061_v31 = vadd.f32 %v5184_v59, %v1060_v17  ;;  %v4271_v32 = vpop.f32.mrb[2].mxu0  ;;  %v4099_v17 = vcombine.low %v1261_v62, %v1265_v47  ;;  %v4124_v62 = vcombine.high %v1285_v41, %v1289_v34 }
 0x1b0   :  { %v1072_v35 = vadd.f32 %v4271_v32, %v5184_v59  ;;  %v1063_v36 = vpop.f32.mrb[3].mxu0  ;;  %v1189_v38 = vmax.f32 %v1069_v29, 0.0 }
 0x1b1   :  { %v1064_v37 = vadd.f32 %v5184_v59, %v1063_v36  ;;  %v1187_v42 = vmax.f32 %v1061_v31, 0.0  ;;  %v4101_v31 = vcombine.low %v1262_v45, %v1266_v56  ;;  %v1293_v45 = vld [vmem:[#allocation9 + $0x1d0] sm:$0xff] }
 0x1b2   :  { %v1190_v39 = vmax.f32 %v1072_v35, 0.0  ;;  %v1297_v56 = vld [vmem:[#allocation9 + $0x1f0] sm:$0xff] }
 0x1b3   :  { %v1188_v43 = vmax.f32 %v1064_v37, 0.0  ;;  %v4110_v37 = vcombine.high %v1270_v22, %v1274_v26 }
 0x1b4   :  { %v5190_v49 = vpack.c.bf16 %v1190_v39, %v1189_v38  ;;  %v1277_v38 = vld [vmem:[#allocation9 + $0x150] sm:$0xff] }
 0x1b5   :  { %v5192_v50 = vpack.c.bf16 %v1188_v43, %v1187_v42  ;;  %v1281_v42 = vld [vmem:[#allocation9 + $0x170] sm:$0xff]  ;;  %v1278_v43 = vld [vmem:[#allocation9 + $0x158] sm:$0xff] }
 0x1b6   :  { %v4116_v53 = vcombine.high %v1277_v38, %v1281_v42  ;;  %v4118_v55 = vcombine.high %v1278_v43, %v1282_v44 }
 0x1b7   :  { %1694 = vmatmul.mubr.bf16.vlgmr.msra.gmra.mrb[0].mxu1 %v5192_v50  ;;  %1887 = vmatmul.mubr.bf16.vlgmr.msra.gmra.mrb[32].mxu0 %v5192_v50 }
 0x1b8   :  { %1703 = vmatprep.mubr.bf16.mxu1 %v4731_v19  ;;  %1896 = vmatprep.mubr.bf16.mxu0 %v4731_v19 }
 0x1b9   :  { %2048 = vmatpush1.bf16.msra.mxu1 %v4075_v20  ;;  %2241 = vmatpush1.bf16.msra.mxu0 %v4077_v33  ;;  %v1269_v33 = vld [vmem:[#allocation9 + $0x110] sm:$0xff] }
 0x1ba   :  { %2049 = vmatprep.subr.bf16.mxu1 %v4084_v51  ;;  %2242 = vmatprep.subr.bf16.mxu0 %v4086_v52  ;;  %v4108_v36 = vcombine.high %v1269_v33, %v1273_v54  ;;  %v4107_v51 = vcombine.low %v1269_v33, %v1273_v54  ;;  %v4109_v52 = vcombine.low %v1270_v22, %v1274_v26 }
 0x1bd   :  { %2050 = vmatpush1.bf16.msra.mxu1 %v4083_v57  ;;  %2243 = vmatpush1.bf16.msra.mxu0 %v4085_v58  ;;  %v1286_v57 = vld [vmem:[#allocation9 + $0x198] sm:$0xff] }
 0x1be   :  { %2051 = vmatprep.subr.bf16.mxu1 %v4092_v60  ;;  %2244 = vmatprep.subr.bf16.mxu0 %v4094_v18  ;;  %v1290_v58 = vld [vmem:[#allocation9 + $0x1b8] sm:$0xff]  ;;  %v4115_v60 = vcombine.low %v1277_v38, %v1281_v42  ;;  %v4117_v18 = vcombine.low %v1278_v43, %v1282_v44 }
 0x1bf   :  { %v4274_v61 = vpop.f32.mrb[4].mxu0  ;;  %1704 = vmatmul.mubr.bf16.gmra.mrb[4].mxu1 %v5190_v49  ;;  %1897 = vmatmul.mubr.bf16.gmra.mrb[36].mxu0 %v5190_v49  ;;  %v4126_v47 = vcombine.high %v1286_v57, %v1290_v58 }
 0x1c0   :  { %v1085_v24 = vadd.f32 %v4274_v61, %v5184_v59  ;;  %v1076_v20 = vpop.f32.mrb[5].mxu0  ;;  %1713 = vmatprep.mubr.bf16.mxu1 %v4731_v19  ;;  %1906 = vmatprep.mubr.bf16.mxu0 %v4731_v19  ;;  %v1294_v61 = vld [vmem:[#allocation9 + $0x1d8] sm:$0xff] }
 0x1c1   :  { %v1077_v16 = vadd.f32 %v5184_v59, %v1076_v20  ;;  %v4275_v21 = vpop.f32.mrb[6].mxu0  ;;  %2052 = vmatpush1.bf16.msra.mxu1 %v4091_v63  ;;  %2245 = vmatpush1.bf16.msra.mxu0 %v4093_v23  ;;  %v1298_v63 = vld [vmem:[#allocation9 + $0x1f8] sm:$0xff]  ;;  %v4123_v23 = vcombine.low %v1285_v41, %v1289_v34  ;;  %v4132_v20 = vcombine.high %v1293_v45, %v1297_v56 }
 0x1c2   :  { %v1088_v27 = vadd.f32 %v4275_v21, %v5184_v59  ;;  %v1079_v28 = vpop.f32.mrb[7].mxu0  ;;  %v1193_v32 = vmax.f32 %v1085_v24, 0.0  ;;  %2053 = vmatprep.subr.bf16.mxu1 %v4100_v25  ;;  %2246 = vmatprep.subr.bf16.mxu0 %v4102_v30  ;;  %v4125_v24 = vcombine.low %v1286_v57, %v1290_v58  ;;  %v4134_v25 = vcombine.high %v1294_v61, %v1298_v63 }
 0x1c3   :  { %v1080_v29 = vadd.f32 %v5184_v59, %v1079_v28  ;;  %v1191_v39 = vmax.f32 %v1077_v16, 0.0  ;;  %v4131_v21 = vcombine.low %v1293_v45, %v1297_v56  ;;  %v4133_v54 = vcombine.low %v1294_v61, %v1298_v63 }
 0x1c4   :  { %v1194_v35 = vmax.f32 %v1088_v27, 0.0 }
 0x1c5   :  { %v1192_v40 = vmax.f32 %v1080_v29, 0.0  ;;  %2054 = vmatpush1.bf16.msra.mxu1 %v4099_v17  ;;  %2247 = vmatpush1.bf16.msra.mxu0 %v4101_v31 }
 0x1c6   :  { %v5212_v46 = vpack.c.bf16 %v1194_v35, %v1193_v32  ;;  %2055 = vmatprep.subr.bf16.mxu1 %v4108_v36  ;;  %2248 = vmatprep.subr.bf16.mxu0 %v4110_v37 }
 0x1c7   :  { %v5214_v48 = vpack.c.bf16 %v1192_v40, %v1191_v39 }
 0x1c9   :  { %1714 = vmatmul.mubr.bf16.gmra.mrb[8].mxu1 %v5214_v48  ;;  %1907 = vmatmul.mubr.bf16.gmra.mrb[40].mxu0 %v5214_v48 }
 0x1ca   :  { %1723 = vmatprep.mubr.bf16.mxu1 %v4731_v19  ;;  %1916 = vmatprep.mubr.bf16.mxu0 %v4731_v19 }
 0x1cb   :  { %2056 = vmatpush1.bf16.msra.mxu1 %v4107_v51  ;;  %2249 = vmatpush1.bf16.msra.mxu0 %v4109_v52 }
 0x1cc   :  { %2057 = vmatprep.subr.bf16.mxu1 %v4116_v53  ;;  %2250 = vmatprep.subr.bf16.mxu0 %v4118_v55 }
 0x1cf   :  { %2058 = vmatpush1.bf16.msra.mxu1 %v4115_v60  ;;  %2251 = vmatpush1.bf16.msra.mxu0 %v4117_v18 }
 0x1d0   :  { %2059 = vmatprep.subr.bf16.mxu1 %v4124_v62  ;;  %2252 = vmatprep.subr.bf16.mxu0 %v4126_v47 }
 0x1d1   :  { %1724 = vmatmul.mubr.bf16.gmra.mrb[12].mxu1 %v5212_v46  ;;  %1917 = vmatmul.mubr.bf16.gmra.mrb[44].mxu0 %v5212_v46 }
 0x1d2   :  { %v4278_v30 = vpop.f32.mrb[8].mxu0  ;;  %1733 = vmatprep.mubr.bf16.mxu1 %v4731_v19  ;;  %1926 = vmatprep.mubr.bf16.mxu0 %v4731_v19 }
 0x1d3   :  { %v1101_v33 = vadd.f32 %v4278_v30, %v5184_v59  ;;  %v1092_v16 = vpop.f32.mrb[9].mxu0  ;;  %2060 = vmatpush1.bf16.msra.mxu1 %v4123_v23  ;;  %2253 = vmatpush1.bf16.msra.mxu0 %v4125_v24 }
 0x1d4   :  { %v1093_v22 = vadd.f32 %v5184_v59, %v1092_v16  ;;  %v4279_v26 = vpop.f32.mrb[10].mxu0  ;;  %2061 = vmatprep.subr.bf16.mxu1 %v4132_v20  ;;  %2254 = vmatprep.subr.bf16.mxu0 %v4134_v25 }
 0x1d5   :  { %v1104_v27 = vadd.f32 %v4279_v26, %v5184_v59  ;;  %v1095_v28 = vpop.f32.mrb[11].mxu0  ;;  %v1197_v17 = vmax.f32 %v1101_v33, 0.0 }
 0x1d6   :  { %v1096_v29 = vadd.f32 %v5184_v59, %v1095_v28  ;;  %v1195_v32 = vmax.f32 %v1093_v22, 0.0 }
 0x1d7   :  { %v1198_v31 = vmax.f32 %v1104_v27, 0.0  ;;  %2062 = vmatpush1.bf16.msra.mxu1 %v4131_v21  ;;  %2255 = vmatpush1.bf16.msra.mxu0 %v4133_v54 }
 0x1d8   :  { %v1196_v35 = vmax.f32 %v1096_v29, 0.0 }
 0x1d9   :  { %v5228_v36 = vpack.c.bf16 %v1198_v31, %v1197_v17 }
 0x1da   :  { %v5230_v37 = vpack.c.bf16 %v1196_v35, %v1195_v32 }
 0x1dc   :  { %1734 = vmatmul.mubr.bf16.gmra.mrb[16].mxu1 %v5230_v37  ;;  %1927 = vmatmul.mubr.bf16.gmra.mrb[48].mxu0 %v5230_v37 }
 0x1dd   :  { %1743 = vmatprep.mubr.bf16.mxu1 %v4731_v19  ;;  %1936 = vmatprep.mubr.bf16.mxu0 %v4731_v19 }
 0x1e4   :  { %1744 = vmatmul.mubr.bf16.gmra.mrb[20].mxu1 %v5228_v36  ;;  %1937 = vmatmul.mubr.bf16.gmra.mrb[52].mxu0 %v5228_v36 }
 0x1e5   :  { %v4282_v38 = vpop.f32.mrb[12].mxu0  ;;  %1753 = vmatprep.mubr.bf16.mxu1 %v4731_v19  ;;  %1946 = vmatprep.mubr.bf16.mxu0 %v4731_v19 }
 0x1e6   :  { %v1117_v39 = vadd.f32 %v4282_v38, %v5184_v59  ;;  %v1108_v40 = vpop.f32.mrb[13].mxu0 }
 0x1e7   :  { %v1109_v42 = vadd.f32 %v5184_v59, %v1108_v40  ;;  %v4283_v43 = vpop.f32.mrb[14].mxu0 }
 0x1e8   :  { %v1120_v44 = vadd.f32 %v4283_v43, %v5184_v59  ;;  %v1111_v51 = vpop.f32.mrb[15].mxu0  ;;  %v1201_v53 = vmax.f32 %v1117_v39, 0.0 }
 0x1e9   :  { %v1112_v52 = vadd.f32 %v5184_v59, %v1111_v51  ;;  %v1199_v41 = vmax.f32 %v1109_v42, 0.0 }
 0x1ea   :  { %v1202_v55 = vmax.f32 %v1120_v44, 0.0 }
 0x1eb   :  { %v1200_v34 = vmax.f32 %v1112_v52, 0.0 }
 0x1ec   :  { %v5244_v57 = vpack.c.bf16 %v1202_v55, %v1201_v53 }
 0x1ed   :  { %v5246_v58 = vpack.c.bf16 %v1200_v34, %v1199_v41 }
 0x1ef   :  { %1754 = vmatmul.mubr.bf16.gmra.mrb[24].mxu1 %v5246_v58  ;;  %1947 = vmatmul.mubr.bf16.gmra.mrb[56].mxu0 %v5246_v58 }
 0x1f0   :  { %1763 = vmatprep.mubr.bf16.mxu1 %v4731_v19  ;;  %1956 = vmatprep.mubr.bf16.mxu0 %v4731_v19 }
 0x1f7   :  { %1764 = vmatmul.mubr.bf16.gmra.mrb[28].mxu1 %v5244_v57  ;;  %1957 = vmatmul.mubr.bf16.gmra.mrb[60].mxu0 %v5244_v57 }
 0x1f8   :  { %v4286_v60 = vpop.f32.mrb[16].mxu0  ;;  %1773 = vmatprep.mubr.bf16.mxu1 %v4731_v19  ;;  %1966 = vmatprep.mubr.bf16.mxu0 %v4731_v19 }
 0x1f9   :  { %v1133_v18 = vadd.f32 %v4286_v60, %v5184_v59  ;;  %v1124_v62 = vpop.f32.mrb[17].mxu0 }
 0x1fa   :  { %v1125_v47 = vadd.f32 %v5184_v59, %v1124_v62  ;;  %v4287_v45 = vpop.f32.mrb[18].mxu0 }
 0x1fb   :  { %v1136_v56 = vadd.f32 %v4287_v45, %v5184_v59  ;;  %v1127_v61 = vpop.f32.mrb[19].mxu0  ;;  %v1205_v23 = vmax.f32 %v1133_v18, 0.0 }
 0x1fc   :  { %v1128_v63 = vadd.f32 %v5184_v59, %v1127_v61  ;;  %v1203_v20 = vmax.f32 %v1125_v47, 0.0 }
 0x1fd   :  { %v1206_v24 = vmax.f32 %v1136_v56, 0.0 }
 0x1fe   :  { %v1204_v25 = vmax.f32 %v1128_v63, 0.0 }
 0x1ff   :  { %v5260_v30 = vpack.c.bf16 %v1206_v24, %v1205_v23 }
 0x200   :  { %v5262_v33 = vpack.c.bf16 %v1204_v25, %v1203_v20 }
 0x202   :  { %1774 = vmatmul.mubr.bf16.gmra.mrb[32].mxu1 %v5262_v33  ;;  %1967 = vmatmul.mubr.bf16.gmra.mrb[64].mxu0 %v5262_v33 }
 0x203   :  { %1783 = vmatprep.mubr.bf16.mxu1 %v4731_v19  ;;  %1976 = vmatprep.mubr.bf16.mxu0 %v4731_v19 }
 0x20a   :  { %1784 = vmatmul.mubr.bf16.gmra.mrb[36].mxu1 %v5260_v30  ;;  %1977 = vmatmul.mubr.bf16.gmra.mrb[68].mxu0 %v5260_v30 }
 0x20b   :  { %v4290_v16 = vpop.f32.mrb[20].mxu0  ;;  %1793 = vmatprep.mubr.bf16.mxu1 %v4731_v19  ;;  %1986 = vmatprep.mubr.bf16.mxu0 %v4731_v19 }
 0x20c   :  { %v1149_v21 = vadd.f32 %v4290_v16, %v5184_v59  ;;  %v1140_v54 = vpop.f32.mrb[21].mxu0 }
 0x20d   :  { %v1141_v22 = vadd.f32 %v5184_v59, %v1140_v54  ;;  %v4291_v26 = vpop.f32.mrb[22].mxu0 }
 0x20e   :  { %v1152_v27 = vadd.f32 %v4291_v26, %v5184_v59  ;;  %v1143_v28 = vpop.f32.mrb[23].mxu0  ;;  %v1209_v17 = vmax.f32 %v1149_v21, 0.0 }
 0x20f   :  { %v1144_v29 = vadd.f32 %v5184_v59, %v1143_v28  ;;  %v1207_v32 = vmax.f32 %v1141_v22, 0.0 }
 0x210   :  { %v1210_v31 = vmax.f32 %v1152_v27, 0.0 }
 0x211   :  { %v1208_v35 = vmax.f32 %v1144_v29, 0.0 }
 0x212   :  { %v5276_v38 = vpack.c.bf16 %v1210_v31, %v1209_v17 }
 0x213   :  { %v5278_v39 = vpack.c.bf16 %v1208_v35, %v1207_v32 }
 0x215   :  { %1794 = vmatmul.mubr.bf16.gmra.mrb[40].mxu1 %v5278_v39  ;;  %1987 = vmatmul.mubr.bf16.gmra.mrb[72].mxu0 %v5278_v39 }
 0x216   :  { %1803 = vmatprep.mubr.bf16.mxu1 %v4731_v19  ;;  %1996 = vmatprep.mubr.bf16.mxu0 %v4731_v19 }
 0x21d   :  { %1804 = vmatmul.mubr.bf16.gmra.mrb[44].mxu1 %v5276_v38  ;;  %1997 = vmatmul.mubr.bf16.gmra.mrb[76].mxu0 %v5276_v38 }
 0x21e   :  { %v4294_v40 = vpop.f32.mrb[24].mxu0  ;;  %1813 = vmatprep.mubr.bf16.mxu1 %v4731_v19  ;;  %2006 = vmatprep.mubr.bf16.mxu0 %v4731_v19 }
 0x21f   :  { %v1165_v42 = vadd.f32 %v4294_v40, %v5184_v59  ;;  %v1156_v43 = vpop.f32.mrb[25].mxu0 }
 0x220   :  { %v1157_v44 = vadd.f32 %v5184_v59, %v1156_v43  ;;  %v4295_v51 = vpop.f32.mrb[26].mxu0 }
 0x221   :  { %v1168_v52 = vadd.f32 %v4295_v51, %v5184_v59  ;;  %v1159_v53 = vpop.f32.mrb[27].mxu0  ;;  %v1213_v41 = vmax.f32 %v1165_v42, 0.0 }
 0x222   :  { %v1160_v55 = vadd.f32 %v5184_v59, %v1159_v53  ;;  %v1211_v60 = vmax.f32 %v1157_v44, 0.0 }
 0x223   :  { %v1214_v34 = vmax.f32 %v1168_v52, 0.0 }
 0x224   :  { %v1212_v18 = vmax.f32 %v1160_v55, 0.0 }
 0x225   :  { %v5292_v62 = vpack.c.bf16 %v1214_v34, %v1213_v41 }
 0x226   :  { %v5294_v47 = vpack.c.bf16 %v1212_v18, %v1211_v60 }
 0x228   :  { %1814 = vmatmul.mubr.bf16.gmra.mrb[48].mxu1 %v5294_v47  ;;  %2007 = vmatmul.mubr.bf16.gmra.mrb[80].mxu0 %v5294_v47 }
 0x229   :  { %1823 = vmatprep.mubr.bf16.mxu1 %v4731_v19  ;;  %2016 = vmatprep.mubr.bf16.mxu0 %v4731_v19 }
 0x230   :  { %1824 = vmatmul.mubr.bf16.gmra.mrb[52].mxu1 %v5292_v62  ;;  %2017 = vmatmul.mubr.bf16.gmra.mrb[84].mxu0 %v5292_v62 }
 0x231   :  { %v4298_v45 = vpop.f32.mrb[28].mxu0  ;;  %1833 = vmatprep.mubr.bf16.mxu1 %v4731_v19  ;;  %2026 = vmatprep.mubr.bf16.mxu0 %v4731_v19 }
 0x232   :  { %v1181_v56 = vadd.f32 %v4298_v45, %v5184_v59  ;;  %v1172_v61 = vpop.f32.mrb[29].mxu0 }
 0x233   :  { %v1173_v63 = vadd.f32 %v5184_v59, %v1172_v61  ;;  %v4299_v23 = vpop.f32.mrb[30].mxu0 }
 0x234   :  { %v1184_v24 = vadd.f32 %v4299_v23, %v5184_v59  ;;  %v1175_v20 = vpop.f32.mrb[31].mxu0  ;;  %v1217_v16 = vmax.f32 %v1181_v56, 0.0 }
 0x235   :  { %v1176_v25 = vadd.f32 %v5184_v59, %v1175_v20  ;;  %v1215_v54 = vmax.f32 %v1173_v63, 0.0  ;;  %v1301_v59 = vlaneseq }
 0x236   :  { %v1218_v21 = vmax.f32 %v1184_v24, 0.0 }
 0x237   :  { %v1216_v22 = vmax.f32 %v1176_v25, 0.0 }
 0x238   :  { %v5308_v26 = vpack.c.bf16 %v1218_v21, %v1217_v16 }
 0x239   :  { %v5310_v27 = vpack.c.bf16 %v1216_v22, %v1215_v54 }
 0x23b   :  { %1834 = vmatmul.mubr.bf16.gmra.mrb[56].mxu1 %v5310_v27  ;;  %2027 = vmatmul.mubr.bf16.gmra.mrb[88].mxu0 %v5310_v27 }
 0x23c   :  { %1843 = vmatprep.mubr.bf16.mxu1 %v4731_v19  ;;  %2036 = vmatprep.mubr.bf16.mxu0 %v4731_v19 }
 0x243   :  { %1844 = vmatmul.mubr.bf16.gmra.mrb[60].mxu1 %v5308_v26  ;;  %2037 = vmatmul.mubr.bf16.gmra.mrb[92].mxu0 %v5308_v26 }
 0x244   :  { %2079 = vmatprep.mubr.bf16.mxu1 %v4731_v19  ;;  %2272 = vmatprep.mubr.bf16.mxu0 %v4731_v19 }
 0x24b   :  { %2080 = vmatmul.mubr.bf16.vlgmr.msra.gmra.mrb[64].mxu1 %v5192_v50  ;;  %2273 = vmatmul.mubr.bf16.vlgmr.msra.gmra.mrb[96].mxu0 %v5192_v50 }
 0x24c   :  { %2089 = vmatprep.mubr.bf16.mxu1 %v4731_v19  ;;  %2282 = vmatprep.mubr.bf16.mxu0 %v4731_v19 }
 0x253   :  { %2090 = vmatmul.mubr.bf16.gmra.mrb[68].mxu1 %v5190_v49  ;;  %2283 = vmatmul.mubr.bf16.gmra.mrb[100].mxu0 %v5190_v49  ;;  %v5348_v49 = vshrl.u32 %v1301_v59, 7 }
 0x254   :  { %2099 = vmatprep.mubr.bf16.mxu1 %v4731_v19  ;;  %2292 = vmatprep.mubr.bf16.mxu0 %v4731_v19 }
 0x255   :  { %v5355_v50 = vsub.s32 0, %v5348_v49 }
 0x25b   :  { %2100 = vmatmul.mubr.bf16.gmra.mrb[72].mxu1 %v5214_v48  ;;  %2293 = vmatmul.mubr.bf16.gmra.mrb[104].mxu0 %v5214_v48  ;;  %v1299_v48 = vld [vmem:[%s5987_s4 + $0x2] sm:$0xff] }
 0x25c   :  { %2109 = vmatprep.mubr.bf16.mxu1 %v4731_v19  ;;  %2302 = vmatprep.mubr.bf16.mxu0 %v4731_v19 }
 0x263   :  { %2110 = vmatmul.mubr.bf16.gmra.mrb[76].mxu1 %v5212_v46  ;;  %2303 = vmatmul.mubr.bf16.gmra.mrb[108].mxu0 %v5212_v46  ;;  %v5993_v46 = vsub.s32 2, %v5348_v49 }
 0x264   :  { %2119 = vmatprep.mubr.bf16.mxu1 %v4731_v19  ;;  %2312 = vmatprep.mubr.bf16.mxu0 %v4731_v19 }
 0x26b   :  { %2120 = vmatmul.mubr.bf16.gmra.mrb[80].mxu1 %v5230_v37  ;;  %2313 = vmatmul.mubr.bf16.gmra.mrb[112].mxu0 %v5230_v37  ;;  %v5992_v37 = vsub.s32 3, %v5348_v49 }
 0x26c   :  { %2129 = vmatprep.mubr.bf16.mxu1 %v4731_v19  ;;  %2322 = vmatprep.mubr.bf16.mxu0 %v4731_v19 }
 0x26d   :  { %v5377_v29 = vrot.slane %v1299_v48, %v5992_v37 }
 0x273   :  { %2130 = vmatmul.mubr.bf16.gmra.mrb[84].mxu1 %v5228_v36  ;;  %2323 = vmatmul.mubr.bf16.gmra.mrb[116].mxu0 %v5228_v36  ;;  %v5362_v36 = vsub.s32 1, %v5348_v49 }
 0x274   :  { %2139 = vmatprep.mubr.bf16.mxu1 %v4731_v19  ;;  %2332 = vmatprep.mubr.bf16.mxu0 %v4731_v19 }
 0x275   :  { %v5373_v28 = vrot.slane %v1299_v48, %v5362_v36 }
 0x27b   :  { %2140 = vmatmul.mubr.bf16.gmra.mrb[88].mxu1 %v5246_v58  ;;  %2333 = vmatmul.mubr.bf16.gmra.mrb[120].mxu0 %v5246_v58  ;;  %v5370_v58 = vrot.slane %v1299_v48, %v5993_v46 }
 0x27c   :  { %2149 = vmatprep.mubr.bf16.mxu1 %v4731_v19  ;;  %2342 = vmatprep.mubr.bf16.mxu0 %v4731_v19 }
 0x283   :  { %2150 = vmatmul.mubr.bf16.gmra.mrb[92].mxu1 %v5244_v57  ;;  %2343 = vmatmul.mubr.bf16.gmra.mrb[124].mxu0 %v5244_v57  ;;  %v5366_v57 = vrot.slane %v1299_v48, %v5355_v50 }
 0x284   :  { %2159 = vmatprep.mubr.bf16.mxu1 %v4731_v19  ;;  %2352 = vmatprep.mubr.bf16.mxu0 %v4731_v19 }
 0x28a   :  { %v1695_v17 = vpop.f32.mrb[0].mxu1  ;;  %v1888_v31 = vpop.f32.mrb[32].mxu0 }
 0x28b   :  { %2160 = vmatmul.mubr.bf16.gmra.mrb[96].mxu1 %v5262_v33  ;;  %2353 = vmatmul.mubr.bf16.gmra.mrb[128].mxu0 %v5262_v33  ;;  %v1696_v32 = vadd.f32 %v1695_v17, %v5366_v57  ;;  %v1889_v35 = vadd.f32 %v1888_v31, %v5370_v58  ;;  %v1697_v40 = vpop.f32.mrb[1].mxu1  ;;  %v1890_v42 = vpop.f32.mrb[33].mxu0 }
 0x28c   :  { %2169 = vmatprep.mubr.bf16.mxu1 %v4731_v19  ;;  %2362 = vmatprep.mubr.bf16.mxu0 %v4731_v19  ;;  %v1698_v43 = vadd.f32 %v1697_v40, %v5373_v28  ;;  %v1891_v44 = vadd.f32 %v1890_v42, %v5377_v29  ;;  %v1699_v51 = vpop.f32.mrb[2].mxu1  ;;  %v1892_v52 = vpop.f32.mrb[34].mxu0 }
 0x28d   :  { %v1700_v33 = vadd.f32 %v1699_v51, %v5366_v57  ;;  %v1893_v53 = vadd.f32 %v1892_v52, %v5370_v58  ;;  %v1701_v55 = vpop.f32.mrb[3].mxu1  ;;  %v1894_v41 = vpop.f32.mrb[35].mxu0  ;;  %v2433_v18 = vmax.f32 %v1696_v32, 0.0  ;;  %v2435_v45 = vmax.f32 %v1889_v35, 0.0 }
 0x28e   :  { %v1702_v34 = vadd.f32 %v1701_v55, %v5373_v28  ;;  %v1895_v60 = vadd.f32 %v1894_v41, %v5377_v29  ;;  %v2434_v63 = vmax.f32 %v1698_v43, 0.0  ;;  %v2436_v23 = vmax.f32 %v1891_v44, 0.0 }
 0x28f   :  { %v2441_v56 = vmax.f32 %v1700_v33, 0.0  ;;  %v2443_v61 = vmax.f32 %v1893_v53, 0.0 }
 0x290   :  { %v2442_v24 = vmax.f32 %v1702_v34, 0.0  ;;  %v2444_v20 = vmax.f32 %v1895_v60, 0.0 }
 0x291   :  { %v5391_v25 = vpack.c.bf16 %v2441_v56, %v2433_v18  ;;  %v5393_v16 = vpack.c.bf16 %v2443_v61, %v2435_v45 }
 0x292   :  { %v5397_v21 = vpack.c.bf16 %v2442_v24, %v2434_v63  ;;  %v5399_v54 = vpack.c.bf16 %v2444_v20, %v2436_v23  ;;  %v1705_v22 = vpop.f32.mrb[4].mxu1  ;;  %v1898_v59 = vpop.f32.mrb[36].mxu0 }
 0x293   :  { %2170 = vmatmul.mubr.bf16.gmra.mrb[100].mxu1 %v5260_v30  ;;  %2363 = vmatmul.mubr.bf16.gmra.mrb[132].mxu0 %v5260_v30  ;;  %v1706_v48 = vadd.f32 %v1705_v22, %v5366_v57  ;;  %v1899_v17 = vadd.f32 %v1898_v59, %v5370_v58  ;;  %v1707_v31 = vpop.f32.mrb[5].mxu1  ;;  %v1900_v32 = vpop.f32.mrb[37].mxu0 }
 0x294   :  { %2179 = vmatprep.mubr.bf16.mxu1 %v4731_v19  ;;  %2372 = vmatprep.mubr.bf16.mxu0 %v4731_v19  ;;  %v1708_v35 = vadd.f32 %v1707_v31, %v5373_v28  ;;  %v1901_v30 = vadd.f32 %v1900_v32, %v5377_v29  ;;  %v1709_v40 = vpop.f32.mrb[6].mxu1  ;;  %v1902_v42 = vpop.f32.mrb[38].mxu0 }
 0x295   :  { %v1710_v43 = vadd.f32 %v1709_v40, %v5366_v57  ;;  %v1903_v44 = vadd.f32 %v1902_v42, %v5370_v58  ;;  %v1711_v51 = vpop.f32.mrb[7].mxu1  ;;  %v1904_v52 = vpop.f32.mrb[39].mxu0  ;;  %v2449_v55 = vmax.f32 %v1706_v48, 0.0  ;;  %v2451_v41 = vmax.f32 %v1899_v17, 0.0 }
 0x296   :  { %v1712_v33 = vadd.f32 %v1711_v51, %v5373_v28  ;;  %v1905_v53 = vadd.f32 %v1904_v52, %v5377_v29  ;;  %v2450_v18 = vmax.f32 %v1708_v35, 0.0  ;;  %v2452_v45 = vmax.f32 %v1901_v30, 0.0 }
 0x297   :  { %v2457_v34 = vmax.f32 %v1710_v43, 0.0  ;;  %v2459_v60 = vmax.f32 %v1903_v44, 0.0 }
 0x298   :  { %v2458_v56 = vmax.f32 %v1712_v33, 0.0  ;;  %v2460_v61 = vmax.f32 %v1905_v53, 0.0 }
 0x299   :  { %v2697_v63 = vpack.c.bf16 %v2457_v34, %v2449_v55  ;;  %v2699_v23 = vpack.c.bf16 %v2459_v60, %v2451_v41 }
 0x29a   :  { %v2698_v24 = vpack.c.bf16 %v2458_v56, %v2450_v18  ;;  %v2700_v20 = vpack.c.bf16 %v2460_v61, %v2452_v45 }
 0x29b   :  { %2180 = vmatmul.mubr.bf16.gmra.mrb[104].mxu1 %v5278_v39  ;;  %2373 = vmatmul.mubr.bf16.gmra.mrb[136].mxu0 %v5278_v39  ;;  %v2817_v48 = vmax.bf16 %v2697_v63, %v5391_v25  ;;  %v2851_v17 = vmax.bf16 %v2699_v23, %v5393_v16 }
 0x29c   :  { %v1715_v22 = vpop.f32.mrb[8].mxu1  ;;  %v1908_v59 = vpop.f32.mrb[40].mxu0  ;;  %2189 = vmatprep.mubr.bf16.mxu1 %v4731_v19  ;;  %2382 = vmatprep.mubr.bf16.mxu0 %v4731_v19  ;;  %v2834_v39 = vmax.bf16 %v2698_v24, %v5397_v21  ;;  %v2868_v40 = vmax.bf16 %v2700_v20, %v5399_v54 }
 0x29d   :  { %v1716_v31 = vadd.f32 %v1715_v22, %v5366_v57  ;;  %v1909_v32 = vadd.f32 %v1908_v59, %v5370_v58  ;;  %v1717_v35 = vpop.f32.mrb[9].mxu1  ;;  %v1910_v30 = vpop.f32.mrb[41].mxu0 }
 0x29e   :  { %v1718_v42 = vadd.f32 %v1717_v35, %v5373_v28  ;;  %v1911_v43 = vadd.f32 %v1910_v30, %v5377_v29  ;;  %v1719_v44 = vpop.f32.mrb[10].mxu1  ;;  %v1912_v51 = vpop.f32.mrb[42].mxu0 }
 0x29f   :  { %v1720_v25 = vadd.f32 %v1719_v44, %v5366_v57  ;;  %v1913_v16 = vadd.f32 %v1912_v51, %v5370_v58  ;;  %v1721_v52 = vpop.f32.mrb[11].mxu1  ;;  %v1914_v33 = vpop.f32.mrb[43].mxu0  ;;  %v2465_v41 = vmax.f32 %v1716_v31, 0.0  ;;  %v2467_v21 = vmax.f32 %v1909_v32, 0.0 }
 0x2a0   :  { %v1722_v53 = vadd.f32 %v1721_v52, %v5373_v28  ;;  %v1915_v55 = vadd.f32 %v1914_v33, %v5377_v29  ;;  %v2466_v60 = vmax.f32 %v1718_v42, 0.0  ;;  %v2468_v18 = vmax.f32 %v1911_v43, 0.0 }
 0x2a1   :  { %v2473_v34 = vmax.f32 %v1720_v25, 0.0  ;;  %v2475_v54 = vmax.f32 %v1913_v16, 0.0 }
 0x2a2   :  { %v2474_v45 = vmax.f32 %v1722_v53, 0.0  ;;  %v2476_v56 = vmax.f32 %v1915_v55, 0.0 }
 0x2a3   :  { %v2705_v61 = vpack.c.bf16 %v2473_v34, %v2465_v41  ;;  %v2707_v63 = vpack.c.bf16 %v2475_v54, %v2467_v21  ;;  %2190 = vmatmul.mubr.bf16.gmra.mrb[108].mxu1 %v5276_v38  ;;  %2383 = vmatmul.mubr.bf16.gmra.mrb[140].mxu0 %v5276_v38 }
 0x2a4   :  { %v2706_v23 = vpack.c.bf16 %v2474_v45, %v2466_v60  ;;  %v2708_v24 = vpack.c.bf16 %v2476_v56, %v2468_v18  ;;  %v1725_v20 = vpop.f32.mrb[12].mxu1  ;;  %v1918_v22 = vpop.f32.mrb[44].mxu0  ;;  %2199 = vmatprep.mubr.bf16.mxu1 %v4731_v19  ;;  %2392 = vmatprep.mubr.bf16.mxu0 %v4731_v19 }
 0x2a5   :  { %v5431_v59 = vmax.bf16 %v2817_v48, %v2705_v61  ;;  %v5433_v31 = vmax.bf16 %v2851_v17, %v2707_v63  ;;  %v1726_v32 = vadd.f32 %v1725_v20, %v5366_v57  ;;  %v1919_v35 = vadd.f32 %v1918_v22, %v5370_v58  ;;  %v1727_v30 = vpop.f32.mrb[13].mxu1  ;;  %v1920_v42 = vpop.f32.mrb[45].mxu0 }
 0x2a6   :  { %v5437_v43 = vmax.bf16 %v2834_v39, %v2706_v23  ;;  %v5439_v38 = vmax.bf16 %v2868_v40, %v2708_v24  ;;  %v1728_v44 = vadd.f32 %v1727_v30, %v5373_v28  ;;  %v1921_v51 = vadd.f32 %v1920_v42, %v5377_v29  ;;  %v1729_v25 = vpop.f32.mrb[14].mxu1  ;;  %v1922_v16 = vpop.f32.mrb[46].mxu0 }
 0x2a7   :  { %v1730_v48 = vadd.f32 %v1729_v25, %v5366_v57  ;;  %v1923_v17 = vadd.f32 %v1922_v16, %v5370_v58  ;;  %v1731_v52 = vpop.f32.mrb[15].mxu1  ;;  %v1924_v33 = vpop.f32.mrb[47].mxu0  ;;  %v2481_v39 = vmax.f32 %v1726_v32, 0.0  ;;  %v2483_v41 = vmax.f32 %v1919_v35, 0.0 }
 0x2a8   :  { %v1732_v53 = vadd.f32 %v1731_v52, %v5373_v28  ;;  %v1925_v55 = vadd.f32 %v1924_v33, %v5377_v29  ;;  %v2482_v34 = vmax.f32 %v1728_v44, 0.0  ;;  %v2484_v54 = vmax.f32 %v1921_v51, 0.0 }
 0x2a9   :  { %v2489_v40 = vmax.f32 %v1730_v48, 0.0  ;;  %v2491_v21 = vmax.f32 %v1923_v17, 0.0 }
 0x2aa   :  { %v2490_v60 = vmax.f32 %v1732_v53, 0.0  ;;  %v2492_v18 = vmax.f32 %v1925_v55, 0.0 }
 0x2ab   :  { %v2713_v45 = vpack.c.bf16 %v2489_v40, %v2481_v39  ;;  %v2715_v56 = vpack.c.bf16 %v2491_v21, %v2483_v41  ;;  %2200 = vmatmul.mubr.bf16.gmra.mrb[112].mxu1 %v5294_v47  ;;  %2393 = vmatmul.mubr.bf16.gmra.mrb[144].mxu0 %v5294_v47 }
 0x2ac   :  { %v2714_v61 = vpack.c.bf16 %v2490_v60, %v2482_v34  ;;  %v2716_v63 = vpack.c.bf16 %v2492_v18, %v2484_v54  ;;  %2209 = vmatprep.mubr.bf16.mxu1 %v4731_v19  ;;  %2402 = vmatprep.mubr.bf16.mxu0 %v4731_v19 }
 0x2ad   :  { %v2819_v23 = vmax.bf16 %v5431_v59, %v2713_v45  ;;  %v2853_v24 = vmax.bf16 %v5433_v31, %v2715_v56 }
 0x2ae   :  { %v2836_v20 = vmax.bf16 %v5437_v43, %v2714_v61  ;;  %v2870_v22 = vmax.bf16 %v5439_v38, %v2716_v63 }
 0x2af   :  { %v1735_v32 = vpop.f32.mrb[16].mxu1  ;;  %v1928_v35 = vpop.f32.mrb[48].mxu0 }
 0x2b0   :  { %v1736_v30 = vadd.f32 %v1735_v32, %v5366_v57  ;;  %v1929_v47 = vadd.f32 %v1928_v35, %v5370_v58  ;;  %v1737_v42 = vpop.f32.mrb[17].mxu1  ;;  %v1930_v44 = vpop.f32.mrb[49].mxu0 }
 0x2b1   :  { %v1738_v51 = vadd.f32 %v1737_v42, %v5373_v28  ;;  %v1931_v25 = vadd.f32 %v1930_v44, %v5377_v29  ;;  %v1739_v16 = vpop.f32.mrb[18].mxu1  ;;  %v1932_v59 = vpop.f32.mrb[50].mxu0 }
 0x2b2   :  { %v1740_v31 = vadd.f32 %v1739_v16, %v5366_v57  ;;  %v1933_v43 = vadd.f32 %v1932_v59, %v5370_v58  ;;  %v1741_v48 = vpop.f32.mrb[19].mxu1  ;;  %v1934_v38 = vpop.f32.mrb[51].mxu0  ;;  %v2497_v33 = vmax.f32 %v1736_v30, 0.0  ;;  %v2499_v53 = vmax.f32 %v1929_v47, 0.0 }
 0x2b3   :  { %v1742_v17 = vadd.f32 %v1741_v48, %v5373_v28  ;;  %v1935_v52 = vadd.f32 %v1934_v38, %v5377_v29  ;;  %2210 = vmatmul.mubr.bf16.gmra.mrb[116].mxu1 %v5292_v62  ;;  %2403 = vmatmul.mubr.bf16.gmra.mrb[148].mxu0 %v5292_v62  ;;  %v2498_v41 = vmax.f32 %v1738_v51, 0.0  ;;  %v2500_v40 = vmax.f32 %v1931_v25, 0.0 }
 0x2b4   :  { %v2505_v55 = vmax.f32 %v1740_v31, 0.0  ;;  %v2507_v39 = vmax.f32 %v1933_v43, 0.0  ;;  %2219 = vmatprep.mubr.bf16.mxu1 %v4731_v19  ;;  %2412 = vmatprep.mubr.bf16.mxu0 %v4731_v19 }
 0x2b5   :  { %v2506_v21 = vmax.f32 %v1742_v17, 0.0  ;;  %v2508_v34 = vmax.f32 %v1935_v52, 0.0 }
 0x2b6   :  { %v2721_v54 = vpack.c.bf16 %v2505_v55, %v2497_v33  ;;  %v2723_v60 = vpack.c.bf16 %v2507_v39, %v2499_v53 }
 0x2b7   :  { %v2722_v18 = vpack.c.bf16 %v2506_v21, %v2498_v41  ;;  %v2724_v45 = vpack.c.bf16 %v2508_v34, %v2500_v40  ;;  %v1745_v56 = vpop.f32.mrb[20].mxu1  ;;  %v1938_v61 = vpop.f32.mrb[52].mxu0 }
 0x2b8   :  { %v5467_v63 = vmax.bf16 %v2819_v23, %v2721_v54  ;;  %v5469_v62 = vmax.bf16 %v2853_v24, %v2723_v60  ;;  %v1746_v32 = vadd.f32 %v1745_v56, %v5366_v57  ;;  %v1939_v35 = vadd.f32 %v1938_v61, %v5370_v58  ;;  %v1747_v30 = vpop.f32.mrb[21].mxu1  ;;  %v1940_v47 = vpop.f32.mrb[53].mxu0 }
 0x2b9   :  { %v5473_v42 = vmax.bf16 %v2836_v20, %v2722_v18  ;;  %v5475_v44 = vmax.bf16 %v2870_v22, %v2724_v45  ;;  %v1748_v51 = vadd.f32 %v1747_v30, %v5373_v28  ;;  %v1941_v25 = vadd.f32 %v1940_v47, %v5377_v29  ;;  %v1749_v16 = vpop.f32.mrb[22].mxu1  ;;  %v1942_v59 = vpop.f32.mrb[54].mxu0 }
 0x2ba   :  { %v1750_v23 = vadd.f32 %v1749_v16, %v5366_v57  ;;  %v1943_v24 = vadd.f32 %v1942_v59, %v5370_v58  ;;  %v1751_v31 = vpop.f32.mrb[23].mxu1  ;;  %v1944_v43 = vpop.f32.mrb[55].mxu0  ;;  %v2513_v20 = vmax.f32 %v1746_v32, 0.0  ;;  %v2515_v22 = vmax.f32 %v1939_v35, 0.0 }
 0x2bb   :  { %v1752_v48 = vadd.f32 %v1751_v31, %v5373_v28  ;;  %v1945_v38 = vadd.f32 %v1944_v43, %v5377_v29  ;;  %2220 = vmatmul.mubr.bf16.gmra.mrb[120].mxu1 %v5310_v27  ;;  %2413 = vmatmul.mubr.bf16.gmra.mrb[152].mxu0 %v5310_v27  ;;  %v2514_v33 = vmax.f32 %v1748_v51, 0.0  ;;  %v2516_v53 = vmax.f32 %v1941_v25, 0.0 }
 0x2bc   :  { %v2521_v17 = vmax.f32 %v1750_v23, 0.0  ;;  %v2523_v52 = vmax.f32 %v1943_v24, 0.0  ;;  %2229 = vmatprep.mubr.bf16.mxu1 %v4731_v19  ;;  %2422 = vmatprep.mubr.bf16.mxu0 %v4731_v19 }
 0x2bd   :  { %v2522_v55 = vmax.f32 %v1752_v48, 0.0  ;;  %v2524_v39 = vmax.f32 %v1945_v38, 0.0 }
 0x2be   :  { %v2729_v41 = vpack.c.bf16 %v2521_v17, %v2513_v20  ;;  %v2731_v40 = vpack.c.bf16 %v2523_v52, %v2515_v22 }
 0x2bf   :  { %v2730_v21 = vpack.c.bf16 %v2522_v55, %v2514_v33  ;;  %v2732_v34 = vpack.c.bf16 %v2524_v39, %v2516_v53 }
 0x2c0   :  { %v2821_v54 = vmax.bf16 %v5467_v63, %v2729_v41  ;;  %v2855_v27 = vmax.bf16 %v5469_v62, %v2731_v40 }
 0x2c1   :  { %v2838_v60 = vmax.bf16 %v5473_v42, %v2730_v21  ;;  %v2872_v18 = vmax.bf16 %v5475_v44, %v2732_v34 }
 0x2c2   :  { %v1755_v45 = vpop.f32.mrb[24].mxu1  ;;  %v1948_v56 = vpop.f32.mrb[56].mxu0 }
 0x2c3   :  { %v1756_v19 = vadd.f32 %v1755_v45, %v5366_v57  ;;  %v1949_v61 = vadd.f32 %v1948_v56, %v5370_v58  ;;  %v1757_v32 = vpop.f32.mrb[25].mxu1  ;;  %v1950_v35 = vpop.f32.mrb[57].mxu0  ;;  %2230 = vmatmul.mubr.bf16.gmra.mrb[124].mxu1 %v5308_v26  ;;  %2423 = vmatmul.mubr.bf16.gmra.mrb[156].mxu0 %v5308_v26 }
 0x2c4   :  { %v1758_v63 = vadd.f32 %v1757_v32, %v5373_v28  ;;  %v1951_v62 = vadd.f32 %v1950_v35, %v5377_v29  ;;  %v1759_v30 = vpop.f32.mrb[26].mxu1  ;;  %v1952_v47 = vpop.f32.mrb[58].mxu0 }
 0x2c5   :  { %v1760_v42 = vadd.f32 %v1759_v30, %v5366_v57  ;;  %v1953_v44 = vadd.f32 %v1952_v47, %v5370_v58  ;;  %v1761_v51 = vpop.f32.mrb[27].mxu1  ;;  %v1954_v25 = vpop.f32.mrb[59].mxu0  ;;  %v2529_v23 = vmax.f32 %v1756_v19, 0.0  ;;  %v2531_v24 = vmax.f32 %v1949_v61, 0.0 }
 0x2c6   :  { %v1762_v16 = vadd.f32 %v1761_v51, %v5373_v28  ;;  %v1955_v59 = vadd.f32 %v1954_v25, %v5377_v29  ;;  %v2530_v43 = vmax.f32 %v1758_v63, 0.0  ;;  %v2532_v48 = vmax.f32 %v1951_v62, 0.0 }
 0x2c7   :  { %v2537_v31 = vmax.f32 %v1760_v42, 0.0  ;;  %v2539_v26 = vmax.f32 %v1953_v44, 0.0 }
 0x2c8   :  { %v2538_v38 = vmax.f32 %v1762_v16, 0.0  ;;  %v2540_v20 = vmax.f32 %v1955_v59, 0.0 }
 0x2c9   :  { %v2737_v22 = vpack.c.bf16 %v2537_v31, %v2529_v23  ;;  %v2739_v17 = vpack.c.bf16 %v2539_v26, %v2531_v24 }
 0x2ca   :  { %v2738_v52 = vpack.c.bf16 %v2538_v38, %v2530_v43  ;;  %v2740_v33 = vpack.c.bf16 %v2540_v20, %v2532_v48  ;;  %v1765_v53 = vpop.f32.mrb[28].mxu1  ;;  %v1958_v55 = vpop.f32.mrb[60].mxu0 }
 0x2cb   :  { %v2822_v39 = vmax.bf16 %v2821_v54, %v2737_v22  ;;  %v2856_v41 = vmax.bf16 %v2855_v27, %v2739_v17  ;;  %v1766_v40 = vadd.f32 %v1765_v53, %v5366_v57  ;;  %v1959_v21 = vadd.f32 %v1958_v55, %v5370_v58  ;;  %v1767_v34 = vpop.f32.mrb[29].mxu1  ;;  %v1960_v45 = vpop.f32.mrb[61].mxu0 }
 0x2cc   :  { %v2839_v56 = vmax.bf16 %v2838_v60, %v2738_v52  ;;  %v2873_v19 = vmax.bf16 %v2872_v18, %v2740_v33  ;;  %v1768_v61 = vadd.f32 %v1767_v34, %v5373_v28  ;;  %v1961_v32 = vadd.f32 %v1960_v45, %v5377_v29  ;;  %v1769_v35 = vpop.f32.mrb[30].mxu1  ;;  %v1962_v63 = vpop.f32.mrb[62].mxu0 }
 0x2cd   :  { %v1770_v62 = vadd.f32 %v1769_v35, %v5366_v57  ;;  %v1963_v30 = vadd.f32 %v1962_v63, %v5370_v58  ;;  %v1771_v54 = vpop.f32.mrb[31].mxu1  ;;  %v1964_v27 = vpop.f32.mrb[63].mxu0  ;;  %v2545_v44 = vmax.f32 %v1766_v40, 0.0  ;;  %v2547_v51 = vmax.f32 %v1959_v21, 0.0 }
 0x2ce   :  { %v1772_v47 = vadd.f32 %v1771_v54, %v5373_v28  ;;  %v1965_v42 = vadd.f32 %v1964_v27, %v5377_v29  ;;  %v2546_v25 = vmax.f32 %v1768_v61, 0.0  ;;  %v2548_v16 = vmax.f32 %v1961_v32, 0.0 }
 0x2cf   :  { %v2553_v60 = vmax.f32 %v1770_v62, 0.0  ;;  %v2555_v18 = vmax.f32 %v1963_v30, 0.0 }
 0x2d0   :  { %v2554_v59 = vmax.f32 %v1772_v47, 0.0  ;;  %v2556_v23 = vmax.f32 %v1965_v42, 0.0 }
 0x2d1   :  { %v2745_v24 = vpack.c.bf16 %v2553_v60, %v2545_v44  ;;  %v2747_v31 = vpack.c.bf16 %v2555_v18, %v2547_v51 }
 0x2d2   :  { %v2746_v26 = vpack.c.bf16 %v2554_v59, %v2546_v25  ;;  %v2748_v43 = vpack.c.bf16 %v2556_v23, %v2548_v16 }
 0x2d3   :  { %v2823_v48 = vmax.bf16 %v2822_v39, %v2745_v24  ;;  %v2857_v38 = vmax.bf16 %v2856_v41, %v2747_v31 }
 0x2d4   :  { %v2840_v20 = vmax.bf16 %v2839_v56, %v2746_v26  ;;  %v2874_v22 = vmax.bf16 %v2873_v19, %v2748_v43 }
 0x2d5   :  { %v2824_v17 = vunpack.i.l.bf16 %v2823_v48  ;;  %v2825_v52 = vunpack.i.h.bf16 %v2823_v48  ;;  %v2858_v33 = vunpack.i.l.bf16 %v2857_v38  ;;  %v2859_v53 = vunpack.i.h.bf16 %v2857_v38  ;;  %v1775_v55 = vpop.f32.mrb[32].mxu1  ;;  %v1968_v40 = vpop.f32.mrb[64].mxu0 }
 0x2d6   :  { %v2841_v21 = vunpack.i.l.bf16 %v2840_v20  ;;  %v2842_v34 = vunpack.i.h.bf16 %v2840_v20  ;;  %v2875_v45 = vunpack.i.l.bf16 %v2874_v22  ;;  %v2876_v61 = vunpack.i.h.bf16 %v2874_v22  ;;  %v1777_v32 = vpop.f32.mrb[33].mxu1  ;;  %v1970_v35 = vpop.f32.mrb[65].mxu0 }
 0x2d7   :  { %v2826_v63 = vmax.f32 %v2824_v17, %v2825_v52  ;;  %v2860_v62 = vmax.f32 %v2858_v33, %v2859_v53  ;;  %v1776_v30 = vadd.f32 %v1775_v55, %v5366_v57  ;;  %v1969_v39 = vadd.f32 %v1968_v40, %v5370_v58  ;;  %v1779_v41 = vpop.f32.mrb[34].mxu1  ;;  %v1972_v56 = vpop.f32.mrb[66].mxu0 }
 0x2d8   :  { %v2843_v19 = vmax.f32 %v2841_v21, %v2842_v34  ;;  %v2877_v54 = vmax.f32 %v2875_v45, %v2876_v61  ;;  %v1778_v27 = vadd.f32 %v1777_v32, %v5373_v28  ;;  %v1971_v47 = vadd.f32 %v1970_v35, %v5377_v29  ;;  %v1781_v42 = vpop.f32.mrb[35].mxu1  ;;  %v1974_v44 = vpop.f32.mrb[67].mxu0 }
 0x2d9   :  { %v2827_v51 = vrot.slane %v2826_v63, 4  ;;  %v2861_v60 = vrot.slane %v2860_v62, 4  ;;  %v2561_v18 = vmax.f32 %v1776_v30, 0.0  ;;  %v2563_v25 = vmax.f32 %v1969_v39, 0.0 }
 0x2da   :  { %v2844_v16 = vrot.slane %v2843_v19, 4  ;;  %v2878_v59 = vrot.slane %v2877_v54, 4  ;;  %v2562_v23 = vmax.f32 %v1778_v27, 0.0  ;;  %v2564_v24 = vmax.f32 %v1971_v47, 0.0 }
 0x2db   :  { %v2828_v31 = vmax.f32 %v2826_v63, %v2827_v51  ;;  %v2862_v26 = vmax.f32 %v2860_v62, %v2861_v60  ;;  %v1780_v43 = vadd.f32 %v1779_v41, %v5366_v57  ;;  %v1973_v48 = vadd.f32 %v1972_v56, %v5370_v58 }
 0x2dc   :  { %v2845_v38 = vmax.f32 %v2843_v19, %v2844_v16  ;;  %v2879_v20 = vmax.f32 %v2877_v54, %v2878_v59  ;;  %v1782_v22 = vadd.f32 %v1781_v42, %v5373_v28  ;;  %v1975_v17 = vadd.f32 %v1974_v44, %v5377_v29 }
 0x2dd   :  { %v2829_v52 = vrot.slane %v2828_v31, 2  ;;  %v2863_v33 = vrot.slane %v2862_v26, 2  ;;  %v2569_v53 = vmax.f32 %v1780_v43, 0.0  ;;  %v2571_v55 = vmax.f32 %v1973_v48, 0.0  ;;  %v1785_v40 = vpop.f32.mrb[36].mxu1  ;;  %v1978_v21 = vpop.f32.mrb[68].mxu0 }
 0x2de   :  { %v2846_v34 = vrot.slane %v2845_v38, 2  ;;  %v2880_v45 = vrot.slane %v2879_v20, 2  ;;  %v2570_v61 = vmax.f32 %v1782_v22, 0.0  ;;  %v2572_v32 = vmax.f32 %v1975_v17, 0.0  ;;  %v1787_v35 = vpop.f32.mrb[37].mxu1  ;;  %v1980_v63 = vpop.f32.mrb[69].mxu0 }
 0x2df   :  { %v2830_v62 = vmax.f32 %v2828_v31, %v2829_v52  ;;  %v2864_v30 = vmax.f32 %v2862_v26, %v2863_v33  ;;  %v5517_v39 = vpack.c.bf16 %v2569_v53, %v2561_v18  ;;  %v5519_v41 = vpack.c.bf16 %v2571_v55, %v2563_v25  ;;  %v1789_v56 = vpop.f32.mrb[38].mxu1  ;;  %v1982_v19 = vpop.f32.mrb[70].mxu0 }
 0x2e0   :  { %v2847_v54 = vmax.f32 %v2845_v38, %v2846_v34  ;;  %v2881_v27 = vmax.f32 %v2879_v20, %v2880_v45  ;;  %v5521_v47 = vpack.c.bf16 %v2570_v61, %v2562_v23  ;;  %v5523_v42 = vpack.c.bf16 %v2572_v32, %v2564_v24  ;;  %v1791_v44 = vpop.f32.mrb[39].mxu1  ;;  %v1984_v51 = vpop.f32.mrb[71].mxu0 }
 0x2e1   :  { %v2831_v60 = vrot.slane %v2830_v62, 1  ;;  %v2865_v16 = vrot.slane %v2864_v30, 1  ;;  %v1786_v25 = vadd.f32 %v1785_v40, %v5366_v57  ;;  %v1979_v26 = vadd.f32 %v1978_v21, %v5370_v58 }
 0x2e2   :  { %v2848_v59 = vrot.slane %v2847_v54, 1  ;;  %v2882_v43 = vrot.slane %v2881_v27, 1  ;;  %v1788_v24 = vadd.f32 %v1787_v35, %v5373_v28  ;;  %v1981_v38 = vadd.f32 %v1980_v63, %v5377_v29 }
 0x2e3   :  { %v5525_v31 = vmax.f32 %v2830_v62, %v2831_v60  ;;  %v5527_v18 = vmax.f32 %v2864_v30, %v2865_v16  ;;  %v1790_v17 = vadd.f32 %v1789_v56, %v5366_v57  ;;  %v1983_v52 = vadd.f32 %v1982_v19, %v5370_v58 }
 0x2e4   :  { %v5531_v48 = vmax.f32 %v2847_v54, %v2848_v59  ;;  %v5533_v23 = vmax.f32 %v2881_v27, %v2882_v43  ;;  %v1792_v55 = vadd.f32 %v1791_v44, %v5373_v28  ;;  %v1985_v40 = vadd.f32 %v1984_v51, %v5377_v29 }
 0x2e5   :  { %v2577_v21 = vmax.f32 %v1786_v25, 0.0  ;;  %v2579_v34 = vmax.f32 %v1979_v26, 0.0  ;;  %v2585_v45 = vmax.f32 %v1790_v17, 0.0  ;;  %v2587_v61 = vmax.f32 %v1983_v52, 0.0 }
 0x2e6   :  { %v2578_v32 = vmax.f32 %v1788_v24, 0.0  ;;  %v2580_v35 = vmax.f32 %v1981_v38, 0.0  ;;  %v2586_v63 = vmax.f32 %v1792_v55, 0.0  ;;  %v2588_v62 = vmax.f32 %v1985_v40, 0.0 }
 0x2e7   :  { %v2761_v19 = vpack.c.bf16 %v2585_v45, %v2577_v21  ;;  %v2763_v54 = vpack.c.bf16 %v2587_v61, %v2579_v34 }
 0x2e8   :  { %v1795_v30 = vpop.f32.mrb[40].mxu1  ;;  %v1988_v56 = vpop.f32.mrb[72].mxu0  ;;  %v2762_v59 = vpack.c.bf16 %v2586_v63, %v2578_v32  ;;  %v2764_v51 = vpack.c.bf16 %v2588_v62, %v2580_v35 }
 0x2e9   :  { %v1796_v27 = vadd.f32 %v1795_v30, %v5366_v57  ;;  %v1989_v60 = vadd.f32 %v1988_v56, %v5370_v58  ;;  %v1797_v16 = vpop.f32.mrb[41].mxu1  ;;  %v1990_v44 = vpop.f32.mrb[73].mxu0  ;;  %v2953_v38 = vmax.bf16 %v2761_v19, %v5517_v39  ;;  %v2987_v17 = vmax.bf16 %v2763_v54, %v5519_v41 }
 0x2ea   :  { %v1798_v43 = vadd.f32 %v1797_v16, %v5373_v28  ;;  %v1991_v25 = vadd.f32 %v1990_v44, %v5377_v29  ;;  %v1799_v26 = vpop.f32.mrb[42].mxu1  ;;  %v1992_v24 = vpop.f32.mrb[74].mxu0  ;;  %v2970_v40 = vmax.bf16 %v2762_v59, %v5521_v47  ;;  %v3004_v21 = vmax.bf16 %v2764_v51, %v5523_v42 }
 0x2eb   :  { %v1801_v52 = vpop.f32.mrb[43].mxu1  ;;  %v1994_v55 = vpop.f32.mrb[75].mxu0  ;;  %v1800_v34 = vadd.f32 %v1799_v26, %v5366_v57  ;;  %v1993_v45 = vadd.f32 %v1992_v24, %v5370_v58  ;;  %v2593_v35 = vmax.f32 %v1796_v27, 0.0  ;;  %v2595_v63 = vmax.f32 %v1989_v60, 0.0 }
 0x2ec   :  { %v1802_v61 = vadd.f32 %v1801_v52, %v5373_v28  ;;  %v1995_v32 = vadd.f32 %v1994_v55, %v5377_v29  ;;  %v2594_v62 = vmax.f32 %v1798_v43, 0.0  ;;  %v2596_v39 = vmax.f32 %v1991_v25, 0.0 }
 0x2ed   :  { %v2601_v30 = vmax.f32 %v1800_v34, 0.0  ;;  %v2603_v41 = vmax.f32 %v1993_v45, 0.0 }
 0x2ee   :  { %v2602_v56 = vmax.f32 %v1802_v61, 0.0  ;;  %v2604_v19 = vmax.f32 %v1995_v32, 0.0 }
 0x2ef   :  { %v2769_v16 = vpack.c.bf16 %v2601_v30, %v2593_v35  ;;  %v2771_v42 = vpack.c.bf16 %v2603_v41, %v2595_v63 }
 0x2f0   :  { %v1805_v54 = vpop.f32.mrb[44].mxu1  ;;  %v1998_v47 = vpop.f32.mrb[76].mxu0  ;;  %v2770_v44 = vpack.c.bf16 %v2602_v56, %v2594_v62  ;;  %v2772_v59 = vpack.c.bf16 %v2604_v19, %v2596_v39 }
 0x2f1   :  { %v1807_v51 = vpop.f32.mrb[45].mxu1  ;;  %v2000_v26 = vpop.f32.mrb[77].mxu0  ;;  %v1806_v24 = vadd.f32 %v1805_v54, %v5366_v57  ;;  %v1999_v52 = vadd.f32 %v1998_v47, %v5370_v58  ;;  %v2954_v55 = vmax.bf16 %v2953_v38, %v2769_v16  ;;  %v2988_v34 = vmax.bf16 %v2987_v17, %v2771_v42 }
 0x2f2   :  { %v1808_v27 = vadd.f32 %v1807_v51, %v5373_v28  ;;  %v2001_v60 = vadd.f32 %v2000_v26, %v5377_v29  ;;  %v1809_v43 = vpop.f32.mrb[46].mxu1  ;;  %v2002_v25 = vpop.f32.mrb[78].mxu0  ;;  %v2971_v45 = vmax.bf16 %v2970_v40, %v2770_v44  ;;  %v3005_v61 = vmax.bf16 %v3004_v21, %v2772_v59 }
 0x2f3   :  { %v1811_v32 = vpop.f32.mrb[47].mxu1  ;;  %v2004_v35 = vpop.f32.mrb[79].mxu0  ;;  %v1810_v63 = vadd.f32 %v1809_v43, %v5366_v57  ;;  %v2003_v62 = vadd.f32 %v2002_v25, %v5370_v58  ;;  %v2609_v41 = vmax.f32 %v1806_v24, 0.0  ;;  %v2611_v56 = vmax.f32 %v1999_v52, 0.0 }
 0x2f4   :  { %v1812_v39 = vadd.f32 %v1811_v32, %v5373_v28  ;;  %v2005_v30 = vadd.f32 %v2004_v35, %v5377_v29  ;;  %v2610_v19 = vmax.f32 %v1808_v27, 0.0  ;;  %v2612_v54 = vmax.f32 %v2001_v60, 0.0 }
 0x2f5   :  { %v2617_v47 = vmax.f32 %v1810_v63, 0.0  ;;  %v2619_v51 = vmax.f32 %v2003_v62, 0.0 }
 0x2f6   :  { %v2618_v38 = vmax.f32 %v1812_v39, 0.0  ;;  %v2620_v17 = vmax.f32 %v2005_v30, 0.0 }
 0x2f7   :  { %v2777_v40 = vpack.c.bf16 %v2617_v47, %v2609_v41  ;;  %v2779_v21 = vpack.c.bf16 %v2619_v51, %v2611_v56 }
 0x2f8   :  { %v2778_v16 = vpack.c.bf16 %v2618_v38, %v2610_v19  ;;  %v2780_v42 = vpack.c.bf16 %v2620_v17, %v2612_v54 }
 0x2f9   :  { %v2955_v44 = vmax.bf16 %v2954_v55, %v2777_v40  ;;  %v2989_v59 = vmax.bf16 %v2988_v34, %v2779_v21 }
 0x2fa   :  { %v2972_v26 = vmax.bf16 %v2971_v45, %v2778_v16  ;;  %v3006_v43 = vmax.bf16 %v3005_v61, %v2780_v42 }
 0x2fb   :  { %v1815_v25 = vpop.f32.mrb[48].mxu1  ;;  %v2008_v32 = vpop.f32.mrb[80].mxu0 }
 0x2fc   :  { %v1816_v35 = vadd.f32 %v1815_v25, %v5366_v57  ;;  %v2009_v24 = vadd.f32 %v2008_v32, %v5370_v58  ;;  %v1817_v52 = vpop.f32.mrb[49].mxu1  ;;  %v2010_v27 = vpop.f32.mrb[81].mxu0 }
 0x2fd   :  { %v1818_v60 = vadd.f32 %v1817_v52, %v5373_v28  ;;  %v2011_v63 = vadd.f32 %v2010_v27, %v5377_v29  ;;  %v1819_v62 = vpop.f32.mrb[50].mxu1  ;;  %v2012_v39 = vpop.f32.mrb[82].mxu0 }
 0x2fe   :  { %v1820_v30 = vadd.f32 %v1819_v62, %v5366_v57  ;;  %v2013_v55 = vadd.f32 %v2012_v39, %v5370_v58  ;;  %v1821_v34 = vpop.f32.mrb[51].mxu1  ;;  %v2014_v45 = vpop.f32.mrb[83].mxu0  ;;  %v2625_v56 = vmax.f32 %v1816_v35, 0.0  ;;  %v2627_v19 = vmax.f32 %v2009_v24, 0.0 }
 0x2ff   :  { %v1822_v61 = vadd.f32 %v1821_v34, %v5373_v28  ;;  %v2015_v41 = vadd.f32 %v2014_v45, %v5377_v29  ;;  %v2626_v51 = vmax.f32 %v1818_v60, 0.0  ;;  %v2628_v38 = vmax.f32 %v2011_v63, 0.0 }
 0x300   :  { %v2633_v54 = vmax.f32 %v1820_v30, 0.0  ;;  %v2635_v47 = vmax.f32 %v2013_v55, 0.0 }
 0x301   :  { %v2634_v17 = vmax.f32 %v1822_v61, 0.0  ;;  %v2636_v40 = vmax.f32 %v2015_v41, 0.0 }
 0x302   :  { %v2785_v21 = vpack.c.bf16 %v2633_v54, %v2625_v56  ;;  %v2787_v16 = vpack.c.bf16 %v2635_v47, %v2627_v19 }
 0x303   :  { %v2786_v42 = vpack.c.bf16 %v2634_v17, %v2626_v51  ;;  %v2788_v25 = vpack.c.bf16 %v2636_v40, %v2628_v38  ;;  %v1825_v32 = vpop.f32.mrb[52].mxu1  ;;  %v2018_v52 = vpop.f32.mrb[84].mxu0 }
 0x304   :  { %v5577_v27 = vmax.bf16 %v2955_v44, %v2785_v21  ;;  %v5579_v62 = vmax.bf16 %v2989_v59, %v2787_v16  ;;  %v1826_v39 = vadd.f32 %v1825_v32, %v5366_v57  ;;  %v2019_v35 = vadd.f32 %v2018_v52, %v5370_v58  ;;  %v1827_v24 = vpop.f32.mrb[53].mxu1  ;;  %v2020_v30 = vpop.f32.mrb[85].mxu0 }
 0x305   :  { %v5583_v60 = vmax.bf16 %v2972_v26, %v2786_v42  ;;  %v5585_v63 = vmax.bf16 %v3006_v43, %v2788_v25  ;;  %v1828_v55 = vadd.f32 %v1827_v24, %v5373_v28  ;;  %v2021_v34 = vadd.f32 %v2020_v30, %v5377_v29  ;;  %v1829_v45 = vpop.f32.mrb[54].mxu1  ;;  %v2022_v61 = vpop.f32.mrb[86].mxu0 }
 0x306   :  { %v1830_v44 = vadd.f32 %v1829_v45, %v5366_v57  ;;  %v2023_v59 = vadd.f32 %v2022_v61, %v5370_v58  ;;  %v1831_v41 = vpop.f32.mrb[55].mxu1  ;;  %v2024_v56 = vpop.f32.mrb[87].mxu0  ;;  %v2641_v26 = vmax.f32 %v1826_v39, 0.0  ;;  %v2643_v47 = vmax.f32 %v2019_v35, 0.0 }
 0x307   :  { %v1832_v19 = vadd.f32 %v1831_v41, %v5373_v28  ;;  %v2025_v54 = vadd.f32 %v2024_v56, %v5377_v29  ;;  %v2642_v38 = vmax.f32 %v1828_v55, 0.0  ;;  %v2644_v17 = vmax.f32 %v2021_v34, 0.0 }
 0x308   :  { %v2649_v43 = vmax.f32 %v1830_v44, 0.0  ;;  %v2651_v51 = vmax.f32 %v2023_v59, 0.0 }
 0x309   :  { %v2650_v40 = vmax.f32 %v1832_v19, 0.0  ;;  %v2652_v21 = vmax.f32 %v2025_v54, 0.0 }
 0x30a   :  { %v2793_v16 = vpack.c.bf16 %v2649_v43, %v2641_v26  ;;  %v2795_v42 = vpack.c.bf16 %v2651_v51, %v2643_v47 }
 0x30b   :  { %v2794_v25 = vpack.c.bf16 %v2650_v40, %v2642_v38  ;;  %v2796_v32 = vpack.c.bf16 %v2652_v21, %v2644_v17 }
 0x30c   :  { %v2957_v52 = vmax.bf16 %v5577_v27, %v2793_v16  ;;  %v2991_v24 = vmax.bf16 %v5579_v62, %v2795_v42 }
 0x30d   :  { %v2974_v30 = vmax.bf16 %v5583_v60, %v2794_v25  ;;  %v3008_v45 = vmax.bf16 %v5585_v63, %v2796_v32  ;;  %v1319_v32 = vsub.s32 4, %v5348_v49 }
 0x30e   :  { %v1835_v39 = vpop.f32.mrb[56].mxu1  ;;  %v2028_v35 = vpop.f32.mrb[88].mxu0 }
 0x30f   :  { %v1836_v61 = vadd.f32 %v1835_v39, %v5366_v57  ;;  %v2029_v55 = vadd.f32 %v2028_v35, %v5370_v58  ;;  %v1837_v34 = vpop.f32.mrb[57].mxu1  ;;  %v2030_v44 = vpop.f32.mrb[89].mxu0  ;;  %v1327_v39 = vsub.s32 6, %v5348_v49 }
 0x310   :  { %v1838_v59 = vadd.f32 %v1837_v34, %v5373_v28  ;;  %v2031_v41 = vadd.f32 %v2030_v44, %v5377_v29  ;;  %v1839_v56 = vpop.f32.mrb[58].mxu1  ;;  %v2032_v27 = vpop.f32.mrb[90].mxu0 }
 0x311   :  { %v1840_v62 = vadd.f32 %v1839_v56, %v5366_v57  ;;  %v2033_v60 = vadd.f32 %v2032_v27, %v5370_v58  ;;  %v1841_v19 = vpop.f32.mrb[59].mxu1  ;;  %v2034_v63 = vpop.f32.mrb[91].mxu0  ;;  %v2657_v47 = vmax.f32 %v1836_v61, 0.0  ;;  %v2659_v43 = vmax.f32 %v2029_v55, 0.0 }
 0x312   :  { %v1842_v54 = vadd.f32 %v1841_v19, %v5373_v28  ;;  %v2035_v26 = vadd.f32 %v2034_v63, %v5377_v29  ;;  %v2658_v17 = vmax.f32 %v1838_v59, 0.0  ;;  %v2660_v40 = vmax.f32 %v2031_v41, 0.0 }
 0x313   :  { %v2665_v51 = vmax.f32 %v1840_v62, 0.0  ;;  %v2667_v38 = vmax.f32 %v2033_v60, 0.0  ;;  %v1323_v27 = vsub.s32 5, %v5348_v49  ;;  %v1331_v61 = vsub.s32 7, %v5348_v49 }
 0x314   :  { %v2666_v21 = vmax.f32 %v1842_v54, 0.0  ;;  %v2668_v16 = vmax.f32 %v2035_v26, 0.0 }
 0x315   :  { %v2801_v42 = vpack.c.bf16 %v2665_v51, %v2657_v47  ;;  %v2803_v25 = vpack.c.bf16 %v2667_v38, %v2659_v43 }
 0x316   :  { %v2802_v35 = vpack.c.bf16 %v2666_v21, %v2658_v17  ;;  %v2804_v34 = vpack.c.bf16 %v2668_v16, %v2660_v40  ;;  %v1845_v44 = vpop.f32.mrb[60].mxu1  ;;  %v2038_v56 = vpop.f32.mrb[92].mxu0  ;;  %v4636_v40 = vld [vmem:[%s5987_s4 + $0x2] sm:$0xff] }
 0x317   :  { %v2958_v55 = vmax.bf16 %v2957_v52, %v2801_v42  ;;  %v2992_v62 = vmax.bf16 %v2991_v24, %v2803_v25  ;;  %v1846_v59 = vadd.f32 %v1845_v44, %v5366_v57  ;;  %v2039_v41 = vadd.f32 %v2038_v56, %v5370_v58  ;;  %v1847_v60 = vpop.f32.mrb[61].mxu1  ;;  %v2040_v19 = vpop.f32.mrb[93].mxu0 }
 0x318   :  { %v2975_v63 = vmax.bf16 %v2974_v30, %v2802_v35  ;;  %v3009_v54 = vmax.bf16 %v3008_v45, %v2804_v34  ;;  %v1848_v26 = vadd.f32 %v1847_v60, %v5373_v28  ;;  %v2041_v47 = vadd.f32 %v2040_v19, %v5377_v29  ;;  %v1849_v43 = vpop.f32.mrb[62].mxu1  ;;  %v2042_v51 = vpop.f32.mrb[94].mxu0 }
 0x319   :  { %v1850_v38 = vadd.f32 %v1849_v43, %v5366_v57  ;;  %v2043_v17 = vadd.f32 %v2042_v51, %v5370_v58  ;;  %v1851_v52 = vpop.f32.mrb[63].mxu1  ;;  %v2044_v24 = vpop.f32.mrb[95].mxu0  ;;  %v5618_v21 = vrot.slane %v4636_v40, %v1319_v32  ;;  %v5620_v30 = vrot.slane %v4636_v40, %v1327_v39 }
 0x31a   :  { %v1852_v45 = vadd.f32 %v1851_v52, %v5373_v28  ;;  %v2045_v16 = vadd.f32 %v2044_v24, %v5377_v29  ;;  %v5624_v42 = vrot.slane %v4636_v40, %v1323_v27  ;;  %v5626_v25 = vrot.slane %v4636_v40, %v1331_v61 }
 0x31b   :  { %v2673_v57 = vmax.f32 %v1846_v59, 0.0  ;;  %v2675_v58 = vmax.f32 %v2039_v41, 0.0  ;;  %v2681_v35 = vmax.f32 %v1850_v38, 0.0  ;;  %v2683_v34 = vmax.f32 %v2043_v17, 0.0 }
 0x31c   :  { %v2674_v44 = vmax.f32 %v1848_v26, 0.0  ;;  %v2676_v56 = vmax.f32 %v2041_v47, 0.0  ;;  %v2682_v60 = vmax.f32 %v1852_v45, 0.0  ;;  %v2684_v19 = vmax.f32 %v2045_v16, 0.0 }
 0x31d   :  { %v2809_v32 = vpack.c.bf16 %v2681_v35, %v2673_v57  ;;  %v2811_v43 = vpack.c.bf16 %v2683_v34, %v2675_v58 }
 0x31e   :  { %v2810_v39 = vpack.c.bf16 %v2682_v60, %v2674_v44  ;;  %v2812_v51 = vpack.c.bf16 %v2684_v19, %v2676_v56  ;;  %v2081_v37 = vpop.f32.mrb[64].mxu1  ;;  %v2274_v28 = vpop.f32.mrb[96].mxu0 }
 0x31f   :  { %v2959_v52 = vmax.bf16 %v2958_v55, %v2809_v32  ;;  %v2993_v29 = vmax.bf16 %v2992_v62, %v2811_v43  ;;  %v2082_v27 = vadd.f32 %v2081_v37, %v5618_v21  ;;  %v2275_v61 = vadd.f32 %v2274_v28, %v5620_v30  ;;  %v2083_v59 = vpop.f32.mrb[65].mxu1  ;;  %v2276_v41 = vpop.f32.mrb[97].mxu0 }
 0x320   :  { %v2976_v38 = vmax.bf16 %v2975_v63, %v2810_v39  ;;  %v3010_v17 = vmax.bf16 %v3009_v54, %v2812_v51  ;;  %v2084_v26 = vadd.f32 %v2083_v59, %v5624_v42  ;;  %v2277_v47 = vadd.f32 %v2276_v41, %v5626_v25  ;;  %v2085_v24 = vpop.f32.mrb[66].mxu1  ;;  %v2278_v40 = vpop.f32.mrb[98].mxu0 }
 0x321   :  { %v2960_v45 = vunpack.i.l.bf16 %v2959_v52  ;;  %v2961_v16 = vunpack.i.h.bf16 %v2959_v52  ;;  %v2994_v57 = vunpack.i.l.bf16 %v2993_v29  ;;  %v2995_v58 = vunpack.i.h.bf16 %v2993_v29  ;;  %v2087_v55 = vpop.f32.mrb[67].mxu1  ;;  %v2280_v62 = vpop.f32.mrb[99].mxu0 }
 0x322   :  { %v2977_v35 = vunpack.i.l.bf16 %v2976_v38  ;;  %v2978_v37 = vunpack.i.h.bf16 %v2976_v38  ;;  %v3011_v34 = vunpack.i.l.bf16 %v3010_v17  ;;  %v3012_v44 = vunpack.i.h.bf16 %v3010_v17 }
 0x323   :  { %v2962_v56 = vmax.f32 %v2960_v45, %v2961_v16  ;;  %v2996_v60 = vmax.f32 %v2994_v57, %v2995_v58  ;;  %v2437_v63 = vmax.f32 %v2082_v27, 0.0  ;;  %v2439_v54 = vmax.f32 %v2275_v61, 0.0 }
 0x324   :  { %v2979_v19 = vmax.f32 %v2977_v35, %v2978_v37  ;;  %v3013_v32 = vmax.f32 %v3011_v34, %v3012_v44  ;;  %v2438_v43 = vmax.f32 %v2084_v26, 0.0  ;;  %v2440_v39 = vmax.f32 %v2277_v47, 0.0 }
 0x325   :  { %v2963_v51 = vrot.slane %v2962_v56, 4  ;;  %v2997_v28 = vrot.slane %v2996_v60, 4  ;;  %v2086_v52 = vadd.f32 %v2085_v24, %v5618_v21  ;;  %v2279_v29 = vadd.f32 %v2278_v40, %v5620_v30 }
 0x326   :  { %v2980_v59 = vrot.slane %v2979_v19, 4  ;;  %v3014_v41 = vrot.slane %v3013_v32, 4  ;;  %v2088_v38 = vadd.f32 %v2087_v55, %v5624_v42  ;;  %v2281_v17 = vadd.f32 %v2280_v62, %v5626_v25  ;;  %v2091_v45 = vpop.f32.mrb[68].mxu1  ;;  %v2284_v16 = vpop.f32.mrb[100].mxu0 }
 0x327   :  { %v2964_v27 = vmax.f32 %v2962_v56, %v2963_v51  ;;  %v2998_v61 = vmax.f32 %v2996_v60, %v2997_v28  ;;  %v2445_v57 = vmax.f32 %v2086_v52, 0.0  ;;  %v2447_v58 = vmax.f32 %v2279_v29, 0.0  ;;  %v2093_v26 = vpop.f32.mrb[69].mxu1  ;;  %v2286_v47 = vpop.f32.mrb[101].mxu0 }
 0x328   :  { %v2981_v35 = vmax.f32 %v2979_v19, %v2980_v59  ;;  %v3015_v37 = vmax.f32 %v3013_v32, %v3014_v41  ;;  %v2446_v34 = vmax.f32 %v2088_v38, 0.0  ;;  %v2448_v24 = vmax.f32 %v2281_v17, 0.0  ;;  %v2095_v44 = vpop.f32.mrb[70].mxu1  ;;  %v2288_v40 = vpop.f32.mrb[102].mxu0 }
 0x329   :  { %v2965_v46 = vrot.slane %v2964_v27, 2  ;;  %v2999_v22 = vrot.slane %v2998_v61, 2  ;;  %v5636_v53 = vpack.c.bf16 %v2445_v57, %v2437_v63  ;;  %v5638_v55 = vpack.c.bf16 %v2447_v58, %v2439_v54  ;;  %v2097_v62 = vpop.f32.mrb[71].mxu1  ;;  %v2290_v20 = vpop.f32.mrb[103].mxu0 }
 0x32a   :  { %v2982_v56 = vrot.slane %v2981_v35, 2  ;;  %v3016_v60 = vrot.slane %v3015_v37, 2  ;;  %v5640_v51 = vpack.c.bf16 %v2446_v34, %v2438_v43  ;;  %v5642_v28 = vpack.c.bf16 %v2448_v24, %v2440_v39 }
 0x32b   :  { %v2966_v19 = vmax.f32 %v2964_v27, %v2965_v46  ;;  %v3000_v32 = vmax.f32 %v2998_v61, %v2999_v22  ;;  %v2092_v52 = vadd.f32 %v2091_v45, %v5618_v21  ;;  %v2285_v29 = vadd.f32 %v2284_v16, %v5620_v30 }
 0x32c   :  { %v2983_v59 = vmax.f32 %v2981_v35, %v2982_v56  ;;  %v3017_v41 = vmax.f32 %v3015_v37, %v3016_v60  ;;  %v2094_v63 = vadd.f32 %v2093_v26, %v5624_v42  ;;  %v2287_v54 = vadd.f32 %v2286_v47, %v5626_v25 }
 0x32d   :  { %v2967_v38 = vrot.slane %v2966_v19, 1  ;;  %v3001_v17 = vrot.slane %v3000_v32, 1  ;;  %v2453_v57 = vmax.f32 %v2092_v52, 0.0  ;;  %v2455_v58 = vmax.f32 %v2285_v29, 0.0 }
 0x32e   :  { %v2984_v43 = vrot.slane %v2983_v59, 1  ;;  %v3018_v34 = vrot.slane %v3017_v41, 1  ;;  %v2454_v39 = vmax.f32 %v2094_v63, 0.0  ;;  %v2456_v24 = vmax.f32 %v2287_v54, 0.0  ;;  %v2101_v46 = vpop.f32.mrb[72].mxu1  ;;  %v2294_v22 = vpop.f32.mrb[104].mxu0 }
 0x32f   :  { %v5648_v27 = vmax.f32 %v2966_v19, %v2967_v38  ;;  %v5650_v45 = vmax.f32 %v3000_v32, %v3001_v17  ;;  %v2096_v16 = vadd.f32 %v2095_v44, %v5618_v21  ;;  %v2289_v61 = vadd.f32 %v2288_v40, %v5620_v30  ;;  %v2103_v26 = vpop.f32.mrb[73].mxu1  ;;  %v2296_v47 = vpop.f32.mrb[105].mxu0 }
 0x330   :  { %v5654_v35 = vmax.f32 %v2983_v59, %v2984_v43  ;;  %v5656_v37 = vmax.f32 %v3017_v41, %v3018_v34  ;;  %v2098_v56 = vadd.f32 %v2097_v62, %v5624_v42  ;;  %v2291_v60 = vadd.f32 %v2290_v20, %v5626_v25  ;;  %v2105_v52 = vpop.f32.mrb[74].mxu1  ;;  %v2298_v29 = vpop.f32.mrb[106].mxu0 }
 0x331   :  { %v2461_v32 = vmax.f32 %v2096_v16, 0.0  ;;  %v2463_v40 = vmax.f32 %v2289_v61, 0.0  ;;  %v2107_v63 = vpop.f32.mrb[75].mxu1  ;;  %v2300_v54 = vpop.f32.mrb[107].mxu0  ;;  %v2102_v43 = vadd.f32 %v2101_v46, %v5618_v21  ;;  %v2295_v34 = vadd.f32 %v2294_v22, %v5620_v30 }
 0x332   :  { %v2462_v41 = vmax.f32 %v2098_v56, 0.0  ;;  %v2464_v20 = vmax.f32 %v2291_v60, 0.0  ;;  %v2104_v16 = vadd.f32 %v2103_v26, %v5624_v42  ;;  %v2297_v61 = vadd.f32 %v2296_v47, %v5626_v25 }
 0x333   :  { %v2701_v38 = vpack.c.bf16 %v2461_v32, %v2453_v57  ;;  %v2703_v17 = vpack.c.bf16 %v2463_v40, %v2455_v58  ;;  %v2469_v7 = vmax.f32 %v2102_v43, 0.0  ;;  %v2471_v62 = vmax.f32 %v2295_v34, 0.0 }
 0x334   :  { %v2702_v19 = vpack.c.bf16 %v2462_v41, %v2454_v39  ;;  %v2704_v44 = vpack.c.bf16 %v2464_v20, %v2456_v24  ;;  %v2470_v58 = vmax.f32 %v2104_v16, 0.0  ;;  %v2472_v46 = vmax.f32 %v2297_v61, 0.0 }
 0x335   :  { %v2885_v33 = vmax.bf16 %v2701_v38, %v5636_v53  ;;  %v2919_v59 = vmax.bf16 %v2703_v17, %v5638_v55  ;;  %v2106_v39 = vadd.f32 %v2105_v52, %v5618_v21  ;;  %v2299_v24 = vadd.f32 %v2298_v29, %v5620_v30 }
 0x336   :  { %v2902_v56 = vmax.bf16 %v2702_v19, %v5640_v51  ;;  %v2936_v57 = vmax.bf16 %v2704_v44, %v5642_v28  ;;  %v2111_v60 = vpop.f32.mrb[76].mxu1  ;;  %v2304_v22 = vpop.f32.mrb[108].mxu0  ;;  %v2108_v26 = vadd.f32 %v2107_v63, %v5624_v42  ;;  %v2301_v53 = vadd.f32 %v2300_v54, %v5626_v25 }
 0x337   :  { %v2113_v47 = vpop.f32.mrb[77].mxu1  ;;  %v2306_v55 = vpop.f32.mrb[109].mxu0  ;;  %v2112_v32 = vadd.f32 %v2111_v60, %v5618_v21  ;;  %v2305_v51 = vadd.f32 %v2304_v22, %v5620_v30  ;;  %v2477_v41 = vmax.f32 %v2106_v39, 0.0  ;;  %v2479_v52 = vmax.f32 %v2299_v24, 0.0 }
 0x338   :  { %v2114_v28 = vadd.f32 %v2113_v47, %v5624_v42  ;;  %v2307_v19 = vadd.f32 %v2306_v55, %v5626_v25  ;;  %v2115_v44 = vpop.f32.mrb[78].mxu1  ;;  %v2308_v40 = vpop.f32.mrb[110].mxu0  ;;  %v2478_v20 = vmax.f32 %v2108_v26, 0.0  ;;  %v2480_v29 = vmax.f32 %v2301_v53, 0.0 }
 0x339   :  { %v2117_v38 = vpop.f32.mrb[79].mxu1  ;;  %v2310_v63 = vpop.f32.mrb[111].mxu0  ;;  %v2485_v17 = vmax.f32 %v2112_v32, 0.0  ;;  %v2487_v54 = vmax.f32 %v2305_v51, 0.0  ;;  %v2709_v16 = vpack.c.bf16 %v2477_v41, %v2469_v7  ;;  %v2711_v61 = vpack.c.bf16 %v2479_v52, %v2471_v62 }
 0x33a   :  { %v2486_v43 = vmax.f32 %v2114_v28, 0.0  ;;  %v2488_v34 = vmax.f32 %v2307_v19, 0.0  ;;  %v2710_v60 = vpack.c.bf16 %v2478_v20, %v2470_v58  ;;  %v2712_v22 = vpack.c.bf16 %v2480_v29, %v2472_v46 }
 0x33b   :  { %v2116_v47 = vadd.f32 %v2115_v44, %v5618_v21  ;;  %v2309_v55 = vadd.f32 %v2308_v40, %v5620_v30  ;;  %v2118_v15 = vadd.f32 %v2117_v38, %v5624_v42  ;;  %v2311_v39 = vadd.f32 %v2310_v63, %v5626_v25 }
 0x33c   :  { %v2886_v24 = vmax.bf16 %v2885_v33, %v2709_v16  ;;  %v2920_v26 = vmax.bf16 %v2919_v59, %v2711_v61  ;;  %v2903_v53 = vmax.bf16 %v2902_v56, %v2710_v60  ;;  %v2937_v6 = vmax.bf16 %v2936_v57, %v2712_v22 }
 0x33d   :  { %v2493_v32 = vmax.f32 %v2116_v47, 0.0  ;;  %v2495_v51 = vmax.f32 %v2309_v55, 0.0  ;;  %v2494_v28 = vmax.f32 %v2118_v15, 0.0  ;;  %v2496_v19 = vmax.f32 %v2311_v39, 0.0 }
 0x33e   :  { %v2121_v7 = vpop.f32.mrb[80].mxu1  ;;  %v2314_v62 = vpop.f32.mrb[112].mxu0 }
 0x33f   :  { %v2123_v58 = vpop.f32.mrb[81].mxu1  ;;  %v2316_v46 = vpop.f32.mrb[113].mxu0  ;;  %v2717_v41 = vpack.c.bf16 %v2493_v32, %v2485_v17  ;;  %v2719_v44 = vpack.c.bf16 %v2495_v51, %v2487_v54  ;;  %v2718_v52 = vpack.c.bf16 %v2494_v28, %v2486_v43  ;;  %v2720_v40 = vpack.c.bf16 %v2496_v19, %v2488_v34 }
 0x340   :  { %v2125_v20 = vpop.f32.mrb[82].mxu1  ;;  %v2318_v29 = vpop.f32.mrb[114].mxu0  ;;  %v2122_v38 = vadd.f32 %v2121_v7, %v5618_v21  ;;  %v2315_v33 = vadd.f32 %v2314_v62, %v5620_v30  ;;  %v2124_v59 = vadd.f32 %v2123_v58, %v5624_v42  ;;  %v2317_v56 = vadd.f32 %v2316_v46, %v5626_v25 }
 0x341   :  { %v2127_v15 = vpop.f32.mrb[83].mxu1  ;;  %v2320_v57 = vpop.f32.mrb[115].mxu0  ;;  %v2887_v63 = vmax.bf16 %v2886_v24, %v2717_v41  ;;  %v2921_v16 = vmax.bf16 %v2920_v26, %v2719_v44  ;;  %v2904_v61 = vmax.bf16 %v2903_v53, %v2718_v52  ;;  %v2938_v60 = vmax.bf16 %v2937_v6, %v2720_v40 }
 0x342   :  { %v2126_v17 = vadd.f32 %v2125_v20, %v5618_v21  ;;  %v2319_v54 = vadd.f32 %v2318_v29, %v5620_v30  ;;  %v2128_v43 = vadd.f32 %v2127_v15, %v5624_v42  ;;  %v2321_v34 = vadd.f32 %v2320_v57, %v5626_v25 }
 0x343   :  { %v2501_v22 = vmax.f32 %v2122_v38, 0.0  ;;  %v2503_v47 = vmax.f32 %v2315_v33, 0.0  ;;  %v2502_v32 = vmax.f32 %v2124_v59, 0.0  ;;  %v2504_v51 = vmax.f32 %v2317_v56, 0.0 }
 0x344   :  { %v2509_v55 = vmax.f32 %v2126_v17, 0.0  ;;  %v2511_v39 = vmax.f32 %v2319_v54, 0.0  ;;  %v2510_v28 = vmax.f32 %v2128_v43, 0.0  ;;  %v2512_v19 = vmax.f32 %v2321_v34, 0.0 }
 0x346   :  { %v2131_v24 = vpop.f32.mrb[84].mxu1  ;;  %v2324_v26 = vpop.f32.mrb[116].mxu0  ;;  %v2725_v53 = vpack.c.bf16 %v2509_v55, %v2501_v22  ;;  %v2727_v6 = vpack.c.bf16 %v2511_v39, %v2503_v47  ;;  %v2726_v41 = vpack.c.bf16 %v2510_v28, %v2502_v32  ;;  %v2728_v44 = vpack.c.bf16 %v2512_v19, %v2504_v51 }
 0x347   :  { %v2132_v7 = vadd.f32 %v2131_v24, %v5618_v21  ;;  %v2325_v62 = vadd.f32 %v2324_v26, %v5620_v30  ;;  %v2133_v58 = vpop.f32.mrb[85].mxu1  ;;  %v2326_v46 = vpop.f32.mrb[117].mxu0 }
 0x348   :  { %v2134_v52 = vadd.f32 %v2133_v58, %v5624_v42  ;;  %v2327_v40 = vadd.f32 %v2326_v46, %v5626_v25  ;;  %v2135_v20 = vpop.f32.mrb[86].mxu1  ;;  %v2328_v29 = vpop.f32.mrb[118].mxu0  ;;  %v5700_v38 = vmax.bf16 %v2887_v63, %v2725_v53  ;;  %v5702_v33 = vmax.bf16 %v2921_v16, %v2727_v6 }
 0x349   :  { %v2137_v59 = vpop.f32.mrb[87].mxu1  ;;  %v2330_v56 = vpop.f32.mrb[119].mxu0  ;;  %v5704_v15 = vmax.bf16 %v2904_v61, %v2726_v41  ;;  %v5706_v57 = vmax.bf16 %v2938_v60, %v2728_v44  ;;  %v2136_v17 = vadd.f32 %v2135_v20, %v5618_v21  ;;  %v2329_v54 = vadd.f32 %v2328_v29, %v5620_v30 }
 0x34a   :  { %v2138_v43 = vadd.f32 %v2137_v59, %v5624_v42  ;;  %v2331_v34 = vadd.f32 %v2330_v56, %v5626_v25  ;;  %v2517_v22 = vmax.f32 %v2132_v7, 0.0  ;;  %v2519_v47 = vmax.f32 %v2325_v62, 0.0 }
 0x34b   :  { %v2518_v63 = vmax.f32 %v2134_v52, 0.0  ;;  %v2520_v55 = vmax.f32 %v2327_v40, 0.0  ;;  %v2525_v16 = vmax.f32 %v2136_v17, 0.0  ;;  %v2527_v39 = vmax.f32 %v2329_v54, 0.0 }
 0x34c   :  { %v2526_v32 = vmax.f32 %v2138_v43, 0.0  ;;  %v2528_v51 = vmax.f32 %v2331_v34, 0.0 }
 0x34d   :  { %v2733_v60 = vpack.c.bf16 %v2525_v16, %v2517_v22  ;;  %v2735_v19 = vpack.c.bf16 %v2527_v39, %v2519_v47 }
 0x34e   :  { %v2141_v61 = vpop.f32.mrb[88].mxu1  ;;  %v2334_v28 = vpop.f32.mrb[120].mxu0  ;;  %v2734_v24 = vpack.c.bf16 %v2526_v32, %v2518_v63  ;;  %v2736_v26 = vpack.c.bf16 %v2528_v51, %v2520_v55 }
 0x34f   :  { %v2143_v53 = vpop.f32.mrb[89].mxu1  ;;  %v2336_v6 = vpop.f32.mrb[121].mxu0  ;;  %v2142_v58 = vadd.f32 %v2141_v61, %v5618_v21  ;;  %v2335_v46 = vadd.f32 %v2334_v28, %v5620_v30  ;;  %v2889_v52 = vmax.bf16 %v5700_v38, %v2733_v60  ;;  %v2923_v40 = vmax.bf16 %v5702_v33, %v2735_v19 }
 0x350   :  { %v2144_v7 = vadd.f32 %v2143_v53, %v5624_v42  ;;  %v2337_v62 = vadd.f32 %v2336_v6, %v5626_v25  ;;  %v2145_v41 = vpop.f32.mrb[90].mxu1  ;;  %v2338_v44 = vpop.f32.mrb[122].mxu0  ;;  %v2906_v20 = vmax.bf16 %v5704_v15, %v2734_v24  ;;  %v2940_v29 = vmax.bf16 %v5706_v57, %v2736_v26 }
 0x351   :  { %v2147_v59 = vpop.f32.mrb[91].mxu1  ;;  %v2340_v56 = vpop.f32.mrb[123].mxu0  ;;  %v2146_v17 = vadd.f32 %v2145_v41, %v5618_v21  ;;  %v2339_v54 = vadd.f32 %v2338_v44, %v5620_v30  ;;  %v2533_v22 = vmax.f32 %v2142_v58, 0.0  ;;  %v2535_v47 = vmax.f32 %v2335_v46, 0.0 }
 0x352   :  { %v2148_v43 = vadd.f32 %v2147_v59, %v5624_v42  ;;  %v2341_v34 = vadd.f32 %v2340_v56, %v5626_v25  ;;  %v2534_v63 = vmax.f32 %v2144_v7, 0.0  ;;  %v2536_v38 = vmax.f32 %v2337_v62, 0.0 }
 0x353   :  { %v2541_v55 = vmax.f32 %v2146_v17, 0.0  ;;  %v2543_v33 = vmax.f32 %v2339_v54, 0.0 }
 0x354   :  { %v2542_v16 = vmax.f32 %v2148_v43, 0.0  ;;  %v2544_v15 = vmax.f32 %v2341_v34, 0.0 }
 0x355   :  { %v2741_v32 = vpack.c.bf16 %v2541_v55, %v2533_v22  ;;  %v2743_v51 = vpack.c.bf16 %v2543_v33, %v2535_v47 }
 0x356   :  { %v2151_v39 = vpop.f32.mrb[92].mxu1  ;;  %v2344_v57 = vpop.f32.mrb[124].mxu0  ;;  %v2742_v61 = vpack.c.bf16 %v2542_v16, %v2534_v63  ;;  %v2744_v28 = vpack.c.bf16 %v2544_v15, %v2536_v38 }
 0x357   :  { %v2153_v60 = vpop.f32.mrb[93].mxu1  ;;  %v2346_v19 = vpop.f32.mrb[125].mxu0  ;;  %v2152_v24 = vadd.f32 %v2151_v39, %v5618_v21  ;;  %v2345_v26 = vadd.f32 %v2344_v57, %v5620_v30  ;;  %v2890_v7 = vmax.bf16 %v2889_v52, %v2741_v32  ;;  %v2924_v62 = vmax.bf16 %v2923_v40, %v2743_v51 }
 0x358   :  { %v2154_v53 = vadd.f32 %v2153_v60, %v5624_v42  ;;  %v2347_v6 = vadd.f32 %v2346_v19, %v5626_v25  ;;  %v2155_v58 = vpop.f32.mrb[94].mxu1  ;;  %v2348_v46 = vpop.f32.mrb[126].mxu0  ;;  %v2907_v41 = vmax.bf16 %v2906_v20, %v2742_v61  ;;  %v2941_v44 = vmax.bf16 %v2940_v29, %v2744_v28 }
 0x359   :  { %v2157_v59 = vpop.f32.mrb[95].mxu1  ;;  %v2350_v56 = vpop.f32.mrb[127].mxu0  ;;  %v2156_v17 = vadd.f32 %v2155_v58, %v5618_v21  ;;  %v2349_v54 = vadd.f32 %v2348_v46, %v5620_v30  ;;  %v2549_v22 = vmax.f32 %v2152_v24, 0.0  ;;  %v2551_v47 = vmax.f32 %v2345_v26, 0.0 }
 0x35a   :  { %v2158_v43 = vadd.f32 %v2157_v59, %v5624_v42  ;;  %v2351_v34 = vadd.f32 %v2350_v56, %v5626_v25  ;;  %v2550_v63 = vmax.f32 %v2154_v53, 0.0  ;;  %v2552_v38 = vmax.f32 %v2347_v6, 0.0 }
 0x35b   :  { %v2557_v55 = vmax.f32 %v2156_v17, 0.0  ;;  %v2559_v33 = vmax.f32 %v2349_v54, 0.0 }
 0x35c   :  { %v2558_v52 = vmax.f32 %v2158_v43, 0.0  ;;  %v2560_v40 = vmax.f32 %v2351_v34, 0.0 }
 0x35d   :  { %v2749_v16 = vpack.c.bf16 %v2557_v55, %v2549_v22  ;;  %v2751_v15 = vpack.c.bf16 %v2559_v33, %v2551_v47 }
 0x35e   :  { %v2161_v20 = vpop.f32.mrb[96].mxu1  ;;  %v2354_v29 = vpop.f32.mrb[128].mxu0  ;;  %v2750_v39 = vpack.c.bf16 %v2558_v52, %v2550_v63  ;;  %v2752_v57 = vpack.c.bf16 %v2560_v40, %v2552_v38 }
 0x35f   :  { %v2163_v32 = vpop.f32.mrb[97].mxu1  ;;  %v2356_v51 = vpop.f32.mrb[129].mxu0  ;;  %v2162_v61 = vadd.f32 %v2161_v20, %v5618_v21  ;;  %v2355_v28 = vadd.f32 %v2354_v29, %v5620_v30  ;;  %v2891_v53 = vmax.bf16 %v2890_v7, %v2749_v16  ;;  %v2925_v6 = vmax.bf16 %v2924_v62, %v2751_v15 }
 0x360   :  { %v2164_v60 = vadd.f32 %v2163_v32, %v5624_v42  ;;  %v2357_v19 = vadd.f32 %v2356_v51, %v5626_v25  ;;  %v2165_v24 = vpop.f32.mrb[98].mxu1  ;;  %v2358_v26 = vpop.f32.mrb[130].mxu0  ;;  %v2908_v58 = vmax.bf16 %v2907_v41, %v2750_v39  ;;  %v2942_v46 = vmax.bf16 %v2941_v44, %v2752_v57 }
 0x361   :  { %v2167_v59 = vpop.f32.mrb[99].mxu1  ;;  %v2360_v56 = vpop.f32.mrb[131].mxu0  ;;  %v2565_v17 = vmax.f32 %v2162_v61, 0.0  ;;  %v2567_v54 = vmax.f32 %v2355_v28, 0.0  ;;  %v2892_v22 = vunpack.i.l.bf16 %v2891_v53  ;;  %v2893_v47 = vunpack.i.h.bf16 %v2891_v53 }
 0x362   :  { %v2566_v43 = vmax.f32 %v2164_v60, 0.0  ;;  %v2568_v34 = vmax.f32 %v2357_v19, 0.0  ;;  %v2926_v63 = vunpack.i.l.bf16 %v2925_v6  ;;  %v2927_v38 = vunpack.i.h.bf16 %v2925_v6 }
 0x363   :  { %v2909_v55 = vunpack.i.l.bf16 %v2908_v58  ;;  %v2910_v33 = vunpack.i.h.bf16 %v2908_v58  ;;  %v2943_v52 = vunpack.i.l.bf16 %v2942_v46  ;;  %v2944_v40 = vunpack.i.h.bf16 %v2942_v46 }
 0x364   :  { %v2894_v20 = vmax.f32 %v2892_v22, %v2893_v47  ;;  %v2928_v29 = vmax.f32 %v2926_v63, %v2927_v38  ;;  %v2166_v7 = vadd.f32 %v2165_v24, %v5618_v21  ;;  %v2359_v62 = vadd.f32 %v2358_v26, %v5620_v30 }
 0x365   :  { %v2911_v41 = vmax.f32 %v2909_v55, %v2910_v33  ;;  %v2945_v44 = vmax.f32 %v2943_v52, %v2944_v40  ;;  %v2168_v16 = vadd.f32 %v2167_v59, %v5624_v42  ;;  %v2361_v15 = vadd.f32 %v2360_v56, %v5626_v25 }
 0x366   :  { %v2171_v39 = vpop.f32.mrb[100].mxu1  ;;  %v2364_v57 = vpop.f32.mrb[132].mxu0  ;;  %v2895_v32 = vrot.slane %v2894_v20, 4  ;;  %v2929_v51 = vrot.slane %v2928_v29, 4  ;;  %v2573_v61 = vmax.f32 %v2166_v7, 0.0  ;;  %v2575_v28 = vmax.f32 %v2359_v62, 0.0 }
 0x367   :  { %v2173_v60 = vpop.f32.mrb[101].mxu1  ;;  %v2366_v19 = vpop.f32.mrb[133].mxu0  ;;  %v2912_v53 = vrot.slane %v2911_v41, 4  ;;  %v2946_v6 = vrot.slane %v2945_v44, 4  ;;  %v2574_v58 = vmax.f32 %v2168_v16, 0.0  ;;  %v2576_v24 = vmax.f32 %v2361_v15, 0.0 }
 0x368   :  { %v2175_v46 = vpop.f32.mrb[102].mxu1  ;;  %v2368_v26 = vpop.f32.mrb[134].mxu0  ;;  %v2896_v22 = vmax.f32 %v2894_v20, %v2895_v32  ;;  %v2930_v47 = vmax.f32 %v2928_v29, %v2929_v51  ;;  %v5740_v63 = vpack.c.bf16 %v2573_v61, %v2565_v17  ;;  %v5742_v59 = vpack.c.bf16 %v2575_v28, %v2567_v54 }
 0x369   :  { %v2177_v56 = vpop.f32.mrb[103].mxu1  ;;  %v2370_v38 = vpop.f32.mrb[135].mxu0  ;;  %v2913_v55 = vmax.f32 %v2911_v41, %v2912_v53  ;;  %v2947_v33 = vmax.f32 %v2945_v44, %v2946_v6  ;;  %v5744_v52 = vpack.c.bf16 %v2574_v58, %v2566_v43  ;;  %v5746_v40 = vpack.c.bf16 %v2576_v24, %v2568_v34 }
 0x36a   :  { %v2897_v7 = vrot.slane %v2896_v22, 2  ;;  %v2931_v62 = vrot.slane %v2930_v47, 2  ;;  %v2172_v16 = vadd.f32 %v2171_v39, %v5618_v21  ;;  %v2365_v15 = vadd.f32 %v2364_v57, %v5620_v30 }
 0x36b   :  { %v2914_v20 = vrot.slane %v2913_v55, 2  ;;  %v2948_v29 = vrot.slane %v2947_v33, 2  ;;  %v2174_v17 = vadd.f32 %v2173_v60, %v5624_v42  ;;  %v2367_v54 = vadd.f32 %v2366_v19, %v5626_v25 }
 0x36c   :  { %v2898_v32 = vmax.f32 %v2896_v22, %v2897_v7  ;;  %v2932_v51 = vmax.f32 %v2930_v47, %v2931_v62  ;;  %v2581_v41 = vmax.f32 %v2172_v16, 0.0  ;;  %v2583_v44 = vmax.f32 %v2365_v15, 0.0 }
 0x36d   :  { %v2915_v43 = vmax.f32 %v2913_v55, %v2914_v20  ;;  %v2949_v61 = vmax.f32 %v2947_v33, %v2948_v29  ;;  %v2582_v34 = vmax.f32 %v2174_v17, 0.0  ;;  %v2584_v28 = vmax.f32 %v2367_v54, 0.0 }
 0x36e   :  { %v2181_v53 = vpop.f32.mrb[104].mxu1  ;;  %v2374_v6 = vpop.f32.mrb[136].mxu0  ;;  %v2899_v58 = vrot.slane %v2898_v32, 1  ;;  %v2933_v39 = vrot.slane %v2932_v51, 1  ;;  %v2176_v57 = vadd.f32 %v2175_v46, %v5618_v21  ;;  %v2369_v24 = vadd.f32 %v2368_v26, %v5620_v30 }
 0x36f   :  { %v2183_v14 = vpop.f32.mrb[105].mxu1  ;;  %v2376_v60 = vpop.f32.mrb[137].mxu0  ;;  %v2916_v5 = vrot.slane %v2915_v43, 1  ;;  %v2950_v19 = vrot.slane %v2949_v61, 1  ;;  %v2178_v22 = vadd.f32 %v2177_v56, %v5624_v42  ;;  %v2371_v47 = vadd.f32 %v2370_v38, %v5626_v25 }
 0x370   :  { %v2185_v55 = vpop.f32.mrb[106].mxu1  ;;  %v2378_v33 = vpop.f32.mrb[138].mxu0  ;;  %v5756_v7 = vmax.f32 %v2898_v32, %v2899_v58  ;;  %v5758_v62 = vmax.f32 %v2932_v51, %v2933_v39  ;;  %v2589_v16 = vmax.f32 %v2176_v57, 0.0  ;;  %v2591_v15 = vmax.f32 %v2369_v24, 0.0 }
 0x371   :  { %v2187_v20 = vpop.f32.mrb[107].mxu1  ;;  %v2380_v46 = vpop.f32.mrb[139].mxu0  ;;  %v5760_v29 = vmax.f32 %v2915_v43, %v2916_v5  ;;  %v5762_v26 = vmax.f32 %v2949_v61, %v2950_v19  ;;  %v2590_v17 = vmax.f32 %v2178_v22, 0.0  ;;  %v2592_v54 = vmax.f32 %v2371_v47, 0.0 }
 0x372   :  { %v2765_v32 = vpack.c.bf16 %v2589_v16, %v2581_v41  ;;  %v2767_v58 = vpack.c.bf16 %v2591_v15, %v2583_v44  ;;  %v2182_v24 = vadd.f32 %v2181_v53, %v5618_v21  ;;  %v2375_v19 = vadd.f32 %v2374_v6, %v5620_v30 }
 0x373   :  { %v2766_v5 = vpack.c.bf16 %v2590_v17, %v2582_v34  ;;  %v2768_v43 = vpack.c.bf16 %v2592_v54, %v2584_v28  ;;  %v2184_v44 = vadd.f32 %v2183_v14, %v5624_v42  ;;  %v2377_v47 = vadd.f32 %v2376_v60, %v5626_v25 }
 0x374   :  { %v3021_v61 = vmax.bf16 %v2765_v32, %v5740_v63  ;;  %v3055_v57 = vmax.bf16 %v2767_v58, %v5742_v59  ;;  %v2186_v34 = vadd.f32 %v2185_v55, %v5618_v21  ;;  %v2379_v63 = vadd.f32 %v2378_v33, %v5620_v30 }
 0x375   :  { %v3038_v22 = vmax.bf16 %v2766_v5, %v5744_v52  ;;  %v3072_v41 = vmax.bf16 %v2768_v43, %v5746_v40  ;;  %v2188_v53 = vadd.f32 %v2187_v20, %v5624_v42  ;;  %v2381_v6 = vadd.f32 %v2380_v46, %v5626_v25 }
 0x376   :  { %v2191_v16 = vpop.f32.mrb[108].mxu1  ;;  %v2384_v15 = vpop.f32.mrb[140].mxu0  ;;  %v2597_v54 = vmax.f32 %v2182_v24, 0.0  ;;  %v2599_v40 = vmax.f32 %v2375_v19, 0.0  ;;  %v2605_v32 = vmax.f32 %v2186_v34, 0.0  ;;  %v2607_v14 = vmax.f32 %v2379_v63, 0.0 }
 0x377   :  { %v2193_v28 = vpop.f32.mrb[109].mxu1  ;;  %v2386_v59 = vpop.f32.mrb[141].mxu0  ;;  %v2598_v5 = vmax.f32 %v2184_v44, 0.0  ;;  %v2600_v43 = vmax.f32 %v2377_v47, 0.0  ;;  %v2606_v38 = vmax.f32 %v2188_v53, 0.0  ;;  %v2608_v55 = vmax.f32 %v2381_v6, 0.0 }
 0x378   :  { %v2195_v17 = vpop.f32.mrb[110].mxu1  ;;  %v2388_v52 = vpop.f32.mrb[142].mxu0  ;;  %v2773_v39 = vpack.c.bf16 %v2605_v32, %v2597_v54  ;;  %v2775_v33 = vpack.c.bf16 %v2607_v14, %v2599_v40  ;;  %v2192_v56 = vadd.f32 %v2191_v16, %v5618_v21  ;;  %v2385_v20 = vadd.f32 %v2384_v15, %v5620_v30 }
 0x379   :  { %v2197_v58 = vpop.f32.mrb[111].mxu1  ;;  %v2390_v60 = vpop.f32.mrb[143].mxu0  ;;  %v2774_v51 = vpack.c.bf16 %v2606_v38, %v2598_v5  ;;  %v2776_v46 = vpack.c.bf16 %v2608_v55, %v2600_v43  ;;  %v2194_v13 = vadd.f32 %v2193_v28, %v5624_v42  ;;  %v2387_v24 = vadd.f32 %v2386_v59, %v5626_v25 }
 0x37a   :  { %v5788_v19 = vmax.bf16 %v3021_v61, %v2773_v39  ;;  %v5790_v34 = vmax.bf16 %v3055_v57, %v2775_v33  ;;  %v2196_v44 = vadd.f32 %v2195_v17, %v5618_v21  ;;  %v2389_v47 = vadd.f32 %v2388_v52, %v5620_v30 }
 0x37b   :  { %v5794_v63 = vmax.bf16 %v3038_v22, %v2774_v51  ;;  %v5796_v53 = vmax.bf16 %v3072_v41, %v2776_v46  ;;  %v2198_v16 = vadd.f32 %v2197_v58, %v5624_v42  ;;  %v2391_v38 = vadd.f32 %v2390_v60, %v5626_v25 }
 0x37c   :  { %v2613_v6 = vmax.f32 %v2192_v56, 0.0  ;;  %v2615_v59 = vmax.f32 %v2385_v20, 0.0  ;;  %v2621_v39 = vmax.f32 %v2196_v44, 0.0  ;;  %v2623_v61 = vmax.f32 %v2389_v47, 0.0 }
 0x37d   :  { %v2614_v40 = vmax.f32 %v2194_v13, 0.0  ;;  %v2616_v17 = vmax.f32 %v2387_v24, 0.0  ;;  %v2622_v32 = vmax.f32 %v2198_v16, 0.0  ;;  %v2624_v52 = vmax.f32 %v2391_v38, 0.0 }
 0x37e   :  { %v2201_v15 = vpop.f32.mrb[112].mxu1  ;;  %v2394_v28 = vpop.f32.mrb[144].mxu0  ;;  %v2781_v41 = vpack.c.bf16 %v2621_v39, %v2613_v6  ;;  %v2783_v14 = vpack.c.bf16 %v2623_v61, %v2615_v59 }
 0x37f   :  { %v2203_v57 = vpop.f32.mrb[113].mxu1  ;;  %v2396_v54 = vpop.f32.mrb[145].mxu0  ;;  %v2202_v58 = vadd.f32 %v2201_v15, %v5618_v21  ;;  %v2395_v60 = vadd.f32 %v2394_v28, %v5620_v30  ;;  %v2782_v56 = vpack.c.bf16 %v2622_v32, %v2614_v40  ;;  %v2784_v55 = vpack.c.bf16 %v2624_v52, %v2616_v17 }
 0x380   :  { %v2205_v51 = vpop.f32.mrb[114].mxu1  ;;  %v2398_v22 = vpop.f32.mrb[146].mxu0  ;;  %v2204_v33 = vadd.f32 %v2203_v57, %v5624_v42  ;;  %v2397_v20 = vadd.f32 %v2396_v54, %v5626_v25  ;;  %v3023_v13 = vmax.bf16 %v5788_v19, %v2781_v41  ;;  %v3057_v46 = vmax.bf16 %v5790_v34, %v2783_v14 }
 0x381   :  { %v2207_v5 = vpop.f32.mrb[115].mxu1  ;;  %v2400_v43 = vpop.f32.mrb[147].mxu0  ;;  %v2206_v24 = vadd.f32 %v2205_v51, %v5618_v21  ;;  %v2399_v44 = vadd.f32 %v2398_v22, %v5620_v30  ;;  %v3040_v47 = vmax.bf16 %v5794_v63, %v2782_v56  ;;  %v3074_v16 = vmax.bf16 %v5796_v53, %v2784_v55 }
 0x382   :  { %v2208_v38 = vadd.f32 %v2207_v5, %v5624_v42  ;;  %v2401_v15 = vadd.f32 %v2400_v43, %v5626_v25  ;;  %v2629_v28 = vmax.f32 %v2202_v58, 0.0  ;;  %v2631_v6 = vmax.f32 %v2395_v60, 0.0 }
 0x383   :  { %v2637_v59 = vmax.f32 %v2206_v24, 0.0  ;;  %v2639_v39 = vmax.f32 %v2399_v44, 0.0  ;;  %v2630_v61 = vmax.f32 %v2204_v33, 0.0  ;;  %v2632_v19 = vmax.f32 %v2397_v20, 0.0 }
 0x384   :  { %v2638_v57 = vmax.f32 %v2208_v38, 0.0  ;;  %v2640_v34 = vmax.f32 %v2401_v15, 0.0 }
 0x385   :  { %v2789_v17 = vpack.c.bf16 %v2637_v59, %v2629_v28  ;;  %v2791_v32 = vpack.c.bf16 %v2639_v39, %v2631_v6 }
 0x386   :  { %v2211_v54 = vpop.f32.mrb[116].mxu1  ;;  %v2404_v40 = vpop.f32.mrb[148].mxu0  ;;  %v2790_v22 = vpack.c.bf16 %v2638_v57, %v2630_v61  ;;  %v2792_v41 = vpack.c.bf16 %v2640_v34, %v2632_v19 }
 0x387   :  { %v2212_v63 = vadd.f32 %v2211_v54, %v5618_v21  ;;  %v2405_v53 = vadd.f32 %v2404_v40, %v5620_v30  ;;  %v2213_v52 = vpop.f32.mrb[117].mxu1  ;;  %v2406_v51 = vpop.f32.mrb[149].mxu0  ;;  %v5816_v43 = vmax.bf16 %v3023_v13, %v2789_v17  ;;  %v5818_v56 = vmax.bf16 %v3057_v46, %v2791_v32 }
 0x388   :  { %v2214_v14 = vadd.f32 %v2213_v52, %v5624_v42  ;;  %v2407_v58 = vadd.f32 %v2406_v51, %v5626_v25  ;;  %v2215_v60 = vpop.f32.mrb[118].mxu1  ;;  %v2408_v5 = vpop.f32.mrb[150].mxu0  ;;  %v5820_v20 = vmax.bf16 %v3040_v47, %v2790_v22  ;;  %v5822_v24 = vmax.bf16 %v3074_v16, %v2792_v41 }
 0x389   :  { %v2217_v55 = vpop.f32.mrb[119].mxu1  ;;  %v2410_v33 = vpop.f32.mrb[151].mxu0  ;;  %v2216_v44 = vadd.f32 %v2215_v60, %v5618_v21  ;;  %v2409_v38 = vadd.f32 %v2408_v5, %v5620_v30  ;;  %v2645_v6 = vmax.f32 %v2212_v63, 0.0  ;;  %v2647_v59 = vmax.f32 %v2405_v53, 0.0 }
 0x38a   :  { %v2218_v15 = vadd.f32 %v2217_v55, %v5624_v42  ;;  %v2411_v28 = vadd.f32 %v2410_v33, %v5626_v25  ;;  %v2646_v13 = vmax.f32 %v2214_v14, 0.0  ;;  %v2648_v39 = vmax.f32 %v2407_v58, 0.0 }
 0x38b   :  { %v2653_v46 = vmax.f32 %v2216_v44, 0.0  ;;  %v2655_v61 = vmax.f32 %v2409_v38, 0.0 }
 0x38c   :  { %v2654_v19 = vmax.f32 %v2218_v15, 0.0  ;;  %v2656_v57 = vmax.f32 %v2411_v28, 0.0 }
 0x38d   :  { %v2797_v16 = vpack.c.bf16 %v2653_v46, %v2645_v6  ;;  %v2799_v54 = vpack.c.bf16 %v2655_v61, %v2647_v59 }
 0x38e   :  { %v2221_v47 = vpop.f32.mrb[120].mxu1  ;;  %v2414_v34 = vpop.f32.mrb[152].mxu0  ;;  %v2798_v40 = vpack.c.bf16 %v2654_v19, %v2646_v13  ;;  %v2800_v17 = vpack.c.bf16 %v2656_v57, %v2648_v39 }
 0x38f   :  { %v2223_v32 = vpop.f32.mrb[121].mxu1  ;;  %v2416_v52 = vpop.f32.mrb[153].mxu0  ;;  %v2222_v51 = vadd.f32 %v2221_v47, %v5618_v21  ;;  %v2415_v22 = vadd.f32 %v2414_v34, %v5620_v30  ;;  %v3025_v58 = vmax.bf16 %v5816_v43, %v2797_v16  ;;  %v3059_v60 = vmax.bf16 %v5818_v56, %v2799_v54 }
 0x390   :  { %v2224_v63 = vadd.f32 %v2223_v32, %v5624_v42  ;;  %v2417_v53 = vadd.f32 %v2416_v52, %v5626_v25  ;;  %v2225_v41 = vpop.f32.mrb[122].mxu1  ;;  %v2418_v14 = vpop.f32.mrb[154].mxu0  ;;  %v3042_v5 = vmax.bf16 %v5820_v20, %v2798_v40  ;;  %v3076_v55 = vmax.bf16 %v5822_v24, %v2800_v17 }
 0x391   :  { %v2227_v33 = vpop.f32.mrb[123].mxu1  ;;  %v2420_v44 = vpop.f32.mrb[155].mxu0  ;;  %v2226_v38 = vadd.f32 %v2225_v41, %v5618_v21  ;;  %v2419_v15 = vadd.f32 %v2418_v14, %v5620_v30  ;;  %v2661_v59 = vmax.f32 %v2222_v51, 0.0  ;;  %v2663_v13 = vmax.f32 %v2415_v22, 0.0 }
 0x392   :  { %v2228_v28 = vadd.f32 %v2227_v33, %v5624_v42  ;;  %v2421_v6 = vadd.f32 %v2420_v44, %v5626_v25  ;;  %v2662_v39 = vmax.f32 %v2224_v63, 0.0  ;;  %v2664_v43 = vmax.f32 %v2417_v53, 0.0 }
 0x393   :  { %v2669_v46 = vmax.f32 %v2226_v38, 0.0  ;;  %v2671_v56 = vmax.f32 %v2419_v15, 0.0 }
 0x394   :  { %v2670_v61 = vmax.f32 %v2228_v28, 0.0  ;;  %v2672_v20 = vmax.f32 %v2421_v6, 0.0 }
 0x395   :  { %v2805_v57 = vpack.c.bf16 %v2669_v46, %v2661_v59  ;;  %v2807_v47 = vpack.c.bf16 %v2671_v56, %v2663_v13 }
 0x396   :  { %v2231_v19 = vpop.f32.mrb[124].mxu1  ;;  %v2424_v24 = vpop.f32.mrb[156].mxu0  ;;  %v2806_v34 = vpack.c.bf16 %v2670_v61, %v2662_v39  ;;  %v2808_v16 = vpack.c.bf16 %v2672_v20, %v2664_v43 }
 0x397   :  { %v2233_v54 = vpop.f32.mrb[125].mxu1  ;;  %v2426_v40 = vpop.f32.mrb[157].mxu0  ;;  %v2232_v17 = vadd.f32 %v2231_v19, %v5618_v21  ;;  %v2425_v32 = vadd.f32 %v2424_v24, %v5620_v30  ;;  %v3026_v53 = vmax.bf16 %v3025_v58, %v2805_v57  ;;  %v3060_v41 = vmax.bf16 %v3059_v60, %v2807_v47 }
 0x398   :  { %v2234_v52 = vadd.f32 %v2233_v54, %v5624_v42  ;;  %v2427_v51 = vadd.f32 %v2426_v40, %v5626_v25  ;;  %v2235_v22 = vpop.f32.mrb[126].mxu1  ;;  %v2428_v63 = vpop.f32.mrb[158].mxu0  ;;  %v3043_v14 = vmax.bf16 %v3042_v5, %v2806_v34  ;;  %v3077_v33 = vmax.bf16 %v3076_v55, %v2808_v16 }
 0x399   :  { %v2237_v44 = vpop.f32.mrb[127].mxu1  ;;  %v2430_v38 = vpop.f32.mrb[159].mxu0  ;;  %v2236_v15 = vadd.f32 %v2235_v22, %v5618_v21  ;;  %v2429_v28 = vadd.f32 %v2428_v63, %v5620_v30  ;;  %v2677_v13 = vmax.f32 %v2232_v17, 0.0  ;;  %v2679_v39 = vmax.f32 %v2425_v32, 0.0 }
 0x39a   :  { %v2238_v6 = vadd.f32 %v2237_v44, %v5624_v42  ;;  %v2431_v59 = vadd.f32 %v2430_v38, %v5626_v25  ;;  %v2678_v43 = vmax.f32 %v2234_v52, 0.0  ;;  %v2680_v46 = vmax.f32 %v2427_v51, 0.0 }
 0x39b   :  { %v2685_v56 = vmax.f32 %v2236_v15, 0.0  ;;  %v2687_v61 = vmax.f32 %v2429_v28, 0.0 }
 0x39c   :  { %v2686_v58 = vmax.f32 %v2238_v6, 0.0  ;;  %v2688_v60 = vmax.f32 %v2431_v59, 0.0 }
 0x39d   :  { %v2813_v5 = vpack.c.bf16 %v2685_v56, %v2677_v13  ;;  %v2815_v55 = vpack.c.bf16 %v2687_v61, %v2679_v39 }
 0x39e   :  { %v2814_v20 = vpack.c.bf16 %v2686_v58, %v2678_v43  ;;  %v2816_v19 = vpack.c.bf16 %v2688_v60, %v2680_v46 }
 0x39f   :  { %v3027_v24 = vmax.bf16 %v3026_v53, %v2813_v5  ;;  %v3061_v21 = vmax.bf16 %v3060_v41, %v2815_v55 }
 0x3a0   :  { %v3044_v57 = vmax.bf16 %v3043_v14, %v2814_v20  ;;  %v3078_v30 = vmax.bf16 %v3077_v33, %v2816_v19 }
 0x3a1   :  { %v3028_v47 = vunpack.i.l.bf16 %v3027_v24  ;;  %v3029_v42 = vunpack.i.h.bf16 %v3027_v24  ;;  %v3062_v34 = vunpack.i.l.bf16 %v3061_v21  ;;  %v3063_v25 = vunpack.i.h.bf16 %v3061_v21 }
 0x3a2   :  { %v3045_v16 = vunpack.i.l.bf16 %v3044_v57  ;;  %v3046_v54 = vunpack.i.h.bf16 %v3044_v57  ;;  %v3079_v40 = vunpack.i.l.bf16 %v3078_v30  ;;  %v3080_v17 = vunpack.i.h.bf16 %v3078_v30 }
 0x3a3   :  { %v3030_v32 = vmax.f32 %v3028_v47, %v3029_v42  ;;  %v3064_v52 = vmax.f32 %v3062_v34, %v3063_v25 }
 0x3a4   :  { %v3047_v51 = vmax.f32 %v3045_v16, %v3046_v54  ;;  %v3081_v22 = vmax.f32 %v3079_v40, %v3080_v17 }
 0x3a5   :  { %v3031_v63 = vrot.slane %v3030_v32, 4  ;;  %v3065_v44 = vrot.slane %v3064_v52, 4 }
 0x3a6   :  { %v3048_v38 = vrot.slane %v3047_v51, 4  ;;  %v3082_v15 = vrot.slane %v3081_v22, 4 }
 0x3a7   :  { %v3032_v53 = vmax.f32 %v3030_v32, %v3031_v63  ;;  %v3066_v41 = vmax.f32 %v3064_v52, %v3065_v44 }
 0x3a8   :  { %v3049_v14 = vmax.f32 %v3047_v51, %v3048_v38  ;;  %v3083_v33 = vmax.f32 %v3081_v22, %v3082_v15 }
 0x3a9   :  { %v3033_v28 = vrot.slane %v3032_v53, 2  ;;  %v3067_v6 = vrot.slane %v3066_v41, 2 }
 0x3aa   :  { %v3050_v59 = vrot.slane %v3049_v14, 2  ;;  %v3084_v13 = vrot.slane %v3083_v33, 2 }
 0x3ab   :  { %v3034_v39 = vmax.f32 %v3032_v53, %v3033_v28  ;;  %v3068_v43 = vmax.f32 %v3066_v41, %v3067_v6 }
 0x3ac   :  { %v3051_v46 = vmax.f32 %v3049_v14, %v3050_v59  ;;  %v3085_v56 = vmax.f32 %v3083_v33, %v3084_v13 }
 0x3ad   :  { %v3035_v61 = vrot.slane %v3034_v39, 1  ;;  %v3069_v58 = vrot.slane %v3068_v43, 1 }
 0x3ae   :  { %v3052_v60 = vrot.slane %v3051_v46, 1  ;;  %v3086_v5 = vrot.slane %v3085_v56, 1 }
 0x3af   :  { %v5848_v55 = vmax.f32 %v3034_v39, %v3035_v61  ;;  %v5850_v20 = vmax.f32 %v3068_v43, %v3069_v58 }
 0x3b0   :  { %v5852_v19 = vmax.f32 %v3051_v46, %v3052_v60  ;;  %v5854_v24 = vmax.f32 %v3085_v56, %v3086_v5 }
 0x3b1   :  { %v3037_v21 = vpack.i.bf16 %v5848_v55, %v5848_v55  ;;  %v3071_v57 = vpack.i.bf16 %v5850_v20, %v5850_v20 }
 0x3b2   :  { %v3054_v30 = vpack.i.bf16 %v5852_v19, %v5852_v19  ;;  %v3088_v47 = vpack.i.bf16 %v5854_v24, %v5854_v24 }
 0x3b3   :  { %4707 = dma.done.wait [#allocation5], 32768 }
 0x3b4   :  { %4708 = vsyncadd [#allocation5], 4294934528  ;;  %v6000_v42 = vpack.i.bf16 %v5531_v48, %v5531_v48  ;;  %v6001_v25 = vpack.i.bf16 %v5654_v35, %v5654_v35  ;;  %vm3403_vm1 = vcmask 1041409   ;;  %v3094_v17 = vld [vmem:[#allocation2 + $0x8] sm:$0xff]  ;;  %v3096_v32 = vld [vmem:[#allocation2 + $0x18] sm:$0xff] }
 0x3b5   :  { %v3093_v52 = vld [vmem:[#allocation2] sm:$0xff]  ;;  %3428 = vmatprep.subr.bf16.mxu1 %v3094_v17  ;;  %3592 = vmatprep.subr.bf16.mxu0 %v3096_v32  ;;  %v3095_v51 = vld [vmem:[#allocation2 + $0x10] sm:$0xff]  ;;  %v3098_v22 = vld [vmem:[#allocation2 + $0x28] sm:$0xff] }
 0x3b6   :  { %v3388_v34 = vunpack.c.l.b16 %v6000_v42  ;;  %v3396_v16 = vunpack.c.l.b16 %v6001_v25  ;;  %v3100_v63 = vld [vmem:[#allocation2 + $0x38] sm:$0xff]  ;;  %3429 = vmatpush1.bf16.msra.mxu1 %v3093_v52  ;;  %3593 = vmatpush1.bf16.msra.mxu0 %v3095_v51  ;;  %v3097_v48 = vld [vmem:[#allocation2 + $0x20] sm:$0xff]  ;;  %v3099_v35 = vld [vmem:[#allocation2 + $0x30] sm:$0xff] }
 0x3b7   :  { %3430 = vmatprep.subr.bf16.mxu1 %v3098_v22  ;;  %3594 = vmatprep.subr.bf16.mxu0 %v3100_v63  ;;  %v3102_v44 = vld [vmem:[#allocation2 + $0x48] sm:$0xff]  ;;  %v3104_v38 = vld [vmem:[#allocation2 + $0x58] sm:$0xff]  ;;  %v3101_v15 = vld [vmem:[#allocation2 + $0x40] sm:$0xff] }
 0x3b8   :  { %v3405_v54 = vsel %vm3403_vm1, %v3396_v16, %v3388_v34  ;;  %v3103_v53 = vld [vmem:[#allocation2 + $0x50] sm:$0xff]  ;;  %v3106_v41 = vld [vmem:[#allocation2 + $0x68] sm:$0xff]  ;;  %v3108_v14 = vld [vmem:[#allocation2 + $0x78] sm:$0xff] }
 0x3b9   :  { %v3413_v40 = vpack.c.b16 %v3405_v54, %v3405_v54  ;;  %v3105_v33 = vld [vmem:[#allocation2 + $0x60] sm:$0xff]  ;;  %v3107_v28 = vld [vmem:[#allocation2 + $0x70] sm:$0xff]  ;;  %v3110_v6 = vld [vmem:[#allocation2 + $0x88] sm:$0xff] }
 0x3ba   :  { %3431 = vmatpush1.bf16.msra.mxu1 %v3097_v48  ;;  %3595 = vmatpush1.bf16.msra.mxu0 %v3099_v35  ;;  %v3112_v59 = vld [vmem:[#allocation2 + $0x98] sm:$0xff]  ;;  %v3109_v13 = vld [vmem:[#allocation2 + $0x80] sm:$0xff]  ;;  %v3111_v39 = vld [vmem:[#allocation2 + $0x90] sm:$0xff] }
 0x3bb   :  { %3460 = vmatprep.mubr.bf16.mxu1 %v3413_v40  ;;  %3624 = vmatprep.mubr.bf16.mxu0 %v3413_v40  ;;  %v3114_v43 = vld [vmem:[#allocation2 + $0xa8] sm:$0xff]  ;;  %v3116_v46 = vld [vmem:[#allocation2 + $0xb8] sm:$0xff]  ;;  %v3113_v56 = vld [vmem:[#allocation2 + $0xa0] sm:$0xff] }
 0x3bc   :  { %3432 = vmatprep.subr.bf16.mxu1 %v3102_v44  ;;  %3596 = vmatprep.subr.bf16.mxu0 %v3104_v38  ;;  %v3115_v61 = vld [vmem:[#allocation2 + $0xb0] sm:$0xff]  ;;  %v3118_v58 = vld [vmem:[#allocation2 + $0xc8] sm:$0xff]  ;;  %v3120_v60 = vld [vmem:[#allocation2 + $0xd8] sm:$0xff] }
 0x3bd   :  { %v3117_v5 = vld [vmem:[#allocation2 + $0xc0] sm:$0xff]  ;;  %v3119_v42 = vld [vmem:[#allocation2 + $0xd0] sm:$0xff]  ;;  %v3122_v34 = vld [vmem:[#allocation2 + $0xe8] sm:$0xff] }
 0x3be   :  { %3433 = vmatpush1.bf16.msra.mxu1 %v3101_v15  ;;  %3597 = vmatpush1.bf16.msra.mxu0 %v3103_v53  ;;  %v3124_v25 = vld [vmem:[#allocation2 + $0xf8] sm:$0xff]  ;;  %v3121_v16 = vld [vmem:[#allocation2 + $0xe0] sm:$0xff]  ;;  %v3123_v54 = vld [vmem:[#allocation2 + $0xf0] sm:$0xff] }
 0x3bf   :  { %3434 = vmatprep.subr.bf16.mxu1 %v3106_v41  ;;  %3598 = vmatprep.subr.bf16.mxu0 %v3108_v14  ;;  %v3126_v40 = vld [vmem:[#allocation2 + $0x108] sm:$0xff]  ;;  %v3128_v17 = vld [vmem:[#allocation2 + $0x118] sm:$0xff]  ;;  %v3125_v32 = vld [vmem:[#allocation2 + $0x100] sm:$0xff] }
 0x3c0   :  { %v3127_v52 = vld [vmem:[#allocation2 + $0x110] sm:$0xff]  ;;  %v3130_v51 = vld [vmem:[#allocation2 + $0x128] sm:$0xff]  ;;  %v3132_v22 = vld [vmem:[#allocation2 + $0x138] sm:$0xff] }
 0x3c1   :  { %v3129_v63 = vld [vmem:[#allocation2 + $0x120] sm:$0xff]  ;;  %v3131_v48 = vld [vmem:[#allocation2 + $0x130] sm:$0xff]  ;;  %v3134_v35 = vld [vmem:[#allocation2 + $0x148] sm:$0xff] }
 0x3c2   :  { %3435 = vmatpush1.bf16.msra.mxu1 %v3105_v33  ;;  %3599 = vmatpush1.bf16.msra.mxu0 %v3107_v28  ;;  %v3136_v44 = vld [vmem:[#allocation2 + $0x158] sm:$0xff]  ;;  %v3133_v38 = vld [vmem:[#allocation2 + $0x140] sm:$0xff]  ;;  %v3135_v15 = vld [vmem:[#allocation2 + $0x150] sm:$0xff] }
 0x3c3   :  { %3436 = vmatprep.subr.bf16.mxu1 %v3110_v6  ;;  %3600 = vmatprep.subr.bf16.mxu0 %v3112_v59  ;;  %v3138_v53 = vld [vmem:[#allocation2 + $0x168] sm:$0xff]  ;;  %v3140_v41 = vld [vmem:[#allocation2 + $0x178] sm:$0xff]  ;;  %v3137_v14 = vld [vmem:[#allocation2 + $0x160] sm:$0xff] }
 0x3c4   :  { %v3139_v33 = vld [vmem:[#allocation2 + $0x170] sm:$0xff]  ;;  %v3142_v28 = vld [vmem:[#allocation2 + $0x188] sm:$0xff]  ;;  %v3144_v6 = vld [vmem:[#allocation2 + $0x198] sm:$0xff] }
 0x3c5   :  { %v3141_v59 = vld [vmem:[#allocation2 + $0x180] sm:$0xff]  ;;  %v3223_v19 = vld [vmem:[#allocation2 + $0x410] sm:$0xff]  ;;  %v3349_v20 = vld [vmem:[%s5987_s4 + $0xa] sm:$0xf] }
 0x3c6   :  { %3437 = vmatpush1.bf16.msra.mxu1 %v3109_v13  ;;  %3601 = vmatpush1.bf16.msra.mxu0 %v3111_v39  ;;  %v3143_v13 = vld [vmem:[#allocation2 + $0x190] sm:$0xff]  ;;  %v3146_v39 = vld [vmem:[#allocation2 + $0x1a8] sm:$0xff]  ;;  %v3281_v55 = vld [vmem:[#allocation2 + $0x5e0] sm:$0xff] }
 0x3c7   :  { %3438 = vmatprep.subr.bf16.mxu1 %v3114_v43  ;;  %3602 = vmatprep.subr.bf16.mxu0 %v3116_v46  ;;  %v3148_v43 = vld [vmem:[#allocation2 + $0x1b8] sm:$0xff]  ;;  %v3145_v46 = vld [vmem:[#allocation2 + $0x1a0] sm:$0xff]  ;;  %v3287_v24 = vld [vmem:[#allocation2 + $0x610] sm:$0xff] }
 0x3ca   :  { %3439 = vmatpush1.bf16.msra.mxu1 %v3113_v56  ;;  %3603 = vmatpush1.bf16.msra.mxu0 %v3115_v61  ;;  %v3147_v56 = vld [vmem:[#allocation2 + $0x1b0] sm:$0xff]  ;;  %v3150_v61 = vld [vmem:[#allocation2 + $0x1c8] sm:$0xff] }
 0x3cb   :  { %3440 = vmatprep.subr.bf16.mxu1 %v3118_v58  ;;  %3604 = vmatprep.subr.bf16.mxu0 %v3120_v60  ;;  %v3152_v58 = vld [vmem:[#allocation2 + $0x1d8] sm:$0xff]  ;;  %v6002_v60 = vpack.i.bf16 %v5525_v31, %v5525_v31 }
 0x3ce   :  { %3441 = vmatpush1.bf16.msra.mxu1 %v3117_v5  ;;  %3605 = vmatpush1.bf16.msra.mxu0 %v3119_v42  ;;  %v3387_v5 = vunpack.c.l.b16 %v6002_v60  ;;  %v6003_v42 = vpack.i.bf16 %v5648_v27, %v5648_v27  ;;  %v3153_v27 = vld [vmem:[#allocation2 + $0x1e0] sm:$0xff]  ;;  %v3175_v60 = vld [vmem:[#allocation2 + $0x290] sm:$0xff] }
 0x3cf   :  { %3442 = vmatprep.subr.bf16.mxu1 %v3122_v34  ;;  %3606 = vmatprep.subr.bf16.mxu0 %v3124_v25  ;;  %v3149_v25 = vld [vmem:[#allocation2 + $0x1c0] sm:$0xff] }
 0x3d0   :  { %v3395_v34 = vunpack.c.l.b16 %v6003_v42  ;;  %v3180_v42 = vld [vmem:[#allocation2 + $0x2b8] sm:$0xff] }
 0x3d2   :  { %3443 = vmatpush1.bf16.msra.mxu1 %v3121_v16  ;;  %3607 = vmatpush1.bf16.msra.mxu0 %v3123_v54  ;;  %v3151_v16 = vld [vmem:[#allocation2 + $0x1d0] sm:$0xff]  ;;  %v3154_v54 = vld [vmem:[#allocation2 + $0x1e8] sm:$0xff]  ;;  %v3404_v31 = vsel %vm3403_vm1, %v3395_v34, %v3387_v5  ;;  %v3177_v34 = vld [vmem:[#allocation2 + $0x2a0] sm:$0xff] }
 0x3d3   :  { %3444 = vmatprep.subr.bf16.mxu1 %v3126_v40  ;;  %3608 = vmatprep.subr.bf16.mxu0 %v3128_v17  ;;  %v3156_v40 = vld [vmem:[#allocation2 + $0x1f8] sm:$0xff]  ;;  %v6004_v17 = vpack.i.bf16 %v5533_v23, %v5533_v23  ;;  %v3157_v23 = vld [vmem:[#allocation2 + $0x200] sm:$0xff]  ;;  %v3178_v5 = vld [vmem:[#allocation2 + $0x2a8] sm:$0xff] }
 0x3d6   :  { %3445 = vmatpush1.bf16.msra.mxu1 %v3125_v32  ;;  %3609 = vmatpush1.bf16.msra.mxu0 %v3127_v52  ;;  %v3390_v32 = vunpack.c.l.b16 %v6004_v17  ;;  %v6005_v52 = vpack.i.bf16 %v5656_v37, %v5656_v37  ;;  %v3159_v37 = vld [vmem:[#allocation2 + $0x210] sm:$0xff] }
 0x3d7   :  { %3446 = vmatprep.subr.bf16.mxu1 %v3130_v51  ;;  %3610 = vmatprep.subr.bf16.mxu0 %v3132_v22  ;;  %v3155_v22 = vld [vmem:[#allocation2 + $0x1f0] sm:$0xff] }
 0x3d8   :  { %v3398_v51 = vunpack.c.l.b16 %v6005_v52  ;;  %v3183_v17 = vld [vmem:[#allocation2 + $0x2d0] sm:$0xff]  ;;  %v3188_v52 = vld [vmem:[#allocation2 + $0x2f8] sm:$0xff] }
 0x3da   :  { %3447 = vmatpush1.bf16.msra.mxu1 %v3129_v63  ;;  %3611 = vmatpush1.bf16.msra.mxu0 %v3131_v48  ;;  %v3158_v63 = vld [vmem:[#allocation2 + $0x208] sm:$0xff]  ;;  %v3160_v48 = vld [vmem:[#allocation2 + $0x218] sm:$0xff] }
 0x3db   :  { %3448 = vmatprep.subr.bf16.mxu1 %v3134_v35  ;;  %3612 = vmatprep.subr.bf16.mxu0 %v3136_v44  ;;  %v3412_v35 = vpack.c.b16 %v3404_v31, %v3404_v31  ;;  %v3407_v44 = vsel %vm3403_vm1, %v3398_v51, %v3390_v32  ;;  %v3186_v32 = vld [vmem:[#allocation2 + $0x2e8] sm:$0xff]  ;;  %v3185_v51 = vld [vmem:[#allocation2 + $0x2e0] sm:$0xff]  ;;  %v3187_v31 = vld [vmem:[#allocation2 + $0x2f0] sm:$0xff] }
 0x3de   :  { %3449 = vmatpush1.bf16.msra.mxu1 %v3133_v38  ;;  %3613 = vmatpush1.bf16.msra.mxu0 %v3135_v15  ;;  %v3162_v38 = vld [vmem:[#allocation2 + $0x228] sm:$0xff]  ;;  %v3164_v15 = vld [vmem:[#allocation2 + $0x238] sm:$0xff] }
 0x3df   :  { %3450 = vmatprep.subr.bf16.mxu1 %v3138_v53  ;;  %3614 = vmatprep.subr.bf16.mxu0 %v3140_v41  ;;  %v3415_v53 = vpack.c.b16 %v3407_v44, %v3407_v44  ;;  %v3161_v41 = vld [vmem:[#allocation2 + $0x220] sm:$0xff]  ;;  %v3196_v44 = vld [vmem:[#allocation2 + $0x338] sm:$0xff] }
 0x3e2   :  { %3451 = vmatpush1.bf16.msra.mxu1 %v3137_v14  ;;  %3615 = vmatpush1.bf16.msra.mxu0 %v3139_v33  ;;  %v3163_v14 = vld [vmem:[#allocation2 + $0x230] sm:$0xff]  ;;  %v3166_v33 = vld [vmem:[#allocation2 + $0x248] sm:$0xff] }
 0x3e3   :  { %3452 = vmatprep.subr.bf16.mxu1 %v3142_v28  ;;  %3616 = vmatprep.subr.bf16.mxu0 %v3144_v6  ;;  %v3168_v28 = vld [vmem:[#allocation2 + $0x258] sm:$0xff]  ;;  %v3165_v6 = vld [vmem:[#allocation2 + $0x240] sm:$0xff] }
 0x3e6   :  { %3453 = vmatpush1.bf16.msra.mxu1 %v3141_v59  ;;  %3617 = vmatpush1.bf16.msra.mxu0 %v3143_v13  ;;  %v3167_v59 = vld [vmem:[#allocation2 + $0x250] sm:$0xff]  ;;  %v3170_v13 = vld [vmem:[#allocation2 + $0x268] sm:$0xff] }
 0x3e7   :  { %3454 = vmatprep.subr.bf16.mxu1 %v3146_v39  ;;  %3618 = vmatprep.subr.bf16.mxu0 %v3148_v43  ;;  %v3172_v39 = vld [vmem:[#allocation2 + $0x278] sm:$0xff]  ;;  %v3169_v43 = vld [vmem:[#allocation2 + $0x260] sm:$0xff] }
 0x3ea   :  { %3455 = vmatpush1.bf16.msra.mxu1 %v3145_v46  ;;  %3619 = vmatpush1.bf16.msra.mxu0 %v3147_v56  ;;  %v3171_v46 = vld [vmem:[#allocation2 + $0x270] sm:$0xff]  ;;  %v3174_v56 = vld [vmem:[#allocation2 + $0x288] sm:$0xff] }
 0x3eb   :  { %3456 = vmatprep.subr.bf16.mxu1 %v3150_v61  ;;  %3620 = vmatprep.subr.bf16.mxu0 %v3152_v58  ;;  %v3176_v61 = vld [vmem:[#allocation2 + $0x298] sm:$0xff]  ;;  %v3173_v58 = vld [vmem:[#allocation2 + $0x280] sm:$0xff] }
 0x3ee   :  { %3457 = vmatpush1.bf16.msra.mxu1 %v3149_v25  ;;  %3621 = vmatpush1.bf16.msra.mxu0 %v3151_v16  ;;  %v3179_v25 = vld [vmem:[#allocation2 + $0x2b0] sm:$0xff]  ;;  %v3182_v16 = vld [vmem:[#allocation2 + $0x2c8] sm:$0xff] }
 0x3ef   :  { %3458 = vmatprep.subr.bf16.mxu1 %v3154_v54  ;;  %3622 = vmatprep.subr.bf16.mxu0 %v3156_v40  ;;  %v3184_v54 = vld [vmem:[#allocation2 + $0x2d8] sm:$0xff]  ;;  %v3181_v40 = vld [vmem:[#allocation2 + $0x2c0] sm:$0xff] }
 0x3f2   :  { %3459 = vmatpush1.bf16.msra.mxu1 %v3153_v27  ;;  %3623 = vmatpush1.bf16.msra.mxu0 %v3155_v22  ;;  %v3190_v27 = vld [vmem:[#allocation2 + $0x308] sm:$0xff]  ;;  %v3192_v22 = vld [vmem:[#allocation2 + $0x318] sm:$0xff] }
 0x3f3   :  { %3469 = vmatprep.subr.bf16.mxu1 %v3158_v63  ;;  %3633 = vmatprep.subr.bf16.mxu0 %v3160_v48  ;;  %v3189_v63 = vld [vmem:[#allocation2 + $0x300] sm:$0xff]  ;;  %v3191_v48 = vld [vmem:[#allocation2 + $0x310] sm:$0xff] }
 0x3f5   :  { %3461 = vmatmul.mubr.bf16.vlgmr.msra.gmra.mrb[128].mxu1 %v3412_v35  ;;  %3625 = vmatmul.mubr.bf16.vlgmr.msra.gmra.mrb[160].mxu0 %v3412_v35  ;;  %v3194_v35 = vld [vmem:[#allocation2 + $0x328] sm:$0xff] }
 0x3f6   :  { %3470 = vmatpush1.bf16.msra.mxu1 %v3157_v23  ;;  %3634 = vmatpush1.bf16.msra.mxu0 %v3159_v37  ;;  %v3193_v23 = vld [vmem:[#allocation2 + $0x320] sm:$0xff]  ;;  %v3195_v37 = vld [vmem:[#allocation2 + $0x330] sm:$0xff] }
 0x3f7   :  { %3471 = vmatprep.subr.bf16.mxu1 %v3162_v38  ;;  %3635 = vmatprep.subr.bf16.mxu0 %v3164_v15  ;;  %v3198_v38 = vld [vmem:[#allocation2 + $0x348] sm:$0xff]  ;;  %v3200_v15 = vld [vmem:[#allocation2 + $0x358] sm:$0xff] }
 0x3f8   :  { %3501 = vmatprep.mubr.bf16.mxu1 %v3415_v53  ;;  %3665 = vmatprep.mubr.bf16.mxu0 %v3415_v53  ;;  %v3197_v53 = vld [vmem:[#allocation2 + $0x340] sm:$0xff] }
 0x3fa   :  { %3472 = vmatpush1.bf16.msra.mxu1 %v3161_v41  ;;  %3636 = vmatpush1.bf16.msra.mxu0 %v3163_v14  ;;  %v3199_v41 = vld [vmem:[#allocation2 + $0x350] sm:$0xff]  ;;  %v3202_v14 = vld [vmem:[#allocation2 + $0x368] sm:$0xff] }
 0x3fb   :  { %3473 = vmatprep.subr.bf16.mxu1 %v3166_v33  ;;  %3637 = vmatprep.subr.bf16.mxu0 %v3168_v28  ;;  %v3204_v33 = vld [vmem:[#allocation2 + $0x378] sm:$0xff]  ;;  %v3201_v28 = vld [vmem:[#allocation2 + $0x360] sm:$0xff] }
 0x3fe   :  { %3474 = vmatpush1.bf16.msra.mxu1 %v3165_v6  ;;  %3638 = vmatpush1.bf16.msra.mxu0 %v3167_v59  ;;  %v3203_v6 = vld [vmem:[#allocation2 + $0x370] sm:$0xff]  ;;  %v3206_v59 = vld [vmem:[#allocation2 + $0x388] sm:$0xff] }
 0x3ff   :  { %3475 = vmatprep.subr.bf16.mxu1 %v3170_v13  ;;  %3639 = vmatprep.subr.bf16.mxu0 %v3172_v39  ;;  %v3208_v13 = vld [vmem:[#allocation2 + $0x398] sm:$0xff]  ;;  %v3205_v39 = vld [vmem:[#allocation2 + $0x380] sm:$0xff] }
 0x402   :  { %3476 = vmatpush1.bf16.msra.mxu1 %v3169_v43  ;;  %3640 = vmatpush1.bf16.msra.mxu0 %v3171_v46  ;;  %v3207_v43 = vld [vmem:[#allocation2 + $0x390] sm:$0xff]  ;;  %v3210_v46 = vld [vmem:[#allocation2 + $0x3a8] sm:$0xff] }
 0x403   :  { %3477 = vmatprep.subr.bf16.mxu1 %v3174_v56  ;;  %3641 = vmatprep.subr.bf16.mxu0 %v3176_v61  ;;  %v3212_v56 = vld [vmem:[#allocation2 + $0x3b8] sm:$0xff]  ;;  %v3209_v61 = vld [vmem:[#allocation2 + $0x3a0] sm:$0xff] }
 0x406   :  { %3478 = vmatpush1.bf16.msra.mxu1 %v3173_v58  ;;  %3642 = vmatpush1.bf16.msra.mxu0 %v3175_v60  ;;  %v3211_v58 = vld [vmem:[#allocation2 + $0x3b0] sm:$0xff]  ;;  %v3214_v60 = vld [vmem:[#allocation2 + $0x3c8] sm:$0xff] }
 0x407   :  { %3479 = vmatprep.subr.bf16.mxu1 %v3178_v5  ;;  %3643 = vmatprep.subr.bf16.mxu0 %v3180_v42  ;;  %v3216_v5 = vld [vmem:[#allocation2 + $0x3d8] sm:$0xff]  ;;  %v6006_v42 = vpack.i.bf16 %v5527_v18, %v5527_v18 }
 0x40a   :  { %3480 = vmatpush1.bf16.msra.mxu1 %v3177_v34  ;;  %3644 = vmatpush1.bf16.msra.mxu0 %v3179_v25  ;;  %v3389_v34 = vunpack.c.l.b16 %v6006_v42  ;;  %v6007_v25 = vpack.i.bf16 %v5650_v45, %v5650_v45  ;;  %v3217_v45 = vld [vmem:[#allocation2 + $0x3e0] sm:$0xff]  ;;  %v3248_v42 = vld [vmem:[#allocation2 + $0x4d8] sm:$0xff] }
 0x40b   :  { %3481 = vmatprep.subr.bf16.mxu1 %v3182_v16  ;;  %3645 = vmatprep.subr.bf16.mxu0 %v3184_v54  ;;  %v3213_v54 = vld [vmem:[#allocation2 + $0x3c0] sm:$0xff] }
 0x40c   :  { %v3397_v16 = vunpack.c.l.b16 %v6007_v25  ;;  %v3247_v25 = vld [vmem:[#allocation2 + $0x4d0] sm:$0xff] }
 0x40e   :  { %3482 = vmatpush1.bf16.msra.mxu1 %v3181_v40  ;;  %3646 = vmatpush1.bf16.msra.mxu0 %v3183_v17  ;;  %v3215_v40 = vld [vmem:[#allocation2 + $0x3d0] sm:$0xff]  ;;  %v3218_v17 = vld [vmem:[#allocation2 + $0x3e8] sm:$0xff]  ;;  %v3406_v18 = vsel %vm3403_vm1, %v3397_v16, %v3389_v34  ;;  %v3245_v34 = vld [vmem:[#allocation2 + $0x4c0] sm:$0xff] }
 0x40f   :  { %3483 = vmatprep.subr.bf16.mxu1 %v3186_v32  ;;  %3647 = vmatprep.subr.bf16.mxu0 %v3188_v52  ;;  %v3220_v32 = vld [vmem:[#allocation2 + $0x3f8] sm:$0xff]  ;;  %v6008_v52 = vpack.i.bf16 %v5760_v29, %v5760_v29  ;;  %v3221_v29 = vld [vmem:[#allocation2 + $0x400] sm:$0xff]  ;;  %v3250_v16 = vld [vmem:[#allocation2 + $0x4e8] sm:$0xff] }
 0x412   :  { %3484 = vmatpush1.bf16.msra.mxu1 %v3185_v51  ;;  %3648 = vmatpush1.bf16.msra.mxu0 %v3187_v31  ;;  %v3392_v51 = vunpack.c.l.b16 %v6008_v52  ;;  %v3400_v31 = vunpack.c.l.b16 %v3054_v30  ;;  %v3226_v30 = vld [vmem:[#allocation2 + $0x428] sm:$0xff]  ;;  %v3256_v52 = vld [vmem:[#allocation2 + $0x518] sm:$0xff] }
 0x413   :  { %3485 = vmatprep.subr.bf16.mxu1 %v3190_v27  ;;  %3649 = vmatprep.subr.bf16.mxu0 %v3192_v22  ;;  %v3219_v27 = vld [vmem:[#allocation2 + $0x3f0] sm:$0xff]  ;;  %v3222_v22 = vld [vmem:[#allocation2 + $0x408] sm:$0xff] }
 0x416   :  { %3486 = vmatpush1.bf16.msra.mxu1 %v3189_v63  ;;  %3650 = vmatpush1.bf16.msra.mxu0 %v3191_v48  ;;  %v3224_v63 = vld [vmem:[#allocation2 + $0x418] sm:$0xff]  ;;  %v3414_v48 = vpack.c.b16 %v3406_v18, %v3406_v18  ;;  %v3258_v18 = vld [vmem:[#allocation2 + $0x528] sm:$0xff] }
 0x417   :  { %3487 = vmatprep.subr.bf16.mxu1 %v3194_v35  ;;  %3651 = vmatprep.subr.bf16.mxu0 %v3196_v44  ;;  %v3409_v35 = vsel %vm3403_vm1, %v3400_v31, %v3392_v51  ;;  %v3228_v44 = vld [vmem:[#allocation2 + $0x438] sm:$0xff]  ;;  %v3253_v51 = vld [vmem:[#allocation2 + $0x500] sm:$0xff]  ;;  %v3255_v31 = vld [vmem:[#allocation2 + $0x510] sm:$0xff] }
 0x41a   :  { %3488 = vmatpush1.bf16.msra.mxu1 %v3193_v23  ;;  %3652 = vmatpush1.bf16.msra.mxu0 %v3195_v37  ;;  %v3417_v23 = vpack.c.b16 %v3409_v35, %v3409_v35  ;;  %v3225_v37 = vld [vmem:[#allocation2 + $0x420] sm:$0xff] }
 0x41b   :  { %3489 = vmatprep.subr.bf16.mxu1 %v3198_v38  ;;  %3653 = vmatprep.subr.bf16.mxu0 %v3200_v15  ;;  %v3227_v38 = vld [vmem:[#allocation2 + $0x430] sm:$0xff]  ;;  %v3230_v15 = vld [vmem:[#allocation2 + $0x448] sm:$0xff]  ;;  %v3261_v35 = vld [vmem:[#allocation2 + $0x540] sm:$0xff] }
 0x41e   :  { %3490 = vmatpush1.bf16.msra.mxu1 %v3197_v53  ;;  %3654 = vmatpush1.bf16.msra.mxu0 %v3199_v41  ;;  %v3232_v53 = vld [vmem:[#allocation2 + $0x458] sm:$0xff]  ;;  %v3229_v41 = vld [vmem:[#allocation2 + $0x440] sm:$0xff] }
 0x41f   :  { %3491 = vmatprep.subr.bf16.mxu1 %v3202_v14  ;;  %3655 = vmatprep.subr.bf16.mxu0 %v3204_v33  ;;  %v3231_v14 = vld [vmem:[#allocation2 + $0x450] sm:$0xff]  ;;  %v3234_v33 = vld [vmem:[#allocation2 + $0x468] sm:$0xff] }
 0x422   :  { %3492 = vmatpush1.bf16.msra.mxu1 %v3201_v28  ;;  %3656 = vmatpush1.bf16.msra.mxu0 %v3203_v6  ;;  %v3236_v28 = vld [vmem:[#allocation2 + $0x478] sm:$0xff]  ;;  %v3233_v6 = vld [vmem:[#allocation2 + $0x460] sm:$0xff] }
 0x423   :  { %3493 = vmatprep.subr.bf16.mxu1 %v3206_v59  ;;  %3657 = vmatprep.subr.bf16.mxu0 %v3208_v13  ;;  %v3235_v59 = vld [vmem:[#allocation2 + $0x470] sm:$0xff]  ;;  %v3238_v13 = vld [vmem:[#allocation2 + $0x488] sm:$0xff] }
 0x426   :  { %3494 = vmatpush1.bf16.msra.mxu1 %v3205_v39  ;;  %3658 = vmatpush1.bf16.msra.mxu0 %v3207_v43  ;;  %v3240_v39 = vld [vmem:[#allocation2 + $0x498] sm:$0xff]  ;;  %v3237_v43 = vld [vmem:[#allocation2 + $0x480] sm:$0xff] }
 0x427   :  { %3495 = vmatprep.subr.bf16.mxu1 %v3210_v46  ;;  %3659 = vmatprep.subr.bf16.mxu0 %v3212_v56  ;;  %v3239_v46 = vld [vmem:[#allocation2 + $0x490] sm:$0xff]  ;;  %v3242_v56 = vld [vmem:[#allocation2 + $0x4a8] sm:$0xff] }
 0x42a   :  { %3496 = vmatpush1.bf16.msra.mxu1 %v3209_v61  ;;  %3660 = vmatpush1.bf16.msra.mxu0 %v3211_v58  ;;  %v3244_v61 = vld [vmem:[#allocation2 + $0x4b8] sm:$0xff]  ;;  %v3241_v58 = vld [vmem:[#allocation2 + $0x4a0] sm:$0xff] }
 0x42b   :  { %3497 = vmatprep.subr.bf16.mxu1 %v3214_v60  ;;  %3661 = vmatprep.subr.bf16.mxu0 %v3216_v5  ;;  %v3243_v60 = vld [vmem:[#allocation2 + $0x4b0] sm:$0xff]  ;;  %v3246_v5 = vld [vmem:[#allocation2 + $0x4c8] sm:$0xff] }
 0x42e   :  { %3498 = vmatpush1.bf16.msra.mxu1 %v3213_v54  ;;  %3662 = vmatpush1.bf16.msra.mxu0 %v3215_v40  ;;  %v3252_v54 = vld [vmem:[#allocation2 + $0x4f8] sm:$0xff]  ;;  %v3249_v40 = vld [vmem:[#allocation2 + $0x4e0] sm:$0xff] }
 0x42f   :  { %3499 = vmatprep.subr.bf16.mxu1 %v3218_v17  ;;  %3663 = vmatprep.subr.bf16.mxu0 %v3220_v32  ;;  %v3251_v17 = vld [vmem:[#allocation2 + $0x4f0] sm:$0xff]  ;;  %v3254_v32 = vld [vmem:[#allocation2 + $0x508] sm:$0xff] }
 0x432   :  { %3500 = vmatpush1.bf16.msra.mxu1 %v3217_v45  ;;  %3664 = vmatpush1.bf16.msra.mxu0 %v3219_v27  ;;  %v3260_v45 = vld [vmem:[#allocation2 + $0x538] sm:$0xff]  ;;  %v3257_v27 = vld [vmem:[#allocation2 + $0x520] sm:$0xff] }
 0x433   :  { %3510 = vmatprep.subr.bf16.mxu1 %v3222_v22  ;;  %3674 = vmatprep.subr.bf16.mxu0 %v3224_v63  ;;  %v3259_v22 = vld [vmem:[#allocation2 + $0x530] sm:$0xff]  ;;  %v3262_v63 = vld [vmem:[#allocation2 + $0x548] sm:$0xff] }
 0x435   :  { %3502 = vmatmul.mubr.bf16.vlgmr.msra.gmra.mrb[128].mxu1 %v3414_v48  ;;  %3666 = vmatmul.mubr.bf16.vlgmr.msra.gmra.mrb[160].mxu0 %v3414_v48  ;;  %v3264_v48 = vld [vmem:[#allocation2 + $0x558] sm:$0xff] }
 0x436   :  { %3511 = vmatpush1.bf16.msra.mxu1 %v3221_v29  ;;  %3675 = vmatpush1.bf16.msra.mxu0 %v3223_v19  ;;  %v3263_v29 = vld [vmem:[#allocation2 + $0x550] sm:$0xff]  ;;  %v3266_v19 = vld [vmem:[#allocation2 + $0x568] sm:$0xff] }
 0x437   :  { %3512 = vmatprep.subr.bf16.mxu1 %v3226_v30  ;;  %3676 = vmatprep.subr.bf16.mxu0 %v3228_v44  ;;  %v3268_v30 = vld [vmem:[#allocation2 + $0x578] sm:$0xff]  ;;  %v3265_v44 = vld [vmem:[#allocation2 + $0x560] sm:$0xff] }
 0x438   :  { %3542 = vmatprep.mubr.bf16.mxu1 %v3417_v23  ;;  %3706 = vmatprep.mubr.bf16.mxu0 %v3417_v23  ;;  %v3267_v23 = vld [vmem:[#allocation2 + $0x570] sm:$0xff] }
 0x43a   :  { %3513 = vmatpush1.bf16.msra.mxu1 %v3225_v37  ;;  %3677 = vmatpush1.bf16.msra.mxu0 %v3227_v38  ;;  %v3270_v37 = vld [vmem:[#allocation2 + $0x588] sm:$0xff]  ;;  %v3272_v38 = vld [vmem:[#allocation2 + $0x598] sm:$0xff] }
 0x43b   :  { %3514 = vmatprep.subr.bf16.mxu1 %v3230_v15  ;;  %3678 = vmatprep.subr.bf16.mxu0 %v3232_v53  ;;  %v3269_v15 = vld [vmem:[#allocation2 + $0x580] sm:$0xff]  ;;  %v3271_v53 = vld [vmem:[#allocation2 + $0x590] sm:$0xff] }
 0x43e   :  { %3515 = vmatpush1.bf16.msra.mxu1 %v3229_v41  ;;  %3679 = vmatpush1.bf16.msra.mxu0 %v3231_v14  ;;  %v3274_v41 = vld [vmem:[#allocation2 + $0x5a8] sm:$0xff]  ;;  %v3276_v14 = vld [vmem:[#allocation2 + $0x5b8] sm:$0xff] }
 0x43f   :  { %3516 = vmatprep.subr.bf16.mxu1 %v3234_v33  ;;  %3680 = vmatprep.subr.bf16.mxu0 %v3236_v28  ;;  %v3273_v33 = vld [vmem:[#allocation2 + $0x5a0] sm:$0xff]  ;;  %v3275_v28 = vld [vmem:[#allocation2 + $0x5b0] sm:$0xff] }
 0x442   :  { %3517 = vmatpush1.bf16.msra.mxu1 %v3233_v6  ;;  %3681 = vmatpush1.bf16.msra.mxu0 %v3235_v59  ;;  %v3278_v6 = vld [vmem:[#allocation2 + $0x5c8] sm:$0xff]  ;;  %v3280_v59 = vld [vmem:[#allocation2 + $0x5d8] sm:$0xff] }
 0x443   :  { %3518 = vmatprep.subr.bf16.mxu1 %v3238_v13  ;;  %3682 = vmatprep.subr.bf16.mxu0 %v3240_v39  ;;  %v6009_v13 = vpack.i.bf16 %v5756_v7, %v5756_v7 }
 0x445   :  { %v3391_v39 = vunpack.c.l.b16 %v6009_v13  ;;  %v3318_v13 = vld [vmem:[#allocation2 + $0x708] sm:$0xff] }
 0x446   :  { %3519 = vmatpush1.bf16.msra.mxu1 %v3237_v43  ;;  %3683 = vmatpush1.bf16.msra.mxu0 %v3239_v46  ;;  %v3399_v43 = vunpack.c.l.b16 %v3037_v21  ;;  %v3277_v46 = vld [vmem:[#allocation2 + $0x5c0] sm:$0xff]  ;;  %v3283_v21 = vld [vmem:[#allocation2 + $0x5f0] sm:$0xff] }
 0x447   :  { %3520 = vmatprep.subr.bf16.mxu1 %v3242_v56  ;;  %3684 = vmatprep.subr.bf16.mxu0 %v3244_v61  ;;  %v3279_v56 = vld [vmem:[#allocation2 + $0x5d0] sm:$0xff]  ;;  %v3282_v61 = vld [vmem:[#allocation2 + $0x5e8] sm:$0xff] }
 0x448   :  { %v3408_v7 = vsel %vm3403_vm1, %v3399_v43, %v3391_v39  ;;  %v3320_v39 = vld [vmem:[#allocation2 + $0x718] sm:$0xff]  ;;  %v3317_v43 = vld [vmem:[#allocation2 + $0x700] sm:$0xff] }
 0x44a   :  { %3521 = vmatpush1.bf16.msra.mxu1 %v3241_v58  ;;  %3685 = vmatpush1.bf16.msra.mxu0 %v3243_v60  ;;  %v3284_v58 = vld [vmem:[#allocation2 + $0x5f8] sm:$0xff]  ;;  %v6010_v60 = vpack.i.bf16 %v5762_v26, %v5762_v26  ;;  %v3285_v26 = vld [vmem:[#allocation2 + $0x600] sm:$0xff] }
 0x44b   :  { %3522 = vmatprep.subr.bf16.mxu1 %v3246_v5  ;;  %3686 = vmatprep.subr.bf16.mxu0 %v3248_v42  ;;  %v3402_v42 = vunpack.c.l.b16 %v3088_v47  ;;  %v3290_v47 = vld [vmem:[#allocation2 + $0x628] sm:$0xff] }
 0x44c   :  { %v3394_v5 = vunpack.c.l.b16 %v6010_v60  ;;  %v3323_v60 = vld [vmem:[#allocation2 + $0x730] sm:$0xff] }
 0x44e   :  { %3523 = vmatpush1.bf16.msra.mxu1 %v3245_v34  ;;  %3687 = vmatpush1.bf16.msra.mxu0 %v3247_v25  ;;  %v3286_v34 = vld [vmem:[#allocation2 + $0x608] sm:$0xff]  ;;  %v3288_v25 = vld [vmem:[#allocation2 + $0x618] sm:$0xff] }
 0x44f   :  { %3524 = vmatprep.subr.bf16.mxu1 %v3250_v16  ;;  %3688 = vmatprep.subr.bf16.mxu0 %v3252_v54  ;;  %v3416_v16 = vpack.c.b16 %v3408_v7, %v3408_v7  ;;  %v3411_v54 = vsel %vm3403_vm1, %v3402_v42, %v3394_v5  ;;  %v3326_v5 = vld [vmem:[#allocation2 + $0x748] sm:$0xff]  ;;  %v3328_v42 = vld [vmem:[#allocation2 + $0x758] sm:$0xff]  ;;  %v3325_v7 = vld [vmem:[#allocation2 + $0x740] sm:$0xff] }
 0x452   :  { %3525 = vmatpush1.bf16.msra.mxu1 %v3249_v40  ;;  %3689 = vmatpush1.bf16.msra.mxu0 %v3251_v17  ;;  %v3292_v40 = vld [vmem:[#allocation2 + $0x638] sm:$0xff]  ;;  %v3419_v17 = vpack.c.b16 %v3411_v54, %v3411_v54  ;;  %v3334_v54 = vld [vmem:[#allocation2 + $0x788] sm:$0xff] }
 0x453   :  { %3526 = vmatprep.subr.bf16.mxu1 %v3254_v32  ;;  %3690 = vmatprep.subr.bf16.mxu0 %v3256_v52  ;;  %v3289_v32 = vld [vmem:[#allocation2 + $0x620] sm:$0xff]  ;;  %v3291_v52 = vld [vmem:[#allocation2 + $0x630] sm:$0xff] }
 0x456   :  { %3527 = vmatpush1.bf16.msra.mxu1 %v3253_v51  ;;  %3691 = vmatpush1.bf16.msra.mxu0 %v3255_v31  ;;  %v3294_v51 = vld [vmem:[#allocation2 + $0x648] sm:$0xff]  ;;  %v3296_v31 = vld [vmem:[#allocation2 + $0x658] sm:$0xff] }
 0x457   :  { %3528 = vmatprep.subr.bf16.mxu1 %v3258_v18  ;;  %3692 = vmatprep.subr.bf16.mxu0 %v3260_v45  ;;  %v3293_v18 = vld [vmem:[#allocation2 + $0x640] sm:$0xff]  ;;  %v3295_v45 = vld [vmem:[#allocation2 + $0x650] sm:$0xff] }
 0x45a   :  { %3529 = vmatpush1.bf16.msra.mxu1 %v3257_v27  ;;  %3693 = vmatpush1.bf16.msra.mxu0 %v3259_v22  ;;  %v3298_v27 = vld [vmem:[#allocation2 + $0x668] sm:$0xff]  ;;  %v3300_v22 = vld [vmem:[#allocation2 + $0x678] sm:$0xff] }
 0x45b   :  { %3530 = vmatprep.subr.bf16.mxu1 %v3262_v63  ;;  %3694 = vmatprep.subr.bf16.mxu0 %v3264_v48  ;;  %v3297_v63 = vld [vmem:[#allocation2 + $0x660] sm:$0xff]  ;;  %v3299_v48 = vld [vmem:[#allocation2 + $0x670] sm:$0xff] }
 0x45e   :  { %3531 = vmatpush1.bf16.msra.mxu1 %v3261_v35  ;;  %3695 = vmatpush1.bf16.msra.mxu0 %v3263_v29  ;;  %v3302_v35 = vld [vmem:[#allocation2 + $0x688] sm:$0xff]  ;;  %v3304_v29 = vld [vmem:[#allocation2 + $0x698] sm:$0xff] }
 0x45f   :  { %3532 = vmatprep.subr.bf16.mxu1 %v3266_v19  ;;  %3696 = vmatprep.subr.bf16.mxu0 %v3268_v30  ;;  %v3301_v19 = vld [vmem:[#allocation2 + $0x680] sm:$0xff]  ;;  %v3303_v30 = vld [vmem:[#allocation2 + $0x690] sm:$0xff] }
 0x462   :  { %3533 = vmatpush1.bf16.msra.mxu1 %v3265_v44  ;;  %3697 = vmatpush1.bf16.msra.mxu0 %v3267_v23  ;;  %v3306_v44 = vld [vmem:[#allocation2 + $0x6a8] sm:$0xff]  ;;  %v3308_v23 = vld [vmem:[#allocation2 + $0x6b8] sm:$0xff] }
 0x463   :  { %3534 = vmatprep.subr.bf16.mxu1 %v3270_v37  ;;  %3698 = vmatprep.subr.bf16.mxu0 %v3272_v38  ;;  %v3305_v37 = vld [vmem:[#allocation2 + $0x6a0] sm:$0xff]  ;;  %v3307_v38 = vld [vmem:[#allocation2 + $0x6b0] sm:$0xff] }
 0x466   :  { %3535 = vmatpush1.bf16.msra.mxu1 %v3269_v15  ;;  %3699 = vmatpush1.bf16.msra.mxu0 %v3271_v53  ;;  %v3310_v15 = vld [vmem:[#allocation2 + $0x6c8] sm:$0xff]  ;;  %v3312_v53 = vld [vmem:[#allocation2 + $0x6d8] sm:$0xff] }
 0x467   :  { %3536 = vmatprep.subr.bf16.mxu1 %v3274_v41  ;;  %3700 = vmatprep.subr.bf16.mxu0 %v3276_v14  ;;  %v3309_v41 = vld [vmem:[#allocation2 + $0x6c0] sm:$0xff]  ;;  %v3311_v14 = vld [vmem:[#allocation2 + $0x6d0] sm:$0xff] }
 0x46a   :  { %3537 = vmatpush1.bf16.msra.mxu1 %v3273_v33  ;;  %3701 = vmatpush1.bf16.msra.mxu0 %v3275_v28  ;;  %v3314_v33 = vld [vmem:[#allocation2 + $0x6e8] sm:$0xff]  ;;  %v3316_v28 = vld [vmem:[#allocation2 + $0x6f8] sm:$0xff] }
 0x46b   :  { %3538 = vmatprep.subr.bf16.mxu1 %v3278_v6  ;;  %3702 = vmatprep.subr.bf16.mxu0 %v3280_v59  ;;  %v3313_v6 = vld [vmem:[#allocation2 + $0x6e0] sm:$0xff]  ;;  %v3315_v59 = vld [vmem:[#allocation2 + $0x6f0] sm:$0xff] }
 0x46e   :  { %3539 = vmatpush1.bf16.msra.mxu1 %v3277_v46  ;;  %3703 = vmatpush1.bf16.msra.mxu0 %v3279_v56  ;;  %v3319_v46 = vld [vmem:[#allocation2 + $0x710] sm:$0xff]  ;;  %v3322_v56 = vld [vmem:[#allocation2 + $0x728] sm:$0xff] }
 0x46f   :  { %3540 = vmatprep.subr.bf16.mxu1 %v3282_v61  ;;  %3704 = vmatprep.subr.bf16.mxu0 %v3284_v58  ;;  %v3324_v61 = vld [vmem:[#allocation2 + $0x738] sm:$0xff]  ;;  %v3321_v58 = vld [vmem:[#allocation2 + $0x720] sm:$0xff] }
 0x472   :  { %3541 = vmatpush1.bf16.msra.mxu1 %v3281_v55  ;;  %3705 = vmatpush1.bf16.msra.mxu0 %v3283_v21  ;;  %v3327_v55 = vld [vmem:[#allocation2 + $0x750] sm:$0xff]  ;;  %v3330_v21 = vld [vmem:[#allocation2 + $0x768] sm:$0xff] }
 0x473   :  { %3551 = vmatprep.subr.bf16.mxu1 %v3286_v34  ;;  %3715 = vmatprep.subr.bf16.mxu0 %v3288_v25  ;;  %v3332_v34 = vld [vmem:[#allocation2 + $0x778] sm:$0xff]  ;;  %v3329_v25 = vld [vmem:[#allocation2 + $0x760] sm:$0xff] }
 0x475   :  { %3543 = vmatmul.mubr.bf16.vlgmr.msra.gmra.mrb[128].mxu1 %v3416_v16  ;;  %3707 = vmatmul.mubr.bf16.vlgmr.msra.gmra.mrb[160].mxu0 %v3416_v16  ;;  %v3331_v16 = vld [vmem:[#allocation2 + $0x770] sm:$0xff] }
 0x476   :  { %3552 = vmatpush1.bf16.msra.mxu1 %v3285_v26  ;;  %3716 = vmatpush1.bf16.msra.mxu0 %v3287_v24  ;;  %v3336_v26 = vld [vmem:[#allocation2 + $0x798] sm:$0xff]  ;;  %v3333_v24 = vld [vmem:[#allocation2 + $0x780] sm:$0xff] }
 0x477   :  { %3553 = vmatprep.subr.bf16.mxu1 %v3290_v47  ;;  %3717 = vmatprep.subr.bf16.mxu0 %v3292_v40  ;;  %v3335_v47 = vld [vmem:[#allocation2 + $0x790] sm:$0xff]  ;;  %v3338_v40 = vld [vmem:[#allocation2 + $0x7a8] sm:$0xff] }
 0x478   :  { %3583 = vmatprep.mubr.bf16.mxu1 %v3419_v17  ;;  %3747 = vmatprep.mubr.bf16.mxu0 %v3419_v17  ;;  %v3340_v17 = vld [vmem:[#allocation2 + $0x7b8] sm:$0xff] }
 0x47a   :  { %3554 = vmatpush1.bf16.msra.mxu1 %v3289_v32  ;;  %3718 = vmatpush1.bf16.msra.mxu0 %v3291_v52  ;;  %v3337_v32 = vld [vmem:[#allocation2 + $0x7a0] sm:$0xff]  ;;  %v3339_v52 = vld [vmem:[#allocation2 + $0x7b0] sm:$0xff] }
 0x47b   :  { %3555 = vmatprep.subr.bf16.mxu1 %v3294_v51  ;;  %3719 = vmatprep.subr.bf16.mxu0 %v3296_v31  ;;  %v3342_v51 = vld [vmem:[#allocation2 + $0x7c8] sm:$0xff]  ;;  %v3344_v31 = vld [vmem:[#allocation2 + $0x7d8] sm:$0xff] }
 0x47e   :  { %3556 = vmatpush1.bf16.msra.mxu1 %v3293_v18  ;;  %3720 = vmatpush1.bf16.msra.mxu0 %v3295_v45  ;;  %v6011_v18 = vpack.i.bf16 %v5758_v62, %v5758_v62 }
 0x47f   :  { %3557 = vmatprep.subr.bf16.mxu1 %v3298_v27  ;;  %3721 = vmatprep.subr.bf16.mxu0 %v3300_v22  ;;  %v3401_v27 = vunpack.c.l.b16 %v3071_v57  ;;  %v3341_v22 = vld [vmem:[#allocation2 + $0x7c0] sm:$0xff]  ;;  %v3354_v57 = vrot.slane %v3349_v20, %v5355_v50 }
 0x480   :  { %v3393_v45 = vunpack.c.l.b16 %v6011_v18 }
 0x482   :  { %3558 = vmatpush1.bf16.msra.mxu1 %v3297_v63  ;;  %3722 = vmatpush1.bf16.msra.mxu0 %v3299_v48  ;;  %v3343_v63 = vld [vmem:[#allocation2 + $0x7d0] sm:$0xff]  ;;  %v3346_v48 = vld [vmem:[#allocation2 + $0x7e8] sm:$0xff] }
 0x483   :  { %3559 = vmatprep.subr.bf16.mxu1 %v3302_v35  ;;  %3723 = vmatprep.subr.bf16.mxu0 %v3304_v29  ;;  %v3348_v35 = vld [vmem:[#allocation2 + $0x7f8] sm:$0xff]  ;;  %v3410_v29 = vsel %vm3403_vm1, %v3401_v27, %v3393_v45 }
 0x484   :  { %v3418_v62 = vpack.c.b16 %v3410_v29, %v3410_v29 }
 0x486   :  { %3560 = vmatpush1.bf16.msra.mxu1 %v3301_v19  ;;  %3724 = vmatpush1.bf16.msra.mxu0 %v3303_v30  ;;  %v3345_v19 = vld [vmem:[#allocation2 + $0x7e0] sm:$0xff]  ;;  %v3347_v30 = vld [vmem:[#allocation2 + $0x7f0] sm:$0xff] }
 0x487   :  { %3561 = vmatprep.subr.bf16.mxu1 %v3306_v44  ;;  %3725 = vmatprep.subr.bf16.mxu0 %v3308_v23  ;;  %v6012_v44 = vsub.s32 2, %v5348_v49 }
 0x489   :  { %v3362_v23 = vrot.slane %v3349_v20, %v6012_v44 }
 0x48a   :  { %3562 = vmatpush1.bf16.msra.mxu1 %v3305_v37  ;;  %3726 = vmatpush1.bf16.msra.mxu0 %v3307_v38  ;;  %v3358_v37 = vrot.slane %v3349_v20, %v5362_v36  ;;  %v6013_v38 = vsub.s32 3, %v5348_v49 }
 0x48b   :  { %3563 = vmatprep.subr.bf16.mxu1 %v3310_v15  ;;  %3727 = vmatprep.subr.bf16.mxu0 %v3312_v53 }
 0x48c   :  { %v3366_v15 = vrot.slane %v3349_v20, %v6013_v38 }
 0x48e   :  { %3564 = vmatpush1.bf16.msra.mxu1 %v3309_v41  ;;  %3728 = vmatpush1.bf16.msra.mxu0 %v3311_v14 }
 0x48f   :  { %3565 = vmatprep.subr.bf16.mxu1 %v3314_v33  ;;  %3729 = vmatprep.subr.bf16.mxu0 %v3316_v28 }
 0x492   :  { %3566 = vmatpush1.bf16.msra.mxu1 %v3313_v6  ;;  %3730 = vmatpush1.bf16.msra.mxu0 %v3315_v59 }
 0x493   :  { %3567 = vmatprep.subr.bf16.mxu1 %v3318_v13  ;;  %3731 = vmatprep.subr.bf16.mxu0 %v3320_v39 }
 0x496   :  { %3568 = vmatpush1.bf16.msra.mxu1 %v3317_v43  ;;  %3732 = vmatpush1.bf16.msra.mxu0 %v3319_v46 }
 0x497   :  { %3569 = vmatprep.subr.bf16.mxu1 %v3322_v56  ;;  %3733 = vmatprep.subr.bf16.mxu0 %v3324_v61 }
 0x49a   :  { %3570 = vmatpush1.bf16.msra.mxu1 %v3321_v58  ;;  %3734 = vmatpush1.bf16.msra.mxu0 %v3323_v60 }
 0x49b   :  { %3571 = vmatprep.subr.bf16.mxu1 %v3326_v5  ;;  %3735 = vmatprep.subr.bf16.mxu0 %v3328_v42 }
 0x49e   :  { %3572 = vmatpush1.bf16.msra.mxu1 %v3325_v7  ;;  %3736 = vmatpush1.bf16.msra.mxu0 %v3327_v55 }
 0x49f   :  { %3573 = vmatprep.subr.bf16.mxu1 %v3330_v21  ;;  %3737 = vmatprep.subr.bf16.mxu0 %v3332_v34 }
 0x4a2   :  { %3574 = vmatpush1.bf16.msra.mxu1 %v3329_v25  ;;  %3738 = vmatpush1.bf16.msra.mxu0 %v3331_v16 }
 0x4a3   :  { %3575 = vmatprep.subr.bf16.mxu1 %v3334_v54  ;;  %3739 = vmatprep.subr.bf16.mxu0 %v3336_v26 }
 0x4a6   :  { %3576 = vmatpush1.bf16.msra.mxu1 %v3333_v24  ;;  %3740 = vmatpush1.bf16.msra.mxu0 %v3335_v47 }
 0x4a7   :  { %3577 = vmatprep.subr.bf16.mxu1 %v3338_v40  ;;  %3741 = vmatprep.subr.bf16.mxu0 %v3340_v17 }
 0x4aa   :  { %3578 = vmatpush1.bf16.msra.mxu1 %v3337_v32  ;;  %3742 = vmatpush1.bf16.msra.mxu0 %v3339_v52 }
 0x4ab   :  { %3579 = vmatprep.subr.bf16.mxu1 %v3342_v51  ;;  %3743 = vmatprep.subr.bf16.mxu0 %v3344_v31 }
 0x4ae   :  { %3580 = vmatpush1.bf16.msra.mxu1 %v3341_v22  ;;  %3744 = vmatpush1.bf16.msra.mxu0 %v3343_v63 }
 0x4af   :  { %3581 = vmatprep.subr.bf16.mxu1 %v3346_v48  ;;  %3745 = vmatprep.subr.bf16.mxu0 %v3348_v35 }
 0x4b2   :  { %3582 = vmatpush1.bf16.msra.mxu1 %v3345_v19  ;;  %3746 = vmatpush1.bf16.msra.mxu0 %v3347_v30 }
 0x4b5   :  { %3584 = vmatmul.mubr.bf16.vlgmr.msra.gmra.mrb[128].mxu1 %v3418_v62  ;;  %3748 = vmatmul.mubr.bf16.vlgmr.msra.gmra.mrb[160].mxu0 %v3418_v62 }
 0x588   :  { %v3585_v53 = vpop.f32.mrb[128].mxu1  ;;  %v3749_v41 = vpop.f32.mrb[160].mxu0 }
 0x589   :  { %v5929_v14 = vadd.f32 %v3585_v53, %v3354_v57  ;;  %v5931_v33 = vadd.f32 %v3749_v41, %v3362_v23  ;;  %v3587_v28 = vpop.f32.mrb[129].mxu1  ;;  %v3751_v6 = vpop.f32.mrb[161].mxu0 }
 0x58a   :  { %v4301_v59 = vadd.f32 %v3587_v28, %v3358_v37  ;;  %v5933_v13 = vadd.f32 %v3751_v6, %v3366_v15  ;;  %v3589_v39 = vpop.f32.mrb[130].mxu1  ;;  %v3753_v43 = vpop.f32.mrb[162].mxu0 }
 0x58b   :  { %v3756_v46 = vmax.f32 %v5929_v14, 0.0  ;;  %v3758_v56 = vmax.f32 %v5931_v33, 0.0  ;;  %v3590_v61 = vpop.f32.mrb[131].mxu1  ;;  %v3754_v49 = vpop.f32.mrb[163].mxu0 }
 0x58c   :  { %v3757_v58 = vmax.f32 %v4301_v59, 0.0  ;;  %v3759_v60 = vmax.f32 %v5933_v13, 0.0 }
 0x58d   :  { %4709 = dma.done.wait [#allocation5 + $0x1], 8192 }
 0x58e   :  { %4710 = vsyncadd [#allocation5 + $0x1], 4294959104  ;;  %v3765_v5 = vpack.c.bf16 %v3757_v58, %v3757_v58  ;;  %v3769_v42 = vld [vmem:[#allocation3 + $0x8] sm:$0xff]  ;;  %v3768_v7 = vld [vmem:[#allocation3] sm:$0xff]  ;;  %v3764_v38 = vpack.c.bf16 %v3756_v46, %v3756_v46  ;;  %v3767_v15 = vpack.c.bf16 %v3759_v60, %v3759_v60  ;;  %4238 = vmatprep.subr.bf16.mxu0 %v4862_v8 }
 0x58f   :  { %v3771_v55 = vld [vmem:[#allocation3 + $0x18] sm:$0xff]  ;;  %3844 = vmatprep.subr.bf16.mxu1 %v3769_v42  ;;  %v3770_v21 = vld [vmem:[#allocation3 + $0x10] sm:$0xff]  ;;  %v3773_v34 = vld [vmem:[#allocation3 + $0x28] sm:$0xff] }
 0x590   :  { %3876 = vmatprep.mubr.bf16.mxu1 %v3765_v5  ;;  %3845 = vmatpush1.bf16.msra.mxu1 %v3768_v7  ;;  %v3772_v25 = vld [vmem:[#allocation3 + $0x20] sm:$0xff]  ;;  %v3775_v16 = vld [vmem:[#allocation3 + $0x38] sm:$0xff]  ;;  %v3774_v54 = vld [vmem:[#allocation3 + $0x30] sm:$0xff] }
 0x591   :  { %3846 = vmatprep.subr.bf16.mxu1 %v3771_v55  ;;  %v3777_v26 = vld [vmem:[#allocation3 + $0x48] sm:$0xff]  ;;  %v3776_v24 = vld [vmem:[#allocation3 + $0x40] sm:$0xff]  ;;  %v3779_v47 = vld [vmem:[#allocation3 + $0x58] sm:$0xff] }
 0x592   :  { %v3778_v40 = vld [vmem:[#allocation3 + $0x50] sm:$0xff]  ;;  %v3781_v17 = vld [vmem:[#allocation3 + $0x68] sm:$0xff]  ;;  %v3780_v32 = vld [vmem:[#allocation3 + $0x60] sm:$0xff] }
 0x593   :  { %v3783_v52 = vld [vmem:[#allocation3 + $0x78] sm:$0xff]  ;;  %v3782_v51 = vld [vmem:[#allocation3 + $0x70] sm:$0xff]  ;;  %v3785_v31 = vld [vmem:[#allocation3 + $0x88] sm:$0xff] }
 0x594   :  { %3847 = vmatpush1.bf16.msra.mxu1 %v3770_v21  ;;  %v3784_v18 = vld [vmem:[#allocation3 + $0x80] sm:$0xff]  ;;  %v3787_v45 = vld [vmem:[#allocation3 + $0x98] sm:$0xff]  ;;  %v3786_v27 = vld [vmem:[#allocation3 + $0x90] sm:$0xff] }
 0x595   :  { %3848 = vmatprep.subr.bf16.mxu1 %v3773_v34  ;;  %v3789_v22 = vld [vmem:[#allocation3 + $0xa8] sm:$0xff]  ;;  %v3788_v63 = vld [vmem:[#allocation3 + $0xa0] sm:$0xff]  ;;  %v3791_v48 = vld [vmem:[#allocation3 + $0xb8] sm:$0xff] }
 0x596   :  { %v3790_v35 = vld [vmem:[#allocation3 + $0xb0] sm:$0xff]  ;;  %v3793_v29 = vld [vmem:[#allocation3 + $0xc8] sm:$0xff]  ;;  %v3792_v19 = vld [vmem:[#allocation3 + $0xc0] sm:$0xff] }
 0x597   :  { %v3795_v30 = vld [vmem:[#allocation3 + $0xd8] sm:$0xff]  ;;  %v3794_v62 = vld [vmem:[#allocation3 + $0xd0] sm:$0xff]  ;;  %v3797_v20 = vld [vmem:[#allocation3 + $0xe8] sm:$0xff] }
 0x598   :  { %3849 = vmatpush1.bf16.msra.mxu1 %v3772_v25  ;;  %v3796_v57 = vld [vmem:[#allocation3 + $0xe0] sm:$0xff]  ;;  %v3799_v44 = vld [vmem:[#allocation3 + $0xf8] sm:$0xff]  ;;  %v3798_v23 = vld [vmem:[#allocation3 + $0xf0] sm:$0xff] }
 0x599   :  { %3850 = vmatprep.subr.bf16.mxu1 %v3775_v16  ;;  %v3801_v37 = vld [vmem:[#allocation3 + $0x108] sm:$0xff]  ;;  %v3800_v53 = vld [vmem:[#allocation3 + $0x100] sm:$0xff]  ;;  %v3803_v41 = vld [vmem:[#allocation3 + $0x118] sm:$0xff] }
 0x59a   :  { %v3802_v28 = vld [vmem:[#allocation3 + $0x110] sm:$0xff]  ;;  %v3805_v6 = vld [vmem:[#allocation3 + $0x128] sm:$0xff]  ;;  %v3804_v59 = vld [vmem:[#allocation3 + $0x120] sm:$0xff] }
 0x59b   :  { %v3807_v14 = vld [vmem:[#allocation3 + $0x138] sm:$0xff]  ;;  %v3806_v39 = vld [vmem:[#allocation3 + $0x130] sm:$0xff]  ;;  %v3809_v43 = vld [vmem:[#allocation3 + $0x148] sm:$0xff] }
 0x59c   :  { %3851 = vmatpush1.bf16.msra.mxu1 %v3774_v54  ;;  %v3808_v13 = vld [vmem:[#allocation3 + $0x140] sm:$0xff]  ;;  %v3811_v46 = vld [vmem:[#allocation3 + $0x158] sm:$0xff]  ;;  %v3810_v61 = vld [vmem:[#allocation3 + $0x150] sm:$0xff] }
 0x59d   :  { %3852 = vmatprep.subr.bf16.mxu1 %v3777_v26  ;;  %v3813_v49 = vld [vmem:[#allocation3 + $0x168] sm:$0xff]  ;;  %v3812_v58 = vld [vmem:[#allocation3 + $0x160] sm:$0xff]  ;;  %v3815_v60 = vld [vmem:[#allocation3 + $0x178] sm:$0xff] }
 0x59e   :  { %v3814_v5 = vld [vmem:[#allocation3 + $0x170] sm:$0xff]  ;;  %v3817_v42 = vld [vmem:[#allocation3 + $0x188] sm:$0xff]  ;;  %v3816_v7 = vld [vmem:[#allocation3 + $0x180] sm:$0xff] }
 0x59f   :  { %v3819_v55 = vld [vmem:[#allocation3 + $0x198] sm:$0xff]  ;;  %v3818_v21 = vld [vmem:[#allocation3 + $0x190] sm:$0xff]  ;;  %v3821_v34 = vld [vmem:[#allocation3 + $0x1a8] sm:$0xff] }
 0x5a0   :  { %3853 = vmatpush1.bf16.msra.mxu1 %v3776_v24  ;;  %v3820_v25 = vld [vmem:[#allocation3 + $0x1a0] sm:$0xff]  ;;  %v3823_v16 = vld [vmem:[#allocation3 + $0x1b8] sm:$0xff]  ;;  %v3822_v54 = vld [vmem:[#allocation3 + $0x1b0] sm:$0xff] }
 0x5a1   :  { %3854 = vmatprep.subr.bf16.mxu1 %v3779_v47  ;;  %v3825_v26 = vld [vmem:[#allocation3 + $0x1c8] sm:$0xff]  ;;  %v3824_v24 = vld [vmem:[#allocation3 + $0x1c0] sm:$0xff]  ;;  %v3827_v47 = vld [vmem:[#allocation3 + $0x1d8] sm:$0xff] }
 0x5a4   :  { %3855 = vmatpush1.bf16.msra.mxu1 %v3778_v40  ;;  %v3826_v40 = vld [vmem:[#allocation3 + $0x1d0] sm:$0xff] }
 0x5a5   :  { %3856 = vmatprep.subr.bf16.mxu1 %v3781_v17  ;;  %v3829_v17 = vld [vmem:[#allocation3 + $0x1e8] sm:$0xff] }
 0x5a8   :  { %3857 = vmatpush1.bf16.msra.mxu1 %v3780_v32  ;;  %v3828_v32 = vld [vmem:[#allocation3 + $0x1e0] sm:$0xff] }
 0x5a9   :  { %3858 = vmatprep.subr.bf16.mxu1 %v3783_v52  ;;  %v3831_v52 = vld [vmem:[#allocation3 + $0x1f8] sm:$0xff] }
 0x5ac   :  { %3859 = vmatpush1.bf16.msra.mxu1 %v3782_v51  ;;  %v3830_v51 = vld [vmem:[#allocation3 + $0x1f0] sm:$0xff] }
 0x5ad   :  { %3860 = vmatprep.subr.bf16.mxu1 %v3785_v31  ;;  %v3766_v31 = vpack.c.bf16 %v3758_v56, %v3758_v56 }
 0x5b0   :  { %3861 = vmatpush1.bf16.msra.mxu1 %v3784_v18  ;;  %v3832_v18 = vld [vmem:[%s5987_s4 + $0xe] sm:$0x3] }
 0x5b1   :  { %3862 = vmatprep.subr.bf16.mxu1 %v3787_v45  ;;  %v3837_v45 = vrot.slane %v3832_v18, %v5355_v50 }
 0x5b4   :  { %3863 = vmatpush1.bf16.msra.mxu1 %v3786_v27  ;;  %v3841_v27 = vrot.slane %v3832_v18, %v5362_v36 }
 0x5b5   :  { %3864 = vmatprep.subr.bf16.mxu1 %v3789_v22 }
 0x5b8   :  { %3865 = vmatpush1.bf16.msra.mxu1 %v3788_v63 }
 0x5b9   :  { %3866 = vmatprep.subr.bf16.mxu1 %v3791_v48 }
 0x5bc   :  { %3867 = vmatpush1.bf16.msra.mxu1 %v3790_v35 }
 0x5bd   :  { %3868 = vmatprep.subr.bf16.mxu1 %v3793_v29 }
 0x5c0   :  { %3869 = vmatpush1.bf16.msra.mxu1 %v3792_v19 }
 0x5c1   :  { %3870 = vmatprep.subr.bf16.mxu1 %v3795_v30 }
 0x5c4   :  { %3871 = vmatpush1.bf16.msra.mxu1 %v3794_v62 }
 0x5c5   :  { %3872 = vmatprep.subr.bf16.mxu1 %v3797_v20 }
 0x5c8   :  { %3873 = vmatpush1.bf16.msra.mxu1 %v3796_v57 }
 0x5c9   :  { %3874 = vmatprep.subr.bf16.mxu1 %v3799_v44 }
 0x5cc   :  { %3875 = vmatpush1.bf16.msra.mxu1 %v3798_v23 }
 0x5cd   :  { %3885 = vmatprep.subr.bf16.mxu1 %v3801_v37 }
 0x5cf   :  { %3877 = vmatmul.mubr.bf16.vlgmr.msra.gmra.mrb[132].mxu1 %v3764_v38 }
 0x5d0   :  { %3886 = vmatpush1.bf16.msra.mxu1 %v3800_v53  ;;  %3917 = vmatprep.mubr.bf16.mxu1 %v3767_v15 }
 0x5d1   :  { %3887 = vmatprep.subr.bf16.mxu1 %v3803_v41 }
 0x5d4   :  { %3888 = vmatpush1.bf16.msra.mxu1 %v3802_v28 }
 0x5d5   :  { %3889 = vmatprep.subr.bf16.mxu1 %v3805_v6 }
 0x5d8   :  { %3890 = vmatpush1.bf16.msra.mxu1 %v3804_v59 }
 0x5d9   :  { %3891 = vmatprep.subr.bf16.mxu1 %v3807_v14 }
 0x5dc   :  { %3892 = vmatpush1.bf16.msra.mxu1 %v3806_v39 }
 0x5dd   :  { %3893 = vmatprep.subr.bf16.mxu1 %v3809_v43 }
 0x5e0   :  { %3894 = vmatpush1.bf16.msra.mxu1 %v3808_v13 }
 0x5e1   :  { %3895 = vmatprep.subr.bf16.mxu1 %v3811_v46 }
 0x5e4   :  { %3896 = vmatpush1.bf16.msra.mxu1 %v3810_v61 }
 0x5e5   :  { %3897 = vmatprep.subr.bf16.mxu1 %v3813_v49 }
 0x5e8   :  { %3898 = vmatpush1.bf16.msra.mxu1 %v3812_v58 }
 0x5e9   :  { %3899 = vmatprep.subr.bf16.mxu1 %v3815_v60 }
 0x5ec   :  { %3900 = vmatpush1.bf16.msra.mxu1 %v3814_v5 }
 0x5ed   :  { %3901 = vmatprep.subr.bf16.mxu1 %v3817_v42 }
 0x5f0   :  { %3902 = vmatpush1.bf16.msra.mxu1 %v3816_v7 }
 0x5f1   :  { %3903 = vmatprep.subr.bf16.mxu1 %v3819_v55 }
 0x5f4   :  { %3904 = vmatpush1.bf16.msra.mxu1 %v3818_v21 }
 0x5f5   :  { %3905 = vmatprep.subr.bf16.mxu1 %v3821_v34 }
 0x5f8   :  { %3906 = vmatpush1.bf16.msra.mxu1 %v3820_v25 }
 0x5f9   :  { %3907 = vmatprep.subr.bf16.mxu1 %v3823_v16 }
 0x5fc   :  { %3908 = vmatpush1.bf16.msra.mxu1 %v3822_v54 }
 0x5fd   :  { %3909 = vmatprep.subr.bf16.mxu1 %v3825_v26 }
 0x600   :  { %3910 = vmatpush1.bf16.msra.mxu1 %v3824_v24 }
 0x601   :  { %3911 = vmatprep.subr.bf16.mxu1 %v3827_v47 }
 0x604   :  { %3912 = vmatpush1.bf16.msra.mxu1 %v3826_v40 }
 0x605   :  { %3913 = vmatprep.subr.bf16.mxu1 %v3829_v17 }
 0x608   :  { %3914 = vmatpush1.bf16.msra.mxu1 %v3828_v32 }
 0x609   :  { %3915 = vmatprep.subr.bf16.mxu1 %v3831_v52 }
 0x60c   :  { %3916 = vmatpush1.bf16.msra.mxu1 %v3830_v51 }
 0x60f   :  { %3918 = vmatmul.mubr.bf16.vlgmr.msra.gmra.mrb[132].mxu1 %v3766_v31 }
 0x6e2   :  { %v3919_v22 = vpop.f32.mrb[132].mxu1 }
 0x6e3   :  { %v4304_v63 = vadd.f32 %v3919_v22, %v3837_v45  ;;  %v3921_v48 = vpop.f32.mrb[133].mxu1 }
 0x6e4   :  { %v4305_v35 = vadd.f32 %v3921_v48, %v3841_v27  ;;  %v3923_v29 = vpop.f32.mrb[134].mxu1 }
 0x6e5   :  { %v3926_v19 = vmax.f32 %v4304_v63, 0.0  ;;  %v3924_v30 = vpop.f32.mrb[135].mxu1 }
 0x6e6   :  { %v3927_v33 = vmax.f32 %v4305_v35, 0.0 }
 0x6e8   :  { %v3933_v56 = vpack.c.bf16 %v3927_v33, %v3927_v33 }
 0x6e9   :  { %4711 = dma.done.wait [#allocation5 + $0x2], 2048 }
 0x6ea   :  { %4712 = vsyncadd [#allocation5 + $0x2], 4294965248  ;;  %4239 = vmatpush3.bf16.msra.mxu0 %v4822_v0  ;;  %3989 = vmatprep.mubr.bf16.mxu0 %v3933_v56  ;;  %v6014_v8 = vld [vmem:[#allocation26_spill] sm:$0xff]  ;;  %v6015_v0 = vld [vmem:[#allocation23_spill] sm:$0xff]  ;;  %s4733_s28 = smov [#allocation11]  }
 0x6eb   :  { %4240 = vmatprep.subr.bf16.mxu0 %v4867_v9  ;;  %v6016_v9 = vld [vmem:[#allocation27_spill] sm:$0xff]  ;;  %v6017_v50 = vld [vmem:[#allocation24_spill] sm:$0xff]  ;;  %s4004_s30 = sshll.u32 %s4733_s28, 4  ;;  %s4005_s30 = int_to_ptr.vmem [resolvable:$true] %s4004_s30 }
 0x6ec   :  { %s4681_s9 = scalar_lea.vmem %s4005_s30, 32  ;;  %p4686_p3 = scmp.lt.s32.totalorder %s4005_s30, %s4005_s30 }
 0x6ed   :  { %p4682_p2 = scmp.ne.s32.totalorder %s4005_s30, %s4681_s9  ;;  %p4687_p4 = scmp.lt.s32.totalorder %s4681_s9, %s4681_s9 }
 0x6ee   :  { %4241 = vmatpush3.bf16.msra.mxu0 %v4827_v1  ;;  %v6018_v1 = vld [vmem:[#allocation28_spill] sm:$0xff] }
 0x6ef   :  { %4242 = vmatprep.subr.bf16.mxu0 %v4872_v10  ;;  %v3932_v10 = vpack.c.bf16 %v3926_v19, %v3926_v19  ;;  %p4688_p5 = por %p4687_p4, %p4686_p3 }
 0x6f1   :  { %p4689_p6 = pnand %p4688_p5, %p4682_p2 }
 0x6f2   :  { %4243 = vmatpush3.bf16.msra.mxu0 %v4832_v2  ;;  %v6019_v2 = vld [vmem:[#allocation25_spill] sm:$0xff] }
 0x6f3   :  { %4244 = vmatprep.subr.bf16.mxu0 %v4877_v11 }
 0x6f6   :  { %4245 = vmatpush3.bf16.msra.mxu0 %v4837_v3  ;;  %v4135_v3 = vld [vmem:[%s5987_s4 + $0x10] ss:$0 sm:$0xff] }
 0x6f7   :  { %4246 = vmatprep.subr.bf16.mxu0 %v4882_v12 }
 0x6fa   :  { %4247 = vmatpush3.bf16.msra.mxu0 %v4842_v4 }
 0x6fb   :  { %4248 = vmatprep.subr.bf16.mxu0 %v6014_v8 }
 0x6fe   :  { %4249 = vmatpush3.bf16.msra.mxu0 %v6015_v0 }
 0x6ff   :  { %4250 = vmatprep.subr.bf16.mxu0 %v6016_v9 }
 0x702   :  { %4251 = vmatpush3.bf16.msra.mxu0 %v6017_v50 }
 0x703   :  { %4252 = vmatprep.subr.bf16.mxu0 %v6018_v1 }
 0x706   :  { %4253 = vmatpush3.bf16.msra.mxu0 %v6019_v2 }
 0x709   :  { %3990 = vmatmul.mubr.bf16.vlgmr.msra.gmra.mrb[164].mxu0 %v3932_v10 }
 0x7dc   :  { %v4254_v11 = vpop.f32.mrb[164].mxu0 }
 0x7dd   :  { %v4255_v4 = vpop.f32.mrb[165].mxu0 }
 0x7de   :  { %v4256_v12 = vadd.f32 %v4255_v4, %v4254_v11  ;;  %v4257_v36 = vpop.f32.mrb[166].mxu0 }
 0x7df   :  { %v4258_v62 = vpop.f32.mrb[167].mxu0 }
 0x7e0   :  { %v3992_v20 = vadd.f32 %v4256_v12, %v4135_v3 }
 0x7e2   :  { %3997 = vst [vmem:[#allocation11] sm:$0x3] %v3992_v20 }
 0x7e3   :  { %4692 = shalt.err (!%p4689_p6)
}
 0x7e4   :  { %s4693_s4 = scalar_lea.hbm %s5991_s8, 32 }
 0x7e5   :  { %p4694_p7 = scmp.ne.s32.totalorder %s5991_s8, %s4693_s4  ;;  %p4697_p8 = scmp.lt.u32.totalorder %s4693_s4, %s5991_s8 }
 0x7e7   :  { %p4699_p9 = pnand %p4697_p8, %p4694_p7 }
 0x7e9   :  { %4702 = shalt.err (!%p4699_p9)
}
 0x7ea   :  { %4007 = dma.vmem_to_hbm [thread:$0]  %s4005_s30, 32, %s5991_s8, [#allocation8]  }
 0x7eb   :  { %4713 = dma.done.wait [#allocation8], 32  }
 0x7ec   :  { %4714 = vsyncadd [#allocation8], 4294967264 }
 0x7ed   :  { %4011 = vsyncpa [#allocation7], 1 }
 0x7ee   :  { %4012 = vsyncpa [#allocation10], 1 }
 0x7ef   :  { %4013 = vsyncpa [#allocation8], 1 }
 0x7f0   :  { %4014 = vsyncmov [#allocation5] }
 0x7f3   :  { %s4015_s13 = vpop.sfrf %4014 }
 0x7f4   :  { %p4136_p10 = scmp.ne.s32.totalorder %s4015_s13, 0 }
 0x7f6   :  { %4019 = shalt.err (%p4136_p10)  }
 0x7f7   :  { %4021 = vsyncmov [#allocation5 + $0x1] }
 0x7fa   :  { %s4022_s3 = vpop.sfrf %4021 }
 0x7fb   :  { %p4137_p11 = scmp.ne.s32.totalorder %s4022_s3, 0 }
 0x7fd   :  { %4026 = shalt.err (%p4137_p11)  }
 0x7fe   :  { %4028 = vsyncmov [#allocation5 + $0x2] }
 0x801   :  { %s4029_s14 = vpop.sfrf %4028 }
 0x802   :  { %p4138_p12 = scmp.ne.s32.totalorder %s4029_s14, 0 }
 0x804   :  { %4033 = shalt.err (%p4138_p12)  }

</bundles_post_ra>
